<compile_context>
chip_gen: v7x
topology: tpu7x:2x2x1
jax: 0.10.0
libtpu: 0.0.40
codegen_flags: <defaults>
</compile_context>

<pallas_src>
import jax
import jax.numpy as jnp
from jax import lax
from jax.experimental import pallas as pl
from jax.experimental.pallas import tpu as pltpu

HIDDEN = 128          # hidden_dim
FFN = 32              # ffn_dim
HEADS = 4             # head_size
DK = HIDDEN // HEADS  # att_size per head
N_LAYERS = 4
LN_EPS = 1e-5

# rows of the packed per-layer vector block  [NVEC, HIDDEN]
LN1_G, LN1_B, BQ, BK, BV, BO, LN2_G, LN2_B, B1, B2 = range(10)
NVEC = 10
_VEC_ROW_NAMES = ["ln1_g", "ln1_b", "bq", "bk", "bv", "bo",
                  "ln2_g", "ln2_b", "b1", "b2"]


def _layernorm(x, g, b):
    mu = jnp.mean(x, axis=-1, keepdims=True)
    var = jnp.mean((x - mu) ** 2, axis=-1, keepdims=True)
    return (x - mu) * lax.rsqrt(var + LN_EPS) * g + b


def _gelu(x):
    # exact (erf-based) GELU, matching nn.GELU() default
    return 0.5 * x * (1.0 + lax.erf(x * (2.0 ** -0.5)))


# --------------------------------------------------------------------------
# Fused kernel: all N_LAYERS encoder layers + final LayerNorm for one batch
# block, statically unrolled over the layer dim of the weight blocks.
# --------------------------------------------------------------------------
def fused_encoder_kernel(x_ref, bias_ref, wqkv_ref, wo_ref, w1_ref, w2_ref,
                         vec_ref, fln_ref, out_ref):
    bblk, S, H = x_ref.shape
    heads = bias_ref.shape[0]
    dk = H // heads
    L = wqkv_ref.shape[0]
    M = bblk * S

    x = x_ref[...].reshape(M, H)                          # [M, H] f32
    # bias pre-packed host-side as [heads, B, S, S]; block -> head-major batch
    bias = bias_ref[...].reshape(heads * bblk, S, S)      # [heads*bblk, S, S]

    def split_heads(t):
        # [M, H] -> [heads*bblk, S, dk], head-major along the batch dim
        return jnp.concatenate(
            [t[:, h * dk:(h + 1) * dk].reshape(bblk, S, dk)
             for h in range(heads)], axis=0)

    for layer in range(L):                                # static unroll, L=4
        vec = vec_ref[layer]                              # [NVEC, H] f32

        # ---------------- self-attention sub-layer ----------------
        y = _layernorm(x, vec[LN1_G:LN1_G + 1], vec[LN1_B:LN1_B + 1])
        qkv = jnp.dot(y.astype(jnp.bfloat16), wqkv_ref[layer],
                      preferred_element_type=jnp.float32)      # [M, 3H] f32
        # dk**-0.5 already folded into wq / bq at pack time
        q = (qkv[:, 0:H] + vec[BQ:BQ + 1]).astype(jnp.bfloat16)
        k = (qkv[:, H:2 * H] + vec[BK:BK + 1]).astype(jnp.bfloat16)
        v = (qkv[:, 2 * H:3 * H] + vec[BV:BV + 1]).astype(jnp.bfloat16)

        qh, kh, vh = split_heads(q), split_heads(k), split_heads(v)
        s = jnp.einsum('bqd,bkd->bqk', qh, kh,
                       preferred_element_type=jnp.float32) + bias
        s = s - jnp.max(s, axis=-1, keepdims=True)
        p = jnp.exp(s)
        p = p * pl.reciprocal(jnp.sum(p, axis=-1, keepdims=True), approx=True)
        ctx = jnp.einsum('bqk,bkd->bqd', p.astype(jnp.bfloat16), vh,
                         preferred_element_type=jnp.float32)   # [hb, S, dk]
        # reassemble heads along the lane axis (head-major), in registers
        ctx = jnp.concatenate(
            [ctx[h * bblk:(h + 1) * bblk].reshape(M, dk)
             for h in range(heads)], axis=-1)                  # [M, H]

        attn = jnp.dot(ctx.astype(jnp.bfloat16), wo_ref[layer],
                       preferred_element_type=jnp.float32) + vec[BO:BO + 1]
        x = x + attn                                           # residual f32

        # ---------------- feed-forward sub-layer (lane-dense, ffn padded) ---
        y = _layernorm(x, vec[LN2_G:LN2_G + 1], vec[LN2_B:LN2_B + 1])
        h1 = jnp.dot(y.astype(jnp.bfloat16), w1_ref[layer],
                     preferred_element_type=jnp.float32) + vec[B1:B1 + 1]
        h1 = _gelu(h1)                                         # [M, 128]
        h2 = jnp.dot(h1.astype(jnp.bfloat16), w2_ref[layer],
                     preferred_element_type=jnp.float32) + vec[B2:B2 + 1]
        x = x + h2                                             # residual f32

    fln = fln_ref[...]
    out = _layernorm(x, fln[0:1], fln[1:2])
    out_ref[...] = out.reshape(bblk, S, H).astype(out_ref.dtype)


def _num_tensorcores():
    """Best-effort TensorCore-per-device count (1 if undetectable)."""
    try:
        dev = jax.devices()[0]
        for attr in ("num_cores", "core_count"):
            n = getattr(dev, attr, None)
            if isinstance(n, int) and n > 0:
                return n
    except Exception:
        pass
    return 1


def _choose_bblk(B, S, *, row_cap=1024, num_cores=None):
    """Largest divisor of B with bblk*S <= row_cap rows.

    Never force a split on single-TC chips (v5e/v6e).  On multi-TC chips
    (v7x) only split when each block still gets >= 256 rows — splitting tiny
    work just doubles per-grid-step overhead.
    """
    if num_cores is None:
        num_cores = _num_tensorcores()
    best = 1
    for d in range(1, B + 1):
        if B % d == 0 and d * S <= row_cap:
            best = d
    if num_cores >= 2 and best == B and B > 1:
        for d in range(B // 2, 0, -1):
            if B % d == 0 and d * S >= 256:
                best = d
                break
    return best


def pack_params(params):
    """Stack per-layer weights along a leading layer dim; fuse QKV (with the
    dk**-0.5 query scale folded in); zero-pad FFN weights to HIDDEN lanes;
    pack all 1-row params into one [L, NVEC, H] block; matmul weights bf16."""
    layers = params["layers"]
    H = layers[0]["wq"].shape[0]
    heads = params["svd"].shape[1]
    scale = (H // heads) ** -0.5

    def stack(key):
        return jnp.stack([lp[key] for lp in layers])

    wqkv = jnp.concatenate([stack("wq") * scale, stack("wk"), stack("wv")],
                           axis=-1)

    ffn = layers[0]["w1"].shape[-1]
    w1 = stack("w1")
    w2 = stack("w2")
    if ffn < H:
        w1 = jnp.pad(w1, ((0, 0), (0, 0), (0, H - ffn)))   # [L, H, 128]
        w2 = jnp.pad(w2, ((0, 0), (0, H - ffn), (0, 0)))   # [L, 128, H]

    def row(key, scl=1.0):
        r = jnp.stack([lp[key][0] for lp in layers]) * scl  # [L, dim]
        if r.shape[-1] < H:
            r = jnp.pad(r, ((0, 0), (0, H - r.shape[-1])))
        return r

    vecs = jnp.stack(
        [row(name, scale if name == "bq" else 1.0) for name in _VEC_ROW_NAMES],
        axis=1)
    fln = jnp.concatenate([params["final_g"], params["final_b"]], axis=0)
    return dict(wqkv=wqkv.astype(jnp.bfloat16),
                wo=stack("wo").astype(jnp.bfloat16),
                w1=w1.astype(jnp.bfloat16),
                w2=w2.astype(jnp.bfloat16),
                vecs=vecs.astype(jnp.float32),
                fln=fln.astype(jnp.float32))


def fused_forward(packed, x, bias_hb, *, bblk=None):
    B, S, H = x.shape
    heads = bias_hb.shape[0]                 # bias_hb: [heads, B, S, S]
    L, _, threeH = packed["wqkv"].shape
    ffn_p = packed["w1"].shape[-1]
    nvec = packed["vecs"].shape[1]
    if bblk is None:
        bblk = _choose_bblk(B, S)
    assert B % bblk == 0, (B, bblk)
    grid = (B // bblk,)

    in_specs = [
        pl.BlockSpec((bblk, S, H), lambda b: (b, 0, 0)),            # x
        pl.BlockSpec((heads, bblk, S, S), lambda b: (0, b, 0, 0)),  # bias
        pl.BlockSpec((L, H, threeH), lambda b: (0, 0, 0)),          # wqkv (all L)
        pl.BlockSpec((L, H, H), lambda b: (0, 0, 0)),               # wo
        pl.BlockSpec((L, H, ffn_p), lambda b: (0, 0, 0)),           # w1
        pl.BlockSpec((L, ffn_p, H), lambda b: (0, 0, 0)),           # w2
        pl.BlockSpec((L, nvec, H), lambda b: (0, 0, 0)),            # vecs
        pl.BlockSpec((2, H), lambda b: (0, 0)),                     # final LN
    ]
    # Weights + per-block activations are far below the scoped-VMEM default at
    # these shapes; raise vmem_limit_bytes here only if row_cap is pushed past
    # ~2048 rows per block.
    return pl.pallas_call(
        fused_encoder_kernel,
        out_shape=jax.ShapeDtypeStruct((B, S, H), x.dtype),
        grid=grid,
        in_specs=in_specs,
        out_specs=pl.BlockSpec((bblk, S, H), lambda b: (b, 0, 0)),
        compiler_params=pltpu.CompilerParams(
            dimension_semantics=("parallel",)),
    )(x, bias_hb, packed["wqkv"], packed["wo"], packed["w1"], packed["w2"],
      packed["vecs"], packed["fln"])


def _build_inputs(params, node_embedded, rel_pos_mat, tree_attn_bias):
    """Super-node prepend + per-head attention bias (plain-JAX glue)."""
    B, N, H = node_embedded.shape
    S = N + 1
    heads = params["svd"].shape[1]
    super_emb = jnp.broadcast_to(params["super_node"][None], (B, 1, H))
    x = jnp.concatenate([super_emb, node_embedded], axis=1)          # [B,S,H]

    bias = jnp.broadcast_to(tree_attn_bias[:, None, :, :], (B, heads, S, S))
    rel = params["rel_pos"][rel_pos_mat]                             # [B,S,S,Hh]
    bias = bias + jnp.transpose(rel, (0, 3, 1, 2))
    t = params["svd"].reshape(1, heads, 1)
    bias = bias.at[:, :, 1:, 0].add(t)
    bias = bias.at[:, :, 0, :].add(t)
    return x, bias                                                   # [B,h,S,S]


def tree_bias_attention_forward(params, node_embedded, rel_pos_mat,
                                tree_attn_bias, *, bblk=None):
    # input_dropout / attention dropout / ffn dropout are identity (inference)
    x, bias = _build_inputs(params, node_embedded, rel_pos_mat, tree_attn_bias)
    bias_hb = jnp.transpose(bias, (1, 0, 2, 3))    # [heads, B, S, S] for kernel
    packed = pack_params(params)
    return fused_forward(packed, x, bias_hb, bblk=bblk)


# --------------------------------------------------------------------------
# Parameter init (f32 masters; bf16 cast of matmul weights happens in packing)
# --------------------------------------------------------------------------
def init_params(key, n_layers=N_LAYERS, hidden=HIDDEN, ffn=FFN, heads=HEADS):
    keys = iter(jax.random.split(key, 3 + n_layers))

    def nrm(k, shape, std=0.02):
        return std * jax.random.normal(k, shape, jnp.float32)

    params = {
        "super_node": jax.random.normal(next(keys), (1, hidden), jnp.float32),
        # nn.Embedding(192, head_size, padding_idx=0) -> row 0 is zero
        "rel_pos": jax.random.normal(next(keys), (192, heads),
                                     jnp.float32).at[0].set(0.0),
        "svd": jax.random.normal(next(keys), (1, heads), jnp.float32),
        "final_g": jnp.ones((1, hidden), jnp.float32),
        "final_b": jnp.zeros((1, hidden), jnp.float32),
        "layers": [],
    }
    for _ in range(n_layers):
        lk = jax.random.split(next(keys), 6)
        params["layers"].append({
            "ln1_g": jnp.ones((1, hidden), jnp.float32),
            "ln1_b": jnp.zeros((1, hidden), jnp.float32),
            "wq": nrm(lk[0], (hidden, hidden)),
            "bq": jnp.zeros((1, hidden), jnp.float32),
            "wk": nrm(lk[1], (hidden, hidden)),
            "bk": jnp.zeros((1, hidden), jnp.float32),
            "wv": nrm(lk[2], (hidden, hidden)),
            "bv": jnp.zeros((1, hidden), jnp.float32),
            "wo": nrm(lk[3], (hidden, hidden)),
            "bo": jnp.zeros((1, hidden), jnp.float32),
            "ln2_g": jnp.ones((1, hidden), jnp.float32),
            "ln2_b": jnp.zeros((1, hidden), jnp.float32),
            "w1": nrm(lk[4], (hidden, ffn)),
            "b1": jnp.zeros((1, ffn), jnp.float32),
            "w2": nrm(lk[5], (ffn, hidden)),
            "b2": jnp.zeros((1, hidden), jnp.float32),
        })
    return params


# --------------------------------------------------------------------------
# Plain-JAX f32 reference (mirrors the PyTorch module) for a sanity check
# --------------------------------------------------------------------------
def reference_forward(params, node_embedded, rel_pos_mat, tree_attn_bias):
    B, N, H = node_embedded.shape
    S = N + 1
    heads = params["svd"].shape[1]
    dk = H // heads
    x, bias = _build_inputs(params, node_embedded, rel_pos_mat, tree_attn_bias)

    def ln(v, g, b):
        mu = jnp.mean(v, -1, keepdims=True)
        var = jnp.mean((v - mu) ** 2, -1, keepdims=True)
        return (v - mu) * lax.rsqrt(var + LN_EPS) * g + b

    def split(z):
        return z.reshape(B, S, heads, dk).transpose(0, 2, 1, 3)

    for lp in params["layers"]:
        y = ln(x, lp["ln1_g"][0], lp["ln1_b"][0])
        q = split(y @ lp["wq"] + lp["bq"][0]) * (dk ** -0.5)
        k = split(y @ lp["wk"] + lp["bk"][0])
        v = split(y @ lp["wv"] + lp["bv"][0])
        s = jnp.einsum('bhqd,bhkd->bhqk', q, k) + bias
        p = jax.nn.softmax(s, axis=-1)
        ctx = jnp.einsum('bhqk,bhkd->bhqd', p, v)
        ctx = ctx.transpose(0, 2, 1, 3).reshape(B, S, H)
        x = x + ctx @ lp["wo"] + lp["bo"][0]
        y = ln(x, lp["ln2_g"][0], lp["ln2_b"][0])
        hid = jax.nn.gelu(y @ lp["w1"] + lp["b1"][0], approximate=False)
        x = x + hid @ lp["w2"] + lp["b2"][0]
    return ln(x, params["final_g"][0], params["final_b"][0])


if __name__ == "__main__":
    key = jax.random.PRNGKey(0)
    kp, kx, kr, kb = jax.random.split(key, 4)

    B, N = 2, 7                      # S = N + 1 = 8 (super node prepended)
    S = N + 1
    params = init_params(kp)

    node_embedded = jax.random.normal(kx, (B, N, HIDDEN), jnp.float32)
    rel_pos_mat = jax.random.randint(kr, (B, S, S), 0, 192, dtype=jnp.int32)
    tree_attn_bias = jax.random.normal(kb, (B, S, S), jnp.float32)

    fwd = jax.jit(tree_bias_attention_forward)
    out = jax.block_until_ready(fwd(params, node_embedded, rel_pos_mat,
                                    tree_attn_bias))
    assert out.shape == (B, S, HIDDEN)

    ref = jax.block_until_ready(
        reference_forward(params, node_embedded, rel_pos_mat, tree_attn_bias))
    max_err = float(jnp.max(jnp.abs(out - ref)))
    assert jnp.allclose(out, ref, atol=5e-2, rtol=5e-2), \
        f"kernel/reference mismatch, max abs err {max_err}"
    print("KERNEL_OK")
</pallas_src>

<mosaic_0001>
module attributes {stable_mosaic.version = 11 : i64} {
  func.func @fused_encoder_kernel(%arg0: i32, %arg1: memref<2x8x128xf32, #tpu.memory_space<vmem>>, %arg2: memref<4x2x8x8xf32, #tpu.memory_space<vmem>>, %arg3: memref<4x128x384xbf16, #tpu.memory_space<vmem>>, %arg4: memref<4x128x128xbf16, #tpu.memory_space<vmem>>, %arg5: memref<4x128x128xbf16, #tpu.memory_space<vmem>>, %arg6: memref<4x128x128xbf16, #tpu.memory_space<vmem>>, %arg7: memref<4x10x128xf32, #tpu.memory_space<vmem>>, %arg8: memref<2x128xf32, #tpu.memory_space<vmem>>, %arg9: memref<2x8x128xf32, #tpu.memory_space<vmem>>) attributes {dimension_semantics = [#tpu.dimension_semantics<parallel>], iteration_bounds = array<i64: 1>, scalar_prefetch = 0 : i64, scratch_operands = 0 : i64, tpu.core_type = #tpu.core_type<tc>, window_params = [{transform_indices = @transform_0, window_bounds = array<i64: 2, 8, 128>}, {transform_indices = @transform_1, window_bounds = array<i64: 4, 2, 8, 8>}, {pipeline_mode = #tpu.pipeline_mode<synchronous>, transform_indices = @transform_2, window_bounds = array<i64: 4, 128, 384>}, {pipeline_mode = #tpu.pipeline_mode<synchronous>, transform_indices = @transform_3, window_bounds = array<i64: 4, 128, 128>}, {pipeline_mode = #tpu.pipeline_mode<synchronous>, transform_indices = @transform_4, window_bounds = array<i64: 4, 128, 128>}, {pipeline_mode = #tpu.pipeline_mode<synchronous>, transform_indices = @transform_5, window_bounds = array<i64: 4, 128, 128>}, {pipeline_mode = #tpu.pipeline_mode<synchronous>, transform_indices = @transform_6, window_bounds = array<i64: 4, 10, 128>}, {pipeline_mode = #tpu.pipeline_mode<synchronous>, transform_indices = @transform_7, window_bounds = array<i64: 2, 128>}, {transform_indices = @transform_8, window_bounds = array<i64: 2, 8, 128>}]} {
    %c0 = arith.constant 0 : index
    %c0_0 = arith.constant 0 : index
    %c0_1 = arith.constant 0 : index
    %0 = vector.load %arg1[%c0, %c0_0, %c0_1] : memref<2x8x128xf32, #tpu.memory_space<vmem>>, vector<2x8x128xf32>
    %1 = vector.shape_cast %0 : vector<2x8x128xf32> to vector<16x128xf32>
    %c0_2 = arith.constant 0 : index
    %c0_3 = arith.constant 0 : index
    %c0_4 = arith.constant 0 : index
    %c0_5 = arith.constant 0 : index
    %2 = vector.load %arg2[%c0_2, %c0_3, %c0_4, %c0_5] : memref<4x2x8x8xf32, #tpu.memory_space<vmem>>, vector<4x2x8x8xf32>
    %3 = vector.shape_cast %2 : vector<4x2x8x8xf32> to vector<8x8x8xf32>
    %c0_6 = arith.constant 0 : index
    %c0_7 = arith.constant 0 : index
    %c0_8 = arith.constant 0 : index
    %4 = vector.load %arg7[%c0_6, %c0_7, %c0_8] : memref<4x10x128xf32, #tpu.memory_space<vmem>>, vector<1x10x128xf32>
    %5 = vector.shape_cast %4 : vector<1x10x128xf32> to vector<10x128xf32>
    %6 = vector.extract_strided_slice %5 {offsets = [0, 0], sizes = [1, 128], strides = [1, 1]} : vector<10x128xf32> to vector<1x128xf32>
    %7 = vector.extract_strided_slice %5 {offsets = [1, 0], sizes = [1, 128], strides = [1, 1]} : vector<10x128xf32> to vector<1x128xf32>
    %cst = arith.constant dense<0.000000e+00> : vector<16xf32>
    %8 = vector.multi_reduction <add>, %1, %cst [1] : vector<16x128xf32> to vector<16xf32>
    %9 = vector.shape_cast %8 : vector<16xf32> to vector<16x1xf32>
    %cst_9 = arith.constant 1.280000e+02 : f32
    %10 = vector.broadcast %cst_9 : f32 to vector<16x1xf32>
    %11 = arith.divf %9, %10 : vector<16x1xf32>
    %12 = vector.broadcast %11 : vector<16x1xf32> to vector<16x128xf32>
    %13 = arith.subf %1, %12 : vector<16x128xf32>
    %14 = arith.mulf %13, %13 : vector<16x128xf32>
    %cst_10 = arith.constant dense<0.000000e+00> : vector<16xf32>
    %15 = vector.multi_reduction <add>, %14, %cst_10 [1] : vector<16x128xf32> to vector<16xf32>
    %16 = vector.shape_cast %15 : vector<16xf32> to vector<16x1xf32>
    %cst_11 = arith.constant 1.280000e+02 : f32
    %17 = vector.broadcast %cst_11 : f32 to vector<16x1xf32>
    %18 = arith.divf %16, %17 : vector<16x1xf32>
    %19 = vector.broadcast %11 : vector<16x1xf32> to vector<16x128xf32>
    %20 = arith.subf %1, %19 : vector<16x128xf32>
    %cst_12 = arith.constant 9.99999974E-6 : f32
    %21 = vector.broadcast %cst_12 : f32 to vector<16x1xf32>
    %22 = arith.addf %18, %21 : vector<16x1xf32>
    %23 = math.rsqrt %22 : vector<16x1xf32>
    %24 = vector.broadcast %23 : vector<16x1xf32> to vector<16x128xf32>
    %25 = arith.mulf %20, %24 : vector<16x128xf32>
    %26 = vector.broadcast %6 : vector<1x128xf32> to vector<16x128xf32>
    %27 = arith.mulf %25, %26 : vector<16x128xf32>
    %28 = vector.broadcast %7 : vector<1x128xf32> to vector<16x128xf32>
    %29 = arith.addf %27, %28 : vector<16x128xf32>
    %30 = arith.truncf %29 : vector<16x128xf32> to vector<16x128xbf16>
    %c0_13 = arith.constant 0 : index
    %c0_14 = arith.constant 0 : index
    %c0_15 = arith.constant 0 : index
    %31 = vector.load %arg3[%c0_13, %c0_14, %c0_15] : memref<4x128x384xbf16, #tpu.memory_space<vmem>>, vector<1x128x384xbf16>
    %32 = vector.shape_cast %31 : vector<1x128x384xbf16> to vector<128x384xbf16>
    %cst_16 = arith.constant dense<0.000000e+00> : vector<16x384xf32>
    %33 = tpu.matmul %30, %32, %cst_16 {dimension_numbers = #tpu.dot_dimension_numbers<[1], [0], [0], [1], [0, 0, 1, 1], [], []>} : vector<16x128xbf16>, vector<128x384xbf16>, vector<16x384xf32> -> vector<16x384xf32>
    %34 = vector.extract_strided_slice %33 {offsets = [0, 0], sizes = [16, 128], strides = [1, 1]} : vector<16x384xf32> to vector<16x128xf32>
    %35 = vector.extract_strided_slice %5 {offsets = [2, 0], sizes = [1, 128], strides = [1, 1]} : vector<10x128xf32> to vector<1x128xf32>
    %36 = vector.broadcast %35 : vector<1x128xf32> to vector<16x128xf32>
    %37 = arith.addf %34, %36 : vector<16x128xf32>
    %38 = arith.truncf %37 : vector<16x128xf32> to vector<16x128xbf16>
    %39 = vector.extract_strided_slice %33 {offsets = [0, 128], sizes = [16, 128], strides = [1, 1]} : vector<16x384xf32> to vector<16x128xf32>
    %40 = vector.extract_strided_slice %5 {offsets = [3, 0], sizes = [1, 128], strides = [1, 1]} : vector<10x128xf32> to vector<1x128xf32>
    %41 = vector.broadcast %40 : vector<1x128xf32> to vector<16x128xf32>
    %42 = arith.addf %39, %41 : vector<16x128xf32>
    %43 = arith.truncf %42 : vector<16x128xf32> to vector<16x128xbf16>
    %44 = vector.extract_strided_slice %33 {offsets = [0, 256], sizes = [16, 128], strides = [1, 1]} : vector<16x384xf32> to vector<16x128xf32>
    %45 = vector.extract_strided_slice %5 {offsets = [4, 0], sizes = [1, 128], strides = [1, 1]} : vector<10x128xf32> to vector<1x128xf32>
    %46 = vector.broadcast %45 : vector<1x128xf32> to vector<16x128xf32>
    %47 = arith.addf %44, %46 : vector<16x128xf32>
    %48 = arith.truncf %47 : vector<16x128xf32> to vector<16x128xbf16>
    %49 = vector.extract_strided_slice %38 {offsets = [0, 0], sizes = [16, 32], strides = [1, 1]} : vector<16x128xbf16> to vector<16x32xbf16>
    %50 = vector.shape_cast %49 : vector<16x32xbf16> to vector<2x8x32xbf16>
    %51 = vector.extract_strided_slice %38 {offsets = [0, 32], sizes = [16, 32], strides = [1, 1]} : vector<16x128xbf16> to vector<16x32xbf16>
    %52 = vector.shape_cast %51 : vector<16x32xbf16> to vector<2x8x32xbf16>
    %53 = vector.extract_strided_slice %38 {offsets = [0, 64], sizes = [16, 32], strides = [1, 1]} : vector<16x128xbf16> to vector<16x32xbf16>
    %54 = vector.shape_cast %53 : vector<16x32xbf16> to vector<2x8x32xbf16>
    %55 = vector.extract_strided_slice %38 {offsets = [0, 96], sizes = [16, 32], strides = [1, 1]} : vector<16x128xbf16> to vector<16x32xbf16>
    %56 = vector.shape_cast %55 : vector<16x32xbf16> to vector<2x8x32xbf16>
    %57 = tpu.concatenate %50, %52, %54, %56 in 0 : vector<2x8x32xbf16>, vector<2x8x32xbf16>, vector<2x8x32xbf16>, vector<2x8x32xbf16> -> vector<8x8x32xbf16>
    %58 = vector.extract_strided_slice %43 {offsets = [0, 0], sizes = [16, 32], strides = [1, 1]} : vector<16x128xbf16> to vector<16x32xbf16>
    %59 = vector.shape_cast %58 : vector<16x32xbf16> to vector<2x8x32xbf16>
    %60 = vector.extract_strided_slice %43 {offsets = [0, 32], sizes = [16, 32], strides = [1, 1]} : vector<16x128xbf16> to vector<16x32xbf16>
    %61 = vector.shape_cast %60 : vector<16x32xbf16> to vector<2x8x32xbf16>
    %62 = vector.extract_strided_slice %43 {offsets = [0, 64], sizes = [16, 32], strides = [1, 1]} : vector<16x128xbf16> to vector<16x32xbf16>
    %63 = vector.shape_cast %62 : vector<16x32xbf16> to vector<2x8x32xbf16>
    %64 = vector.extract_strided_slice %43 {offsets = [0, 96], sizes = [16, 32], strides = [1, 1]} : vector<16x128xbf16> to vector<16x32xbf16>
    %65 = vector.shape_cast %64 : vector<16x32xbf16> to vector<2x8x32xbf16>
    %66 = tpu.concatenate %59, %61, %63, %65 in 0 : vector<2x8x32xbf16>, vector<2x8x32xbf16>, vector<2x8x32xbf16>, vector<2x8x32xbf16> -> vector<8x8x32xbf16>
    %67 = vector.extract_strided_slice %48 {offsets = [0, 0], sizes = [16, 32], strides = [1, 1]} : vector<16x128xbf16> to vector<16x32xbf16>
    %68 = vector.shape_cast %67 : vector<16x32xbf16> to vector<2x8x32xbf16>
    %69 = vector.extract_strided_slice %48 {offsets = [0, 32], sizes = [16, 32], strides = [1, 1]} : vector<16x128xbf16> to vector<16x32xbf16>
    %70 = vector.shape_cast %69 : vector<16x32xbf16> to vector<2x8x32xbf16>
    %71 = vector.extract_strided_slice %48 {offsets = [0, 64], sizes = [16, 32], strides = [1, 1]} : vector<16x128xbf16> to vector<16x32xbf16>
    %72 = vector.shape_cast %71 : vector<16x32xbf16> to vector<2x8x32xbf16>
    %73 = vector.extract_strided_slice %48 {offsets = [0, 96], sizes = [16, 32], strides = [1, 1]} : vector<16x128xbf16> to vector<16x32xbf16>
    %74 = vector.shape_cast %73 : vector<16x32xbf16> to vector<2x8x32xbf16>
    %75 = tpu.concatenate %68, %70, %72, %74 in 0 : vector<2x8x32xbf16>, vector<2x8x32xbf16>, vector<2x8x32xbf16>, vector<2x8x32xbf16> -> vector<8x8x32xbf16>
    "tpu.trace_start"() <{level = 10 : i32, message = "bqd,bkd->bqk"}> : () -> ()
    %cst_17 = arith.constant dense<0.000000e+00> : vector<8x8x8xf32>
    %76 = tpu.matmul %57, %66, %cst_17 {dimension_numbers = #tpu.dot_dimension_numbers<[2], [2], [1], [1], [0, 0, 0, 1, 1, 1], [0], [0]>} : vector<8x8x32xbf16>, vector<8x8x32xbf16>, vector<8x8x8xf32> -> vector<8x8x8xf32>
    "tpu.trace_stop"() : () -> ()
    %77 = arith.addf %76, %3 : vector<8x8x8xf32>
    %cst_18 = arith.constant dense<0xFF800000> : vector<8x8xf32>
    %78 = vector.multi_reduction <maximumf>, %77, %cst_18 [2] : vector<8x8x8xf32> to vector<8x8xf32>
    %79 = vector.shape_cast %78 : vector<8x8xf32> to vector<8x8x1xf32>
    %80 = vector.broadcast %79 : vector<8x8x1xf32> to vector<8x8x8xf32>
    %81 = arith.subf %77, %80 : vector<8x8x8xf32>
    %82 = math.exp %81 : vector<8x8x8xf32>
    %cst_19 = arith.constant dense<0.000000e+00> : vector<8x8xf32>
    %83 = vector.multi_reduction <add>, %82, %cst_19 [2] : vector<8x8x8xf32> to vector<8x8xf32>
    %84 = vector.shape_cast %83 : vector<8x8xf32> to vector<8x8x1xf32>
    %85 = tpu.reciprocal %84 {approx = true} : vector<8x8x1xf32> -> vector<8x8x1xf32>
    %86 = vector.broadcast %85 : vector<8x8x1xf32> to vector<8x8x8xf32>
    %87 = arith.mulf %82, %86 : vector<8x8x8xf32>
    %88 = arith.truncf %87 : vector<8x8x8xf32> to vector<8x8x8xbf16>
    "tpu.trace_start"() <{level = 10 : i32, message = "bqk,bkd->bqd"}> : () -> ()
    %cst_20 = arith.constant dense<0.000000e+00> : vector<8x8x32xf32>
    %89 = tpu.matmul %88, %75, %cst_20 {dimension_numbers = #tpu.dot_dimension_numbers<[2], [1], [1], [2], [0, 0, 0, 1, 1, 2], [0], [0]>} : vector<8x8x8xbf16>, vector<8x8x32xbf16>, vector<8x8x32xf32> -> vector<8x8x32xf32>
    "tpu.trace_stop"() : () -> ()
    %90 = vector.extract_strided_slice %89 {offsets = [0, 0, 0], sizes = [2, 8, 32], strides = [1, 1, 1]} : vector<8x8x32xf32> to vector<2x8x32xf32>
    %91 = vector.shape_cast %90 : vector<2x8x32xf32> to vector<16x32xf32>
    %92 = vector.extract_strided_slice %89 {offsets = [2, 0, 0], sizes = [2, 8, 32], strides = [1, 1, 1]} : vector<8x8x32xf32> to vector<2x8x32xf32>
    %93 = vector.shape_cast %92 : vector<2x8x32xf32> to vector<16x32xf32>
    %94 = vector.extract_strided_slice %89 {offsets = [4, 0, 0], sizes = [2, 8, 32], strides = [1, 1, 1]} : vector<8x8x32xf32> to vector<2x8x32xf32>
    %95 = vector.shape_cast %94 : vector<2x8x32xf32> to vector<16x32xf32>
    %96 = vector.extract_strided_slice %89 {offsets = [6, 0, 0], sizes = [2, 8, 32], strides = [1, 1, 1]} : vector<8x8x32xf32> to vector<2x8x32xf32>
    %97 = vector.shape_cast %96 : vector<2x8x32xf32> to vector<16x32xf32>
    %98 = tpu.concatenate %91, %93, %95, %97 in 1 : vector<16x32xf32>, vector<16x32xf32>, vector<16x32xf32>, vector<16x32xf32> -> vector<16x128xf32>
    %99 = arith.truncf %98 : vector<16x128xf32> to vector<16x128xbf16>
    %c0_21 = arith.constant 0 : index
    %c0_22 = arith.constant 0 : index
    %c0_23 = arith.constant 0 : index
    %100 = vector.load %arg4[%c0_21, %c0_22, %c0_23] : memref<4x128x128xbf16, #tpu.memory_space<vmem>>, vector<1x128x128xbf16>
    %101 = vector.shape_cast %100 : vector<1x128x128xbf16> to vector<128x128xbf16>
    %cst_24 = arith.constant dense<0.000000e+00> : vector<16x128xf32>
    %102 = tpu.matmul %99, %101, %cst_24 {dimension_numbers = #tpu.dot_dimension_numbers<[1], [0], [0], [1], [0, 0, 1, 1], [], []>} : vector<16x128xbf16>, vector<128x128xbf16>, vector<16x128xf32> -> vector<16x128xf32>
    %103 = vector.extract_strided_slice %5 {offsets = [5, 0], sizes = [1, 128], strides = [1, 1]} : vector<10x128xf32> to vector<1x128xf32>
    %104 = vector.broadcast %103 : vector<1x128xf32> to vector<16x128xf32>
    %105 = arith.addf %102, %104 : vector<16x128xf32>
    %106 = arith.addf %1, %105 : vector<16x128xf32>
    %107 = vector.extract_strided_slice %5 {offsets = [6, 0], sizes = [1, 128], strides = [1, 1]} : vector<10x128xf32> to vector<1x128xf32>
    %108 = vector.extract_strided_slice %5 {offsets = [7, 0], sizes = [1, 128], strides = [1, 1]} : vector<10x128xf32> to vector<1x128xf32>
    %cst_25 = arith.constant dense<0.000000e+00> : vector<16xf32>
    %109 = vector.multi_reduction <add>, %106, %cst_25 [1] : vector<16x128xf32> to vector<16xf32>
    %110 = vector.shape_cast %109 : vector<16xf32> to vector<16x1xf32>
    %cst_26 = arith.constant 1.280000e+02 : f32
    %111 = vector.broadcast %cst_26 : f32 to vector<16x1xf32>
    %112 = arith.divf %110, %111 : vector<16x1xf32>
    %113 = vector.broadcast %112 : vector<16x1xf32> to vector<16x128xf32>
    %114 = arith.subf %106, %113 : vector<16x128xf32>
    %115 = arith.mulf %114, %114 : vector<16x128xf32>
    %cst_27 = arith.constant dense<0.000000e+00> : vector<16xf32>
    %116 = vector.multi_reduction <add>, %115, %cst_27 [1] : vector<16x128xf32> to vector<16xf32>
    %117 = vector.shape_cast %116 : vector<16xf32> to vector<16x1xf32>
    %cst_28 = arith.constant 1.280000e+02 : f32
    %118 = vector.broadcast %cst_28 : f32 to vector<16x1xf32>
    %119 = arith.divf %117, %118 : vector<16x1xf32>
    %120 = vector.broadcast %112 : vector<16x1xf32> to vector<16x128xf32>
    %121 = arith.subf %106, %120 : vector<16x128xf32>
    %cst_29 = arith.constant 9.99999974E-6 : f32
    %122 = vector.broadcast %cst_29 : f32 to vector<16x1xf32>
    %123 = arith.addf %119, %122 : vector<16x1xf32>
    %124 = math.rsqrt %123 : vector<16x1xf32>
    %125 = vector.broadcast %124 : vector<16x1xf32> to vector<16x128xf32>
    %126 = arith.mulf %121, %125 : vector<16x128xf32>
    %127 = vector.broadcast %107 : vector<1x128xf32> to vector<16x128xf32>
    %128 = arith.mulf %126, %127 : vector<16x128xf32>
    %129 = vector.broadcast %108 : vector<1x128xf32> to vector<16x128xf32>
    %130 = arith.addf %128, %129 : vector<16x128xf32>
    %131 = arith.truncf %130 : vector<16x128xf32> to vector<16x128xbf16>
    %c0_30 = arith.constant 0 : index
    %c0_31 = arith.constant 0 : index
    %c0_32 = arith.constant 0 : index
    %132 = vector.load %arg5[%c0_30, %c0_31, %c0_32] : memref<4x128x128xbf16, #tpu.memory_space<vmem>>, vector<1x128x128xbf16>
    %133 = vector.shape_cast %132 : vector<1x128x128xbf16> to vector<128x128xbf16>
    %cst_33 = arith.constant dense<0.000000e+00> : vector<16x128xf32>
    %134 = tpu.matmul %131, %133, %cst_33 {dimension_numbers = #tpu.dot_dimension_numbers<[1], [0], [0], [1], [0, 0, 1, 1], [], []>} : vector<16x128xbf16>, vector<128x128xbf16>, vector<16x128xf32> -> vector<16x128xf32>
    %135 = vector.extract_strided_slice %5 {offsets = [8, 0], sizes = [1, 128], strides = [1, 1]} : vector<10x128xf32> to vector<1x128xf32>
    %136 = vector.broadcast %135 : vector<1x128xf32> to vector<16x128xf32>
    %137 = arith.addf %134, %136 : vector<16x128xf32>
    %cst_34 = arith.constant 5.000000e-01 : f32
    %138 = vector.broadcast %cst_34 : f32 to vector<16x128xf32>
    %139 = arith.mulf %138, %137 : vector<16x128xf32>
    %cst_35 = arith.constant 0.707106769 : f32
    %140 = vector.broadcast %cst_35 : f32 to vector<16x128xf32>
    %141 = arith.mulf %137, %140 : vector<16x128xf32>
    %142 = math.erf %141 : vector<16x128xf32>
    %cst_36 = arith.constant 1.000000e+00 : f32
    %143 = vector.broadcast %cst_36 : f32 to vector<16x128xf32>
    %144 = arith.addf %143, %142 : vector<16x128xf32>
    %145 = arith.mulf %139, %144 : vector<16x128xf32>
    %146 = arith.truncf %145 : vector<16x128xf32> to vector<16x128xbf16>
    %c0_37 = arith.constant 0 : index
    %c0_38 = arith.constant 0 : index
    %c0_39 = arith.constant 0 : index
    %147 = vector.load %arg6[%c0_37, %c0_38, %c0_39] : memref<4x128x128xbf16, #tpu.memory_space<vmem>>, vector<1x128x128xbf16>
    %148 = vector.shape_cast %147 : vector<1x128x128xbf16> to vector<128x128xbf16>
    %cst_40 = arith.constant dense<0.000000e+00> : vector<16x128xf32>
    %149 = tpu.matmul %146, %148, %cst_40 {dimension_numbers = #tpu.dot_dimension_numbers<[1], [0], [0], [1], [0, 0, 1, 1], [], []>} : vector<16x128xbf16>, vector<128x128xbf16>, vector<16x128xf32> -> vector<16x128xf32>
    %150 = vector.extract_strided_slice %5 {offsets = [9, 0], sizes = [1, 128], strides = [1, 1]} : vector<10x128xf32> to vector<1x128xf32>
    %151 = vector.broadcast %150 : vector<1x128xf32> to vector<16x128xf32>
    %152 = arith.addf %149, %151 : vector<16x128xf32>
    %153 = arith.addf %106, %152 : vector<16x128xf32>
    %c1 = arith.constant 1 : index
    %c0_41 = arith.constant 0 : index
    %c0_42 = arith.constant 0 : index
    %154 = vector.load %arg7[%c1, %c0_41, %c0_42] : memref<4x10x128xf32, #tpu.memory_space<vmem>>, vector<1x10x128xf32>
    %155 = vector.shape_cast %154 : vector<1x10x128xf32> to vector<10x128xf32>
    %156 = vector.extract_strided_slice %155 {offsets = [0, 0], sizes = [1, 128], strides = [1, 1]} : vector<10x128xf32> to vector<1x128xf32>
    %157 = vector.extract_strided_slice %155 {offsets = [1, 0], sizes = [1, 128], strides = [1, 1]} : vector<10x128xf32> to vector<1x128xf32>
    %cst_43 = arith.constant dense<0.000000e+00> : vector<16xf32>
    %158 = vector.multi_reduction <add>, %153, %cst_43 [1] : vector<16x128xf32> to vector<16xf32>
    %159 = vector.shape_cast %158 : vector<16xf32> to vector<16x1xf32>
    %cst_44 = arith.constant 1.280000e+02 : f32
    %160 = vector.broadcast %cst_44 : f32 to vector<16x1xf32>
    %161 = arith.divf %159, %160 : vector<16x1xf32>
    %162 = vector.broadcast %161 : vector<16x1xf32> to vector<16x128xf32>
    %163 = arith.subf %153, %162 : vector<16x128xf32>
    %164 = arith.mulf %163, %163 : vector<16x128xf32>
    %cst_45 = arith.constant dense<0.000000e+00> : vector<16xf32>
    %165 = vector.multi_reduction <add>, %164, %cst_45 [1] : vector<16x128xf32> to vector<16xf32>
    %166 = vector.shape_cast %165 : vector<16xf32> to vector<16x1xf32>
    %cst_46 = arith.constant 1.280000e+02 : f32
    %167 = vector.broadcast %cst_46 : f32 to vector<16x1xf32>
    %168 = arith.divf %166, %167 : vector<16x1xf32>
    %169 = vector.broadcast %161 : vector<16x1xf32> to vector<16x128xf32>
    %170 = arith.subf %153, %169 : vector<16x128xf32>
    %cst_47 = arith.constant 9.99999974E-6 : f32
    %171 = vector.broadcast %cst_47 : f32 to vector<16x1xf32>
    %172 = arith.addf %168, %171 : vector<16x1xf32>
    %173 = math.rsqrt %172 : vector<16x1xf32>
    %174 = vector.broadcast %173 : vector<16x1xf32> to vector<16x128xf32>
    %175 = arith.mulf %170, %174 : vector<16x128xf32>
    %176 = vector.broadcast %156 : vector<1x128xf32> to vector<16x128xf32>
    %177 = arith.mulf %175, %176 : vector<16x128xf32>
    %178 = vector.broadcast %157 : vector<1x128xf32> to vector<16x128xf32>
    %179 = arith.addf %177, %178 : vector<16x128xf32>
    %180 = arith.truncf %179 : vector<16x128xf32> to vector<16x128xbf16>
    %c1_48 = arith.constant 1 : index
    %c0_49 = arith.constant 0 : index
    %c0_50 = arith.constant 0 : index
    %181 = vector.load %arg3[%c1_48, %c0_49, %c0_50] : memref<4x128x384xbf16, #tpu.memory_space<vmem>>, vector<1x128x384xbf16>
    %182 = vector.shape_cast %181 : vector<1x128x384xbf16> to vector<128x384xbf16>
    %cst_51 = arith.constant dense<0.000000e+00> : vector<16x384xf32>
    %183 = tpu.matmul %180, %182, %cst_51 {dimension_numbers = #tpu.dot_dimension_numbers<[1], [0], [0], [1], [0, 0, 1, 1], [], []>} : vector<16x128xbf16>, vector<128x384xbf16>, vector<16x384xf32> -> vector<16x384xf32>
    %184 = vector.extract_strided_slice %183 {offsets = [0, 0], sizes = [16, 128], strides = [1, 1]} : vector<16x384xf32> to vector<16x128xf32>
    %185 = vector.extract_strided_slice %155 {offsets = [2, 0], sizes = [1, 128], strides = [1, 1]} : vector<10x128xf32> to vector<1x128xf32>
    %186 = vector.broadcast %185 : vector<1x128xf32> to vector<16x128xf32>
    %187 = arith.addf %184, %186 : vector<16x128xf32>
    %188 = arith.truncf %187 : vector<16x128xf32> to vector<16x128xbf16>
    %189 = vector.extract_strided_slice %183 {offsets = [0, 128], sizes = [16, 128], strides = [1, 1]} : vector<16x384xf32> to vector<16x128xf32>
    %190 = vector.extract_strided_slice %155 {offsets = [3, 0], sizes = [1, 128], strides = [1, 1]} : vector<10x128xf32> to vector<1x128xf32>
    %191 = vector.broadcast %190 : vector<1x128xf32> to vector<16x128xf32>
    %192 = arith.addf %189, %191 : vector<16x128xf32>
    %193 = arith.truncf %192 : vector<16x128xf32> to vector<16x128xbf16>
    %194 = vector.extract_strided_slice %183 {offsets = [0, 256], sizes = [16, 128], strides = [1, 1]} : vector<16x384xf32> to vector<16x128xf32>
    %195 = vector.extract_strided_slice %155 {offsets = [4, 0], sizes = [1, 128], strides = [1, 1]} : vector<10x128xf32> to vector<1x128xf32>
    %196 = vector.broadcast %195 : vector<1x128xf32> to vector<16x128xf32>
    %197 = arith.addf %194, %196 : vector<16x128xf32>
    %198 = arith.truncf %197 : vector<16x128xf32> to vector<16x128xbf16>
    %199 = vector.extract_strided_slice %188 {offsets = [0, 0], sizes = [16, 32], strides = [1, 1]} : vector<16x128xbf16> to vector<16x32xbf16>
    %200 = vector.shape_cast %199 : vector<16x32xbf16> to vector<2x8x32xbf16>
    %201 = vector.extract_strided_slice %188 {offsets = [0, 32], sizes = [16, 32], strides = [1, 1]} : vector<16x128xbf16> to vector<16x32xbf16>
    %202 = vector.shape_cast %201 : vector<16x32xbf16> to vector<2x8x32xbf16>
    %203 = vector.extract_strided_slice %188 {offsets = [0, 64], sizes = [16, 32], strides = [1, 1]} : vector<16x128xbf16> to vector<16x32xbf16>
    %204 = vector.shape_cast %203 : vector<16x32xbf16> to vector<2x8x32xbf16>
    %205 = vector.extract_strided_slice %188 {offsets = [0, 96], sizes = [16, 32], strides = [1, 1]} : vector<16x128xbf16> to vector<16x32xbf16>
    %206 = vector.shape_cast %205 : vector<16x32xbf16> to vector<2x8x32xbf16>
    %207 = tpu.concatenate %200, %202, %204, %206 in 0 : vector<2x8x32xbf16>, vector<2x8x32xbf16>, vector<2x8x32xbf16>, vector<2x8x32xbf16> -> vector<8x8x32xbf16>
    %208 = vector.extract_strided_slice %193 {offsets = [0, 0], sizes = [16, 32], strides = [1, 1]} : vector<16x128xbf16> to vector<16x32xbf16>
    %209 = vector.shape_cast %208 : vector<16x32xbf16> to vector<2x8x32xbf16>
    %210 = vector.extract_strided_slice %193 {offsets = [0, 32], sizes = [16, 32], strides = [1, 1]} : vector<16x128xbf16> to vector<16x32xbf16>
    %211 = vector.shape_cast %210 : vector<16x32xbf16> to vector<2x8x32xbf16>
    %212 = vector.extract_strided_slice %193 {offsets = [0, 64], sizes = [16, 32], strides = [1, 1]} : vector<16x128xbf16> to vector<16x32xbf16>
    %213 = vector.shape_cast %212 : vector<16x32xbf16> to vector<2x8x32xbf16>
    %214 = vector.extract_strided_slice %193 {offsets = [0, 96], sizes = [16, 32], strides = [1, 1]} : vector<16x128xbf16> to vector<16x32xbf16>
    %215 = vector.shape_cast %214 : vector<16x32xbf16> to vector<2x8x32xbf16>
    %216 = tpu.concatenate %209, %211, %213, %215 in 0 : vector<2x8x32xbf16>, vector<2x8x32xbf16>, vector<2x8x32xbf16>, vector<2x8x32xbf16> -> vector<8x8x32xbf16>
    %217 = vector.extract_strided_slice %198 {offsets = [0, 0], sizes = [16, 32], strides = [1, 1]} : vector<16x128xbf16> to vector<16x32xbf16>
    %218 = vector.shape_cast %217 : vector<16x32xbf16> to vector<2x8x32xbf16>
    %219 = vector.extract_strided_slice %198 {offsets = [0, 32], sizes = [16, 32], strides = [1, 1]} : vector<16x128xbf16> to vector<16x32xbf16>
    %220 = vector.shape_cast %219 : vector<16x32xbf16> to vector<2x8x32xbf16>
    %221 = vector.extract_strided_slice %198 {offsets = [0, 64], sizes = [16, 32], strides = [1, 1]} : vector<16x128xbf16> to vector<16x32xbf16>
    %222 = vector.shape_cast %221 : vector<16x32xbf16> to vector<2x8x32xbf16>
    %223 = vector.extract_strided_slice %198 {offsets = [0, 96], sizes = [16, 32], strides = [1, 1]} : vector<16x128xbf16> to vector<16x32xbf16>
    %224 = vector.shape_cast %223 : vector<16x32xbf16> to vector<2x8x32xbf16>
    %225 = tpu.concatenate %218, %220, %222, %224 in 0 : vector<2x8x32xbf16>, vector<2x8x32xbf16>, vector<2x8x32xbf16>, vector<2x8x32xbf16> -> vector<8x8x32xbf16>
    "tpu.trace_start"() <{level = 10 : i32, message = "bqd,bkd->bqk"}> : () -> ()
    %cst_52 = arith.constant dense<0.000000e+00> : vector<8x8x8xf32>
    %226 = tpu.matmul %207, %216, %cst_52 {dimension_numbers = #tpu.dot_dimension_numbers<[2], [2], [1], [1], [0, 0, 0, 1, 1, 1], [0], [0]>} : vector<8x8x32xbf16>, vector<8x8x32xbf16>, vector<8x8x8xf32> -> vector<8x8x8xf32>
    "tpu.trace_stop"() : () -> ()
    %227 = arith.addf %226, %3 : vector<8x8x8xf32>
    %cst_53 = arith.constant dense<0xFF800000> : vector<8x8xf32>
    %228 = vector.multi_reduction <maximumf>, %227, %cst_53 [2] : vector<8x8x8xf32> to vector<8x8xf32>
    %229 = vector.shape_cast %228 : vector<8x8xf32> to vector<8x8x1xf32>
    %230 = vector.broadcast %229 : vector<8x8x1xf32> to vector<8x8x8xf32>
    %231 = arith.subf %227, %230 : vector<8x8x8xf32>
    %232 = math.exp %231 : vector<8x8x8xf32>
    %cst_54 = arith.constant dense<0.000000e+00> : vector<8x8xf32>
    %233 = vector.multi_reduction <add>, %232, %cst_54 [2] : vector<8x8x8xf32> to vector<8x8xf32>
    %234 = vector.shape_cast %233 : vector<8x8xf32> to vector<8x8x1xf32>
    %235 = tpu.reciprocal %234 {approx = true} : vector<8x8x1xf32> -> vector<8x8x1xf32>
    %236 = vector.broadcast %235 : vector<8x8x1xf32> to vector<8x8x8xf32>
    %237 = arith.mulf %232, %236 : vector<8x8x8xf32>
    %238 = arith.truncf %237 : vector<8x8x8xf32> to vector<8x8x8xbf16>
    "tpu.trace_start"() <{level = 10 : i32, message = "bqk,bkd->bqd"}> : () -> ()
    %cst_55 = arith.constant dense<0.000000e+00> : vector<8x8x32xf32>
    %239 = tpu.matmul %238, %225, %cst_55 {dimension_numbers = #tpu.dot_dimension_numbers<[2], [1], [1], [2], [0, 0, 0, 1, 1, 2], [0], [0]>} : vector<8x8x8xbf16>, vector<8x8x32xbf16>, vector<8x8x32xf32> -> vector<8x8x32xf32>
    "tpu.trace_stop"() : () -> ()
    %240 = vector.extract_strided_slice %239 {offsets = [0, 0, 0], sizes = [2, 8, 32], strides = [1, 1, 1]} : vector<8x8x32xf32> to vector<2x8x32xf32>
    %241 = vector.shape_cast %240 : vector<2x8x32xf32> to vector<16x32xf32>
    %242 = vector.extract_strided_slice %239 {offsets = [2, 0, 0], sizes = [2, 8, 32], strides = [1, 1, 1]} : vector<8x8x32xf32> to vector<2x8x32xf32>
    %243 = vector.shape_cast %242 : vector<2x8x32xf32> to vector<16x32xf32>
    %244 = vector.extract_strided_slice %239 {offsets = [4, 0, 0], sizes = [2, 8, 32], strides = [1, 1, 1]} : vector<8x8x32xf32> to vector<2x8x32xf32>
    %245 = vector.shape_cast %244 : vector<2x8x32xf32> to vector<16x32xf32>
    %246 = vector.extract_strided_slice %239 {offsets = [6, 0, 0], sizes = [2, 8, 32], strides = [1, 1, 1]} : vector<8x8x32xf32> to vector<2x8x32xf32>
    %247 = vector.shape_cast %246 : vector<2x8x32xf32> to vector<16x32xf32>
    %248 = tpu.concatenate %241, %243, %245, %247 in 1 : vector<16x32xf32>, vector<16x32xf32>, vector<16x32xf32>, vector<16x32xf32> -> vector<16x128xf32>
    %249 = arith.truncf %248 : vector<16x128xf32> to vector<16x128xbf16>
    %c1_56 = arith.constant 1 : index
    %c0_57 = arith.constant 0 : index
    %c0_58 = arith.constant 0 : index
    %250 = vector.load %arg4[%c1_56, %c0_57, %c0_58] : memref<4x128x128xbf16, #tpu.memory_space<vmem>>, vector<1x128x128xbf16>
    %251 = vector.shape_cast %250 : vector<1x128x128xbf16> to vector<128x128xbf16>
    %cst_59 = arith.constant dense<0.000000e+00> : vector<16x128xf32>
    %252 = tpu.matmul %249, %251, %cst_59 {dimension_numbers = #tpu.dot_dimension_numbers<[1], [0], [0], [1], [0, 0, 1, 1], [], []>} : vector<16x128xbf16>, vector<128x128xbf16>, vector<16x128xf32> -> vector<16x128xf32>
    %253 = vector.extract_strided_slice %155 {offsets = [5, 0], sizes = [1, 128], strides = [1, 1]} : vector<10x128xf32> to vector<1x128xf32>
    %254 = vector.broadcast %253 : vector<1x128xf32> to vector<16x128xf32>
    %255 = arith.addf %252, %254 : vector<16x128xf32>
    %256 = arith.addf %153, %255 : vector<16x128xf32>
    %257 = vector.extract_strided_slice %155 {offsets = [6, 0], sizes = [1, 128], strides = [1, 1]} : vector<10x128xf32> to vector<1x128xf32>
    %258 = vector.extract_strided_slice %155 {offsets = [7, 0], sizes = [1, 128], strides = [1, 1]} : vector<10x128xf32> to vector<1x128xf32>
    %cst_60 = arith.constant dense<0.000000e+00> : vector<16xf32>
    %259 = vector.multi_reduction <add>, %256, %cst_60 [1] : vector<16x128xf32> to vector<16xf32>
    %260 = vector.shape_cast %259 : vector<16xf32> to vector<16x1xf32>
    %cst_61 = arith.constant 1.280000e+02 : f32
    %261 = vector.broadcast %cst_61 : f32 to vector<16x1xf32>
    %262 = arith.divf %260, %261 : vector<16x1xf32>
    %263 = vector.broadcast %262 : vector<16x1xf32> to vector<16x128xf32>
    %264 = arith.subf %256, %263 : vector<16x128xf32>
    %265 = arith.mulf %264, %264 : vector<16x128xf32>
    %cst_62 = arith.constant dense<0.000000e+00> : vector<16xf32>
    %266 = vector.multi_reduction <add>, %265, %cst_62 [1] : vector<16x128xf32> to vector<16xf32>
    %267 = vector.shape_cast %266 : vector<16xf32> to vector<16x1xf32>
    %cst_63 = arith.constant 1.280000e+02 : f32
    %268 = vector.broadcast %cst_63 : f32 to vector<16x1xf32>
    %269 = arith.divf %267, %268 : vector<16x1xf32>
    %270 = vector.broadcast %262 : vector<16x1xf32> to vector<16x128xf32>
    %271 = arith.subf %256, %270 : vector<16x128xf32>
    %cst_64 = arith.constant 9.99999974E-6 : f32
    %272 = vector.broadcast %cst_64 : f32 to vector<16x1xf32>
    %273 = arith.addf %269, %272 : vector<16x1xf32>
    %274 = math.rsqrt %273 : vector<16x1xf32>
    %275 = vector.broadcast %274 : vector<16x1xf32> to vector<16x128xf32>
    %276 = arith.mulf %271, %275 : vector<16x128xf32>
    %277 = vector.broadcast %257 : vector<1x128xf32> to vector<16x128xf32>
    %278 = arith.mulf %276, %277 : vector<16x128xf32>
    %279 = vector.broadcast %258 : vector<1x128xf32> to vector<16x128xf32>
    %280 = arith.addf %278, %279 : vector<16x128xf32>
    %281 = arith.truncf %280 : vector<16x128xf32> to vector<16x128xbf16>
    %c1_65 = arith.constant 1 : index
    %c0_66 = arith.constant 0 : index
    %c0_67 = arith.constant 0 : index
    %282 = vector.load %arg5[%c1_65, %c0_66, %c0_67] : memref<4x128x128xbf16, #tpu.memory_space<vmem>>, vector<1x128x128xbf16>
    %283 = vector.shape_cast %282 : vector<1x128x128xbf16> to vector<128x128xbf16>
    %cst_68 = arith.constant dense<0.000000e+00> : vector<16x128xf32>
    %284 = tpu.matmul %281, %283, %cst_68 {dimension_numbers = #tpu.dot_dimension_numbers<[1], [0], [0], [1], [0, 0, 1, 1], [], []>} : vector<16x128xbf16>, vector<128x128xbf16>, vector<16x128xf32> -> vector<16x128xf32>
    %285 = vector.extract_strided_slice %155 {offsets = [8, 0], sizes = [1, 128], strides = [1, 1]} : vector<10x128xf32> to vector<1x128xf32>
    %286 = vector.broadcast %285 : vector<1x128xf32> to vector<16x128xf32>
    %287 = arith.addf %284, %286 : vector<16x128xf32>
    %cst_69 = arith.constant 5.000000e-01 : f32
    %288 = vector.broadcast %cst_69 : f32 to vector<16x128xf32>
    %289 = arith.mulf %288, %287 : vector<16x128xf32>
    %cst_70 = arith.constant 0.707106769 : f32
    %290 = vector.broadcast %cst_70 : f32 to vector<16x128xf32>
    %291 = arith.mulf %287, %290 : vector<16x128xf32>
    %292 = math.erf %291 : vector<16x128xf32>
    %cst_71 = arith.constant 1.000000e+00 : f32
    %293 = vector.broadcast %cst_71 : f32 to vector<16x128xf32>
    %294 = arith.addf %293, %292 : vector<16x128xf32>
    %295 = arith.mulf %289, %294 : vector<16x128xf32>
    %296 = arith.truncf %295 : vector<16x128xf32> to vector<16x128xbf16>
    %c1_72 = arith.constant 1 : index
    %c0_73 = arith.constant 0 : index
    %c0_74 = arith.constant 0 : index
    %297 = vector.load %arg6[%c1_72, %c0_73, %c0_74] : memref<4x128x128xbf16, #tpu.memory_space<vmem>>, vector<1x128x128xbf16>
    %298 = vector.shape_cast %297 : vector<1x128x128xbf16> to vector<128x128xbf16>
    %cst_75 = arith.constant dense<0.000000e+00> : vector<16x128xf32>
    %299 = tpu.matmul %296, %298, %cst_75 {dimension_numbers = #tpu.dot_dimension_numbers<[1], [0], [0], [1], [0, 0, 1, 1], [], []>} : vector<16x128xbf16>, vector<128x128xbf16>, vector<16x128xf32> -> vector<16x128xf32>
    %300 = vector.extract_strided_slice %155 {offsets = [9, 0], sizes = [1, 128], strides = [1, 1]} : vector<10x128xf32> to vector<1x128xf32>
    %301 = vector.broadcast %300 : vector<1x128xf32> to vector<16x128xf32>
    %302 = arith.addf %299, %301 : vector<16x128xf32>
    %303 = arith.addf %256, %302 : vector<16x128xf32>
    %c2 = arith.constant 2 : index
    %c0_76 = arith.constant 0 : index
    %c0_77 = arith.constant 0 : index
    %304 = vector.load %arg7[%c2, %c0_76, %c0_77] : memref<4x10x128xf32, #tpu.memory_space<vmem>>, vector<1x10x128xf32>
    %305 = vector.shape_cast %304 : vector<1x10x128xf32> to vector<10x128xf32>
    %306 = vector.extract_strided_slice %305 {offsets = [0, 0], sizes = [1, 128], strides = [1, 1]} : vector<10x128xf32> to vector<1x128xf32>
    %307 = vector.extract_strided_slice %305 {offsets = [1, 0], sizes = [1, 128], strides = [1, 1]} : vector<10x128xf32> to vector<1x128xf32>
    %cst_78 = arith.constant dense<0.000000e+00> : vector<16xf32>
    %308 = vector.multi_reduction <add>, %303, %cst_78 [1] : vector<16x128xf32> to vector<16xf32>
    %309 = vector.shape_cast %308 : vector<16xf32> to vector<16x1xf32>
    %cst_79 = arith.constant 1.280000e+02 : f32
    %310 = vector.broadcast %cst_79 : f32 to vector<16x1xf32>
    %311 = arith.divf %309, %310 : vector<16x1xf32>
    %312 = vector.broadcast %311 : vector<16x1xf32> to vector<16x128xf32>
    %313 = arith.subf %303, %312 : vector<16x128xf32>
    %314 = arith.mulf %313, %313 : vector<16x128xf32>
    %cst_80 = arith.constant dense<0.000000e+00> : vector<16xf32>
    %315 = vector.multi_reduction <add>, %314, %cst_80 [1] : vector<16x128xf32> to vector<16xf32>
    %316 = vector.shape_cast %315 : vector<16xf32> to vector<16x1xf32>
    %cst_81 = arith.constant 1.280000e+02 : f32
    %317 = vector.broadcast %cst_81 : f32 to vector<16x1xf32>
    %318 = arith.divf %316, %317 : vector<16x1xf32>
    %319 = vector.broadcast %311 : vector<16x1xf32> to vector<16x128xf32>
    %320 = arith.subf %303, %319 : vector<16x128xf32>
    %cst_82 = arith.constant 9.99999974E-6 : f32
    %321 = vector.broadcast %cst_82 : f32 to vector<16x1xf32>
    %322 = arith.addf %318, %321 : vector<16x1xf32>
    %323 = math.rsqrt %322 : vector<16x1xf32>
    %324 = vector.broadcast %323 : vector<16x1xf32> to vector<16x128xf32>
    %325 = arith.mulf %320, %324 : vector<16x128xf32>
    %326 = vector.broadcast %306 : vector<1x128xf32> to vector<16x128xf32>
    %327 = arith.mulf %325, %326 : vector<16x128xf32>
    %328 = vector.broadcast %307 : vector<1x128xf32> to vector<16x128xf32>
    %329 = arith.addf %327, %328 : vector<16x128xf32>
    %330 = arith.truncf %329 : vector<16x128xf32> to vector<16x128xbf16>
    %c2_83 = arith.constant 2 : index
    %c0_84 = arith.constant 0 : index
    %c0_85 = arith.constant 0 : index
    %331 = vector.load %arg3[%c2_83, %c0_84, %c0_85] : memref<4x128x384xbf16, #tpu.memory_space<vmem>>, vector<1x128x384xbf16>
    %332 = vector.shape_cast %331 : vector<1x128x384xbf16> to vector<128x384xbf16>
    %cst_86 = arith.constant dense<0.000000e+00> : vector<16x384xf32>
    %333 = tpu.matmul %330, %332, %cst_86 {dimension_numbers = #tpu.dot_dimension_numbers<[1], [0], [0], [1], [0, 0, 1, 1], [], []>} : vector<16x128xbf16>, vector<128x384xbf16>, vector<16x384xf32> -> vector<16x384xf32>
    %334 = vector.extract_strided_slice %333 {offsets = [0, 0], sizes = [16, 128], strides = [1, 1]} : vector<16x384xf32> to vector<16x128xf32>
    %335 = vector.extract_strided_slice %305 {offsets = [2, 0], sizes = [1, 128], strides = [1, 1]} : vector<10x128xf32> to vector<1x128xf32>
    %336 = vector.broadcast %335 : vector<1x128xf32> to vector<16x128xf32>
    %337 = arith.addf %334, %336 : vector<16x128xf32>
    %338 = arith.truncf %337 : vector<16x128xf32> to vector<16x128xbf16>
    %339 = vector.extract_strided_slice %333 {offsets = [0, 128], sizes = [16, 128], strides = [1, 1]} : vector<16x384xf32> to vector<16x128xf32>
    %340 = vector.extract_strided_slice %305 {offsets = [3, 0], sizes = [1, 128], strides = [1, 1]} : vector<10x128xf32> to vector<1x128xf32>
    %341 = vector.broadcast %340 : vector<1x128xf32> to vector<16x128xf32>
    %342 = arith.addf %339, %341 : vector<16x128xf32>
    %343 = arith.truncf %342 : vector<16x128xf32> to vector<16x128xbf16>
    %344 = vector.extract_strided_slice %333 {offsets = [0, 256], sizes = [16, 128], strides = [1, 1]} : vector<16x384xf32> to vector<16x128xf32>
    %345 = vector.extract_strided_slice %305 {offsets = [4, 0], sizes = [1, 128], strides = [1, 1]} : vector<10x128xf32> to vector<1x128xf32>
    %346 = vector.broadcast %345 : vector<1x128xf32> to vector<16x128xf32>
    %347 = arith.addf %344, %346 : vector<16x128xf32>
    %348 = arith.truncf %347 : vector<16x128xf32> to vector<16x128xbf16>
    %349 = vector.extract_strided_slice %338 {offsets = [0, 0], sizes = [16, 32], strides = [1, 1]} : vector<16x128xbf16> to vector<16x32xbf16>
    %350 = vector.shape_cast %349 : vector<16x32xbf16> to vector<2x8x32xbf16>
    %351 = vector.extract_strided_slice %338 {offsets = [0, 32], sizes = [16, 32], strides = [1, 1]} : vector<16x128xbf16> to vector<16x32xbf16>
    %352 = vector.shape_cast %351 : vector<16x32xbf16> to vector<2x8x32xbf16>
    %353 = vector.extract_strided_slice %338 {offsets = [0, 64], sizes = [16, 32], strides = [1, 1]} : vector<16x128xbf16> to vector<16x32xbf16>
    %354 = vector.shape_cast %353 : vector<16x32xbf16> to vector<2x8x32xbf16>
    %355 = vector.extract_strided_slice %338 {offsets = [0, 96], sizes = [16, 32], strides = [1, 1]} : vector<16x128xbf16> to vector<16x32xbf16>
    %356 = vector.shape_cast %355 : vector<16x32xbf16> to vector<2x8x32xbf16>
    %357 = tpu.concatenate %350, %352, %354, %356 in 0 : vector<2x8x32xbf16>, vector<2x8x32xbf16>, vector<2x8x32xbf16>, vector<2x8x32xbf16> -> vector<8x8x32xbf16>
    %358 = vector.extract_strided_slice %343 {offsets = [0, 0], sizes = [16, 32], strides = [1, 1]} : vector<16x128xbf16> to vector<16x32xbf16>
    %359 = vector.shape_cast %358 : vector<16x32xbf16> to vector<2x8x32xbf16>
    %360 = vector.extract_strided_slice %343 {offsets = [0, 32], sizes = [16, 32], strides = [1, 1]} : vector<16x128xbf16> to vector<16x32xbf16>
    %361 = vector.shape_cast %360 : vector<16x32xbf16> to vector<2x8x32xbf16>
    %362 = vector.extract_strided_slice %343 {offsets = [0, 64], sizes = [16, 32], strides = [1, 1]} : vector<16x128xbf16> to vector<16x32xbf16>
    %363 = vector.shape_cast %362 : vector<16x32xbf16> to vector<2x8x32xbf16>
    %364 = vector.extract_strided_slice %343 {offsets = [0, 96], sizes = [16, 32], strides = [1, 1]} : vector<16x128xbf16> to vector<16x32xbf16>
    %365 = vector.shape_cast %364 : vector<16x32xbf16> to vector<2x8x32xbf16>
    %366 = tpu.concatenate %359, %361, %363, %365 in 0 : vector<2x8x32xbf16>, vector<2x8x32xbf16>, vector<2x8x32xbf16>, vector<2x8x32xbf16> -> vector<8x8x32xbf16>
    %367 = vector.extract_strided_slice %348 {offsets = [0, 0], sizes = [16, 32], strides = [1, 1]} : vector<16x128xbf16> to vector<16x32xbf16>
    %368 = vector.shape_cast %367 : vector<16x32xbf16> to vector<2x8x32xbf16>
    %369 = vector.extract_strided_slice %348 {offsets = [0, 32], sizes = [16, 32], strides = [1, 1]} : vector<16x128xbf16> to vector<16x32xbf16>
    %370 = vector.shape_cast %369 : vector<16x32xbf16> to vector<2x8x32xbf16>
    %371 = vector.extract_strided_slice %348 {offsets = [0, 64], sizes = [16, 32], strides = [1, 1]} : vector<16x128xbf16> to vector<16x32xbf16>
    %372 = vector.shape_cast %371 : vector<16x32xbf16> to vector<2x8x32xbf16>
    %373 = vector.extract_strided_slice %348 {offsets = [0, 96], sizes = [16, 32], strides = [1, 1]} : vector<16x128xbf16> to vector<16x32xbf16>
    %374 = vector.shape_cast %373 : vector<16x32xbf16> to vector<2x8x32xbf16>
    %375 = tpu.concatenate %368, %370, %372, %374 in 0 : vector<2x8x32xbf16>, vector<2x8x32xbf16>, vector<2x8x32xbf16>, vector<2x8x32xbf16> -> vector<8x8x32xbf16>
    "tpu.trace_start"() <{level = 10 : i32, message = "bqd,bkd->bqk"}> : () -> ()
    %cst_87 = arith.constant dense<0.000000e+00> : vector<8x8x8xf32>
    %376 = tpu.matmul %357, %366, %cst_87 {dimension_numbers = #tpu.dot_dimension_numbers<[2], [2], [1], [1], [0, 0, 0, 1, 1, 1], [0], [0]>} : vector<8x8x32xbf16>, vector<8x8x32xbf16>, vector<8x8x8xf32> -> vector<8x8x8xf32>
    "tpu.trace_stop"() : () -> ()
    %377 = arith.addf %376, %3 : vector<8x8x8xf32>
    %cst_88 = arith.constant dense<0xFF800000> : vector<8x8xf32>
    %378 = vector.multi_reduction <maximumf>, %377, %cst_88 [2] : vector<8x8x8xf32> to vector<8x8xf32>
    %379 = vector.shape_cast %378 : vector<8x8xf32> to vector<8x8x1xf32>
    %380 = vector.broadcast %379 : vector<8x8x1xf32> to vector<8x8x8xf32>
    %381 = arith.subf %377, %380 : vector<8x8x8xf32>
    %382 = math.exp %381 : vector<8x8x8xf32>
    %cst_89 = arith.constant dense<0.000000e+00> : vector<8x8xf32>
    %383 = vector.multi_reduction <add>, %382, %cst_89 [2] : vector<8x8x8xf32> to vector<8x8xf32>
    %384 = vector.shape_cast %383 : vector<8x8xf32> to vector<8x8x1xf32>
    %385 = tpu.reciprocal %384 {approx = true} : vector<8x8x1xf32> -> vector<8x8x1xf32>
    %386 = vector.broadcast %385 : vector<8x8x1xf32> to vector<8x8x8xf32>
    %387 = arith.mulf %382, %386 : vector<8x8x8xf32>
    %388 = arith.truncf %387 : vector<8x8x8xf32> to vector<8x8x8xbf16>
    "tpu.trace_start"() <{level = 10 : i32, message = "bqk,bkd->bqd"}> : () -> ()
    %cst_90 = arith.constant dense<0.000000e+00> : vector<8x8x32xf32>
    %389 = tpu.matmul %388, %375, %cst_90 {dimension_numbers = #tpu.dot_dimension_numbers<[2], [1], [1], [2], [0, 0, 0, 1, 1, 2], [0], [0]>} : vector<8x8x8xbf16>, vector<8x8x32xbf16>, vector<8x8x32xf32> -> vector<8x8x32xf32>
    "tpu.trace_stop"() : () -> ()
    %390 = vector.extract_strided_slice %389 {offsets = [0, 0, 0], sizes = [2, 8, 32], strides = [1, 1, 1]} : vector<8x8x32xf32> to vector<2x8x32xf32>
    %391 = vector.shape_cast %390 : vector<2x8x32xf32> to vector<16x32xf32>
    %392 = vector.extract_strided_slice %389 {offsets = [2, 0, 0], sizes = [2, 8, 32], strides = [1, 1, 1]} : vector<8x8x32xf32> to vector<2x8x32xf32>
    %393 = vector.shape_cast %392 : vector<2x8x32xf32> to vector<16x32xf32>
    %394 = vector.extract_strided_slice %389 {offsets = [4, 0, 0], sizes = [2, 8, 32], strides = [1, 1, 1]} : vector<8x8x32xf32> to vector<2x8x32xf32>
    %395 = vector.shape_cast %394 : vector<2x8x32xf32> to vector<16x32xf32>
    %396 = vector.extract_strided_slice %389 {offsets = [6, 0, 0], sizes = [2, 8, 32], strides = [1, 1, 1]} : vector<8x8x32xf32> to vector<2x8x32xf32>
    %397 = vector.shape_cast %396 : vector<2x8x32xf32> to vector<16x32xf32>
    %398 = tpu.concatenate %391, %393, %395, %397 in 1 : vector<16x32xf32>, vector<16x32xf32>, vector<16x32xf32>, vector<16x32xf32> -> vector<16x128xf32>
    %399 = arith.truncf %398 : vector<16x128xf32> to vector<16x128xbf16>
    %c2_91 = arith.constant 2 : index
    %c0_92 = arith.constant 0 : index
    %c0_93 = arith.constant 0 : index
    %400 = vector.load %arg4[%c2_91, %c0_92, %c0_93] : memref<4x128x128xbf16, #tpu.memory_space<vmem>>, vector<1x128x128xbf16>
    %401 = vector.shape_cast %400 : vector<1x128x128xbf16> to vector<128x128xbf16>
    %cst_94 = arith.constant dense<0.000000e+00> : vector<16x128xf32>
    %402 = tpu.matmul %399, %401, %cst_94 {dimension_numbers = #tpu.dot_dimension_numbers<[1], [0], [0], [1], [0, 0, 1, 1], [], []>} : vector<16x128xbf16>, vector<128x128xbf16>, vector<16x128xf32> -> vector<16x128xf32>
    %403 = vector.extract_strided_slice %305 {offsets = [5, 0], sizes = [1, 128], strides = [1, 1]} : vector<10x128xf32> to vector<1x128xf32>
    %404 = vector.broadcast %403 : vector<1x128xf32> to vector<16x128xf32>
    %405 = arith.addf %402, %404 : vector<16x128xf32>
    %406 = arith.addf %303, %405 : vector<16x128xf32>
    %407 = vector.extract_strided_slice %305 {offsets = [6, 0], sizes = [1, 128], strides = [1, 1]} : vector<10x128xf32> to vector<1x128xf32>
    %408 = vector.extract_strided_slice %305 {offsets = [7, 0], sizes = [1, 128], strides = [1, 1]} : vector<10x128xf32> to vector<1x128xf32>
    %cst_95 = arith.constant dense<0.000000e+00> : vector<16xf32>
    %409 = vector.multi_reduction <add>, %406, %cst_95 [1] : vector<16x128xf32> to vector<16xf32>
    %410 = vector.shape_cast %409 : vector<16xf32> to vector<16x1xf32>
    %cst_96 = arith.constant 1.280000e+02 : f32
    %411 = vector.broadcast %cst_96 : f32 to vector<16x1xf32>
    %412 = arith.divf %410, %411 : vector<16x1xf32>
    %413 = vector.broadcast %412 : vector<16x1xf32> to vector<16x128xf32>
    %414 = arith.subf %406, %413 : vector<16x128xf32>
    %415 = arith.mulf %414, %414 : vector<16x128xf32>
    %cst_97 = arith.constant dense<0.000000e+00> : vector<16xf32>
    %416 = vector.multi_reduction <add>, %415, %cst_97 [1] : vector<16x128xf32> to vector<16xf32>
    %417 = vector.shape_cast %416 : vector<16xf32> to vector<16x1xf32>
    %cst_98 = arith.constant 1.280000e+02 : f32
    %418 = vector.broadcast %cst_98 : f32 to vector<16x1xf32>
    %419 = arith.divf %417, %418 : vector<16x1xf32>
    %420 = vector.broadcast %412 : vector<16x1xf32> to vector<16x128xf32>
    %421 = arith.subf %406, %420 : vector<16x128xf32>
    %cst_99 = arith.constant 9.99999974E-6 : f32
    %422 = vector.broadcast %cst_99 : f32 to vector<16x1xf32>
    %423 = arith.addf %419, %422 : vector<16x1xf32>
    %424 = math.rsqrt %423 : vector<16x1xf32>
    %425 = vector.broadcast %424 : vector<16x1xf32> to vector<16x128xf32>
    %426 = arith.mulf %421, %425 : vector<16x128xf32>
    %427 = vector.broadcast %407 : vector<1x128xf32> to vector<16x128xf32>
    %428 = arith.mulf %426, %427 : vector<16x128xf32>
    %429 = vector.broadcast %408 : vector<1x128xf32> to vector<16x128xf32>
    %430 = arith.addf %428, %429 : vector<16x128xf32>
    %431 = arith.truncf %430 : vector<16x128xf32> to vector<16x128xbf16>
    %c2_100 = arith.constant 2 : index
    %c0_101 = arith.constant 0 : index
    %c0_102 = arith.constant 0 : index
    %432 = vector.load %arg5[%c2_100, %c0_101, %c0_102] : memref<4x128x128xbf16, #tpu.memory_space<vmem>>, vector<1x128x128xbf16>
    %433 = vector.shape_cast %432 : vector<1x128x128xbf16> to vector<128x128xbf16>
    %cst_103 = arith.constant dense<0.000000e+00> : vector<16x128xf32>
    %434 = tpu.matmul %431, %433, %cst_103 {dimension_numbers = #tpu.dot_dimension_numbers<[1], [0], [0], [1], [0, 0, 1, 1], [], []>} : vector<16x128xbf16>, vector<128x128xbf16>, vector<16x128xf32> -> vector<16x128xf32>
    %435 = vector.extract_strided_slice %305 {offsets = [8, 0], sizes = [1, 128], strides = [1, 1]} : vector<10x128xf32> to vector<1x128xf32>
    %436 = vector.broadcast %435 : vector<1x128xf32> to vector<16x128xf32>
    %437 = arith.addf %434, %436 : vector<16x128xf32>
    %cst_104 = arith.constant 5.000000e-01 : f32
    %438 = vector.broadcast %cst_104 : f32 to vector<16x128xf32>
    %439 = arith.mulf %438, %437 : vector<16x128xf32>
    %cst_105 = arith.constant 0.707106769 : f32
    %440 = vector.broadcast %cst_105 : f32 to vector<16x128xf32>
    %441 = arith.mulf %437, %440 : vector<16x128xf32>
    %442 = math.erf %441 : vector<16x128xf32>
    %cst_106 = arith.constant 1.000000e+00 : f32
    %443 = vector.broadcast %cst_106 : f32 to vector<16x128xf32>
    %444 = arith.addf %443, %442 : vector<16x128xf32>
    %445 = arith.mulf %439, %444 : vector<16x128xf32>
    %446 = arith.truncf %445 : vector<16x128xf32> to vector<16x128xbf16>
    %c2_107 = arith.constant 2 : index
    %c0_108 = arith.constant 0 : index
    %c0_109 = arith.constant 0 : index
    %447 = vector.load %arg6[%c2_107, %c0_108, %c0_109] : memref<4x128x128xbf16, #tpu.memory_space<vmem>>, vector<1x128x128xbf16>
    %448 = vector.shape_cast %447 : vector<1x128x128xbf16> to vector<128x128xbf16>
    %cst_110 = arith.constant dense<0.000000e+00> : vector<16x128xf32>
    %449 = tpu.matmul %446, %448, %cst_110 {dimension_numbers = #tpu.dot_dimension_numbers<[1], [0], [0], [1], [0, 0, 1, 1], [], []>} : vector<16x128xbf16>, vector<128x128xbf16>, vector<16x128xf32> -> vector<16x128xf32>
    %450 = vector.extract_strided_slice %305 {offsets = [9, 0], sizes = [1, 128], strides = [1, 1]} : vector<10x128xf32> to vector<1x128xf32>
    %451 = vector.broadcast %450 : vector<1x128xf32> to vector<16x128xf32>
    %452 = arith.addf %449, %451 : vector<16x128xf32>
    %453 = arith.addf %406, %452 : vector<16x128xf32>
    %c3 = arith.constant 3 : index
    %c0_111 = arith.constant 0 : index
    %c0_112 = arith.constant 0 : index
    %454 = vector.load %arg7[%c3, %c0_111, %c0_112] : memref<4x10x128xf32, #tpu.memory_space<vmem>>, vector<1x10x128xf32>
    %455 = vector.shape_cast %454 : vector<1x10x128xf32> to vector<10x128xf32>
    %456 = vector.extract_strided_slice %455 {offsets = [0, 0], sizes = [1, 128], strides = [1, 1]} : vector<10x128xf32> to vector<1x128xf32>
    %457 = vector.extract_strided_slice %455 {offsets = [1, 0], sizes = [1, 128], strides = [1, 1]} : vector<10x128xf32> to vector<1x128xf32>
    %cst_113 = arith.constant dense<0.000000e+00> : vector<16xf32>
    %458 = vector.multi_reduction <add>, %453, %cst_113 [1] : vector<16x128xf32> to vector<16xf32>
    %459 = vector.shape_cast %458 : vector<16xf32> to vector<16x1xf32>
    %cst_114 = arith.constant 1.280000e+02 : f32
    %460 = vector.broadcast %cst_114 : f32 to vector<16x1xf32>
    %461 = arith.divf %459, %460 : vector<16x1xf32>
    %462 = vector.broadcast %461 : vector<16x1xf32> to vector<16x128xf32>
    %463 = arith.subf %453, %462 : vector<16x128xf32>
    %464 = arith.mulf %463, %463 : vector<16x128xf32>
    %cst_115 = arith.constant dense<0.000000e+00> : vector<16xf32>
    %465 = vector.multi_reduction <add>, %464, %cst_115 [1] : vector<16x128xf32> to vector<16xf32>
    %466 = vector.shape_cast %465 : vector<16xf32> to vector<16x1xf32>
    %cst_116 = arith.constant 1.280000e+02 : f32
    %467 = vector.broadcast %cst_116 : f32 to vector<16x1xf32>
    %468 = arith.divf %466, %467 : vector<16x1xf32>
    %469 = vector.broadcast %461 : vector<16x1xf32> to vector<16x128xf32>
    %470 = arith.subf %453, %469 : vector<16x128xf32>
    %cst_117 = arith.constant 9.99999974E-6 : f32
    %471 = vector.broadcast %cst_117 : f32 to vector<16x1xf32>
    %472 = arith.addf %468, %471 : vector<16x1xf32>
    %473 = math.rsqrt %472 : vector<16x1xf32>
    %474 = vector.broadcast %473 : vector<16x1xf32> to vector<16x128xf32>
    %475 = arith.mulf %470, %474 : vector<16x128xf32>
    %476 = vector.broadcast %456 : vector<1x128xf32> to vector<16x128xf32>
    %477 = arith.mulf %475, %476 : vector<16x128xf32>
    %478 = vector.broadcast %457 : vector<1x128xf32> to vector<16x128xf32>
    %479 = arith.addf %477, %478 : vector<16x128xf32>
    %480 = arith.truncf %479 : vector<16x128xf32> to vector<16x128xbf16>
    %c3_118 = arith.constant 3 : index
    %c0_119 = arith.constant 0 : index
    %c0_120 = arith.constant 0 : index
    %481 = vector.load %arg3[%c3_118, %c0_119, %c0_120] : memref<4x128x384xbf16, #tpu.memory_space<vmem>>, vector<1x128x384xbf16>
    %482 = vector.shape_cast %481 : vector<1x128x384xbf16> to vector<128x384xbf16>
    %cst_121 = arith.constant dense<0.000000e+00> : vector<16x384xf32>
    %483 = tpu.matmul %480, %482, %cst_121 {dimension_numbers = #tpu.dot_dimension_numbers<[1], [0], [0], [1], [0, 0, 1, 1], [], []>} : vector<16x128xbf16>, vector<128x384xbf16>, vector<16x384xf32> -> vector<16x384xf32>
    %484 = vector.extract_strided_slice %483 {offsets = [0, 0], sizes = [16, 128], strides = [1, 1]} : vector<16x384xf32> to vector<16x128xf32>
    %485 = vector.extract_strided_slice %455 {offsets = [2, 0], sizes = [1, 128], strides = [1, 1]} : vector<10x128xf32> to vector<1x128xf32>
    %486 = vector.broadcast %485 : vector<1x128xf32> to vector<16x128xf32>
    %487 = arith.addf %484, %486 : vector<16x128xf32>
    %488 = arith.truncf %487 : vector<16x128xf32> to vector<16x128xbf16>
    %489 = vector.extract_strided_slice %483 {offsets = [0, 128], sizes = [16, 128], strides = [1, 1]} : vector<16x384xf32> to vector<16x128xf32>
    %490 = vector.extract_strided_slice %455 {offsets = [3, 0], sizes = [1, 128], strides = [1, 1]} : vector<10x128xf32> to vector<1x128xf32>
    %491 = vector.broadcast %490 : vector<1x128xf32> to vector<16x128xf32>
    %492 = arith.addf %489, %491 : vector<16x128xf32>
    %493 = arith.truncf %492 : vector<16x128xf32> to vector<16x128xbf16>
    %494 = vector.extract_strided_slice %483 {offsets = [0, 256], sizes = [16, 128], strides = [1, 1]} : vector<16x384xf32> to vector<16x128xf32>
    %495 = vector.extract_strided_slice %455 {offsets = [4, 0], sizes = [1, 128], strides = [1, 1]} : vector<10x128xf32> to vector<1x128xf32>
    %496 = vector.broadcast %495 : vector<1x128xf32> to vector<16x128xf32>
    %497 = arith.addf %494, %496 : vector<16x128xf32>
    %498 = arith.truncf %497 : vector<16x128xf32> to vector<16x128xbf16>
    %499 = vector.extract_strided_slice %488 {offsets = [0, 0], sizes = [16, 32], strides = [1, 1]} : vector<16x128xbf16> to vector<16x32xbf16>
    %500 = vector.shape_cast %499 : vector<16x32xbf16> to vector<2x8x32xbf16>
    %501 = vector.extract_strided_slice %488 {offsets = [0, 32], sizes = [16, 32], strides = [1, 1]} : vector<16x128xbf16> to vector<16x32xbf16>
    %502 = vector.shape_cast %501 : vector<16x32xbf16> to vector<2x8x32xbf16>
    %503 = vector.extract_strided_slice %488 {offsets = [0, 64], sizes = [16, 32], strides = [1, 1]} : vector<16x128xbf16> to vector<16x32xbf16>
    %504 = vector.shape_cast %503 : vector<16x32xbf16> to vector<2x8x32xbf16>
    %505 = vector.extract_strided_slice %488 {offsets = [0, 96], sizes = [16, 32], strides = [1, 1]} : vector<16x128xbf16> to vector<16x32xbf16>
    %506 = vector.shape_cast %505 : vector<16x32xbf16> to vector<2x8x32xbf16>
    %507 = tpu.concatenate %500, %502, %504, %506 in 0 : vector<2x8x32xbf16>, vector<2x8x32xbf16>, vector<2x8x32xbf16>, vector<2x8x32xbf16> -> vector<8x8x32xbf16>
    %508 = vector.extract_strided_slice %493 {offsets = [0, 0], sizes = [16, 32], strides = [1, 1]} : vector<16x128xbf16> to vector<16x32xbf16>
    %509 = vector.shape_cast %508 : vector<16x32xbf16> to vector<2x8x32xbf16>
    %510 = vector.extract_strided_slice %493 {offsets = [0, 32], sizes = [16, 32], strides = [1, 1]} : vector<16x128xbf16> to vector<16x32xbf16>
    %511 = vector.shape_cast %510 : vector<16x32xbf16> to vector<2x8x32xbf16>
    %512 = vector.extract_strided_slice %493 {offsets = [0, 64], sizes = [16, 32], strides = [1, 1]} : vector<16x128xbf16> to vector<16x32xbf16>
    %513 = vector.shape_cast %512 : vector<16x32xbf16> to vector<2x8x32xbf16>
    %514 = vector.extract_strided_slice %493 {offsets = [0, 96], sizes = [16, 32], strides = [1, 1]} : vector<16x128xbf16> to vector<16x32xbf16>
    %515 = vector.shape_cast %514 : vector<16x32xbf16> to vector<2x8x32xbf16>
    %516 = tpu.concatenate %509, %511, %513, %515 in 0 : vector<2x8x32xbf16>, vector<2x8x32xbf16>, vector<2x8x32xbf16>, vector<2x8x32xbf16> -> vector<8x8x32xbf16>
    %517 = vector.extract_strided_slice %498 {offsets = [0, 0], sizes = [16, 32], strides = [1, 1]} : vector<16x128xbf16> to vector<16x32xbf16>
    %518 = vector.shape_cast %517 : vector<16x32xbf16> to vector<2x8x32xbf16>
    %519 = vector.extract_strided_slice %498 {offsets = [0, 32], sizes = [16, 32], strides = [1, 1]} : vector<16x128xbf16> to vector<16x32xbf16>
    %520 = vector.shape_cast %519 : vector<16x32xbf16> to vector<2x8x32xbf16>
    %521 = vector.extract_strided_slice %498 {offsets = [0, 64], sizes = [16, 32], strides = [1, 1]} : vector<16x128xbf16> to vector<16x32xbf16>
    %522 = vector.shape_cast %521 : vector<16x32xbf16> to vector<2x8x32xbf16>
    %523 = vector.extract_strided_slice %498 {offsets = [0, 96], sizes = [16, 32], strides = [1, 1]} : vector<16x128xbf16> to vector<16x32xbf16>
    %524 = vector.shape_cast %523 : vector<16x32xbf16> to vector<2x8x32xbf16>
    %525 = tpu.concatenate %518, %520, %522, %524 in 0 : vector<2x8x32xbf16>, vector<2x8x32xbf16>, vector<2x8x32xbf16>, vector<2x8x32xbf16> -> vector<8x8x32xbf16>
    "tpu.trace_start"() <{level = 10 : i32, message = "bqd,bkd->bqk"}> : () -> ()
    %cst_122 = arith.constant dense<0.000000e+00> : vector<8x8x8xf32>
    %526 = tpu.matmul %507, %516, %cst_122 {dimension_numbers = #tpu.dot_dimension_numbers<[2], [2], [1], [1], [0, 0, 0, 1, 1, 1], [0], [0]>} : vector<8x8x32xbf16>, vector<8x8x32xbf16>, vector<8x8x8xf32> -> vector<8x8x8xf32>
    "tpu.trace_stop"() : () -> ()
    %527 = arith.addf %526, %3 : vector<8x8x8xf32>
    %cst_123 = arith.constant dense<0xFF800000> : vector<8x8xf32>
    %528 = vector.multi_reduction <maximumf>, %527, %cst_123 [2] : vector<8x8x8xf32> to vector<8x8xf32>
    %529 = vector.shape_cast %528 : vector<8x8xf32> to vector<8x8x1xf32>
    %530 = vector.broadcast %529 : vector<8x8x1xf32> to vector<8x8x8xf32>
    %531 = arith.subf %527, %530 : vector<8x8x8xf32>
    %532 = math.exp %531 : vector<8x8x8xf32>
    %cst_124 = arith.constant dense<0.000000e+00> : vector<8x8xf32>
    %533 = vector.multi_reduction <add>, %532, %cst_124 [2] : vector<8x8x8xf32> to vector<8x8xf32>
    %534 = vector.shape_cast %533 : vector<8x8xf32> to vector<8x8x1xf32>
    %535 = tpu.reciprocal %534 {approx = true} : vector<8x8x1xf32> -> vector<8x8x1xf32>
    %536 = vector.broadcast %535 : vector<8x8x1xf32> to vector<8x8x8xf32>
    %537 = arith.mulf %532, %536 : vector<8x8x8xf32>
    %538 = arith.truncf %537 : vector<8x8x8xf32> to vector<8x8x8xbf16>
    "tpu.trace_start"() <{level = 10 : i32, message = "bqk,bkd->bqd"}> : () -> ()
    %cst_125 = arith.constant dense<0.000000e+00> : vector<8x8x32xf32>
    %539 = tpu.matmul %538, %525, %cst_125 {dimension_numbers = #tpu.dot_dimension_numbers<[2], [1], [1], [2], [0, 0, 0, 1, 1, 2], [0], [0]>} : vector<8x8x8xbf16>, vector<8x8x32xbf16>, vector<8x8x32xf32> -> vector<8x8x32xf32>
    "tpu.trace_stop"() : () -> ()
    %540 = vector.extract_strided_slice %539 {offsets = [0, 0, 0], sizes = [2, 8, 32], strides = [1, 1, 1]} : vector<8x8x32xf32> to vector<2x8x32xf32>
    %541 = vector.shape_cast %540 : vector<2x8x32xf32> to vector<16x32xf32>
    %542 = vector.extract_strided_slice %539 {offsets = [2, 0, 0], sizes = [2, 8, 32], strides = [1, 1, 1]} : vector<8x8x32xf32> to vector<2x8x32xf32>
    %543 = vector.shape_cast %542 : vector<2x8x32xf32> to vector<16x32xf32>
    %544 = vector.extract_strided_slice %539 {offsets = [4, 0, 0], sizes = [2, 8, 32], strides = [1, 1, 1]} : vector<8x8x32xf32> to vector<2x8x32xf32>
    %545 = vector.shape_cast %544 : vector<2x8x32xf32> to vector<16x32xf32>
    %546 = vector.extract_strided_slice %539 {offsets = [6, 0, 0], sizes = [2, 8, 32], strides = [1, 1, 1]} : vector<8x8x32xf32> to vector<2x8x32xf32>
    %547 = vector.shape_cast %546 : vector<2x8x32xf32> to vector<16x32xf32>
    %548 = tpu.concatenate %541, %543, %545, %547 in 1 : vector<16x32xf32>, vector<16x32xf32>, vector<16x32xf32>, vector<16x32xf32> -> vector<16x128xf32>
    %549 = arith.truncf %548 : vector<16x128xf32> to vector<16x128xbf16>
    %c3_126 = arith.constant 3 : index
    %c0_127 = arith.constant 0 : index
    %c0_128 = arith.constant 0 : index
    %550 = vector.load %arg4[%c3_126, %c0_127, %c0_128] : memref<4x128x128xbf16, #tpu.memory_space<vmem>>, vector<1x128x128xbf16>
    %551 = vector.shape_cast %550 : vector<1x128x128xbf16> to vector<128x128xbf16>
    %cst_129 = arith.constant dense<0.000000e+00> : vector<16x128xf32>
    %552 = tpu.matmul %549, %551, %cst_129 {dimension_numbers = #tpu.dot_dimension_numbers<[1], [0], [0], [1], [0, 0, 1, 1], [], []>} : vector<16x128xbf16>, vector<128x128xbf16>, vector<16x128xf32> -> vector<16x128xf32>
    %553 = vector.extract_strided_slice %455 {offsets = [5, 0], sizes = [1, 128], strides = [1, 1]} : vector<10x128xf32> to vector<1x128xf32>
    %554 = vector.broadcast %553 : vector<1x128xf32> to vector<16x128xf32>
    %555 = arith.addf %552, %554 : vector<16x128xf32>
    %556 = arith.addf %453, %555 : vector<16x128xf32>
    %557 = vector.extract_strided_slice %455 {offsets = [6, 0], sizes = [1, 128], strides = [1, 1]} : vector<10x128xf32> to vector<1x128xf32>
    %558 = vector.extract_strided_slice %455 {offsets = [7, 0], sizes = [1, 128], strides = [1, 1]} : vector<10x128xf32> to vector<1x128xf32>
    %cst_130 = arith.constant dense<0.000000e+00> : vector<16xf32>
    %559 = vector.multi_reduction <add>, %556, %cst_130 [1] : vector<16x128xf32> to vector<16xf32>
    %560 = vector.shape_cast %559 : vector<16xf32> to vector<16x1xf32>
    %cst_131 = arith.constant 1.280000e+02 : f32
    %561 = vector.broadcast %cst_131 : f32 to vector<16x1xf32>
    %562 = arith.divf %560, %561 : vector<16x1xf32>
    %563 = vector.broadcast %562 : vector<16x1xf32> to vector<16x128xf32>
    %564 = arith.subf %556, %563 : vector<16x128xf32>
    %565 = arith.mulf %564, %564 : vector<16x128xf32>
    %cst_132 = arith.constant dense<0.000000e+00> : vector<16xf32>
    %566 = vector.multi_reduction <add>, %565, %cst_132 [1] : vector<16x128xf32> to vector<16xf32>
    %567 = vector.shape_cast %566 : vector<16xf32> to vector<16x1xf32>
    %cst_133 = arith.constant 1.280000e+02 : f32
    %568 = vector.broadcast %cst_133 : f32 to vector<16x1xf32>
    %569 = arith.divf %567, %568 : vector<16x1xf32>
    %570 = vector.broadcast %562 : vector<16x1xf32> to vector<16x128xf32>
    %571 = arith.subf %556, %570 : vector<16x128xf32>
    %cst_134 = arith.constant 9.99999974E-6 : f32
    %572 = vector.broadcast %cst_134 : f32 to vector<16x1xf32>
    %573 = arith.addf %569, %572 : vector<16x1xf32>
    %574 = math.rsqrt %573 : vector<16x1xf32>
    %575 = vector.broadcast %574 : vector<16x1xf32> to vector<16x128xf32>
    %576 = arith.mulf %571, %575 : vector<16x128xf32>
    %577 = vector.broadcast %557 : vector<1x128xf32> to vector<16x128xf32>
    %578 = arith.mulf %576, %577 : vector<16x128xf32>
    %579 = vector.broadcast %558 : vector<1x128xf32> to vector<16x128xf32>
    %580 = arith.addf %578, %579 : vector<16x128xf32>
    %581 = arith.truncf %580 : vector<16x128xf32> to vector<16x128xbf16>
    %c3_135 = arith.constant 3 : index
    %c0_136 = arith.constant 0 : index
    %c0_137 = arith.constant 0 : index
    %582 = vector.load %arg5[%c3_135, %c0_136, %c0_137] : memref<4x128x128xbf16, #tpu.memory_space<vmem>>, vector<1x128x128xbf16>
    %583 = vector.shape_cast %582 : vector<1x128x128xbf16> to vector<128x128xbf16>
    %cst_138 = arith.constant dense<0.000000e+00> : vector<16x128xf32>
    %584 = tpu.matmul %581, %583, %cst_138 {dimension_numbers = #tpu.dot_dimension_numbers<[1], [0], [0], [1], [0, 0, 1, 1], [], []>} : vector<16x128xbf16>, vector<128x128xbf16>, vector<16x128xf32> -> vector<16x128xf32>
    %585 = vector.extract_strided_slice %455 {offsets = [8, 0], sizes = [1, 128], strides = [1, 1]} : vector<10x128xf32> to vector<1x128xf32>
    %586 = vector.broadcast %585 : vector<1x128xf32> to vector<16x128xf32>
    %587 = arith.addf %584, %586 : vector<16x128xf32>
    %cst_139 = arith.constant 5.000000e-01 : f32
    %588 = vector.broadcast %cst_139 : f32 to vector<16x128xf32>
    %589 = arith.mulf %588, %587 : vector<16x128xf32>
    %cst_140 = arith.constant 0.707106769 : f32
    %590 = vector.broadcast %cst_140 : f32 to vector<16x128xf32>
    %591 = arith.mulf %587, %590 : vector<16x128xf32>
    %592 = math.erf %591 : vector<16x128xf32>
    %cst_141 = arith.constant 1.000000e+00 : f32
    %593 = vector.broadcast %cst_141 : f32 to vector<16x128xf32>
    %594 = arith.addf %593, %592 : vector<16x128xf32>
    %595 = arith.mulf %589, %594 : vector<16x128xf32>
    %596 = arith.truncf %595 : vector<16x128xf32> to vector<16x128xbf16>
    %c3_142 = arith.constant 3 : index
    %c0_143 = arith.constant 0 : index
    %c0_144 = arith.constant 0 : index
    %597 = vector.load %arg6[%c3_142, %c0_143, %c0_144] : memref<4x128x128xbf16, #tpu.memory_space<vmem>>, vector<1x128x128xbf16>
    %598 = vector.shape_cast %597 : vector<1x128x128xbf16> to vector<128x128xbf16>
    %cst_145 = arith.constant dense<0.000000e+00> : vector<16x128xf32>
    %599 = tpu.matmul %596, %598, %cst_145 {dimension_numbers = #tpu.dot_dimension_numbers<[1], [0], [0], [1], [0, 0, 1, 1], [], []>} : vector<16x128xbf16>, vector<128x128xbf16>, vector<16x128xf32> -> vector<16x128xf32>
    %600 = vector.extract_strided_slice %455 {offsets = [9, 0], sizes = [1, 128], strides = [1, 1]} : vector<10x128xf32> to vector<1x128xf32>
    %601 = vector.broadcast %600 : vector<1x128xf32> to vector<16x128xf32>
    %602 = arith.addf %599, %601 : vector<16x128xf32>
    %603 = arith.addf %556, %602 : vector<16x128xf32>
    %c0_146 = arith.constant 0 : index
    %c0_147 = arith.constant 0 : index
    %604 = vector.load %arg8[%c0_146, %c0_147] : memref<2x128xf32, #tpu.memory_space<vmem>>, vector<2x128xf32>
    %605 = vector.extract_strided_slice %604 {offsets = [0, 0], sizes = [1, 128], strides = [1, 1]} : vector<2x128xf32> to vector<1x128xf32>
    %606 = vector.extract_strided_slice %604 {offsets = [1, 0], sizes = [1, 128], strides = [1, 1]} : vector<2x128xf32> to vector<1x128xf32>
    %cst_148 = arith.constant dense<0.000000e+00> : vector<16xf32>
    %607 = vector.multi_reduction <add>, %603, %cst_148 [1] : vector<16x128xf32> to vector<16xf32>
    %608 = vector.shape_cast %607 : vector<16xf32> to vector<16x1xf32>
    %cst_149 = arith.constant 1.280000e+02 : f32
    %609 = vector.broadcast %cst_149 : f32 to vector<16x1xf32>
    %610 = arith.divf %608, %609 : vector<16x1xf32>
    %611 = vector.broadcast %610 : vector<16x1xf32> to vector<16x128xf32>
    %612 = arith.subf %603, %611 : vector<16x128xf32>
    %613 = arith.mulf %612, %612 : vector<16x128xf32>
    %cst_150 = arith.constant dense<0.000000e+00> : vector<16xf32>
    %614 = vector.multi_reduction <add>, %613, %cst_150 [1] : vector<16x128xf32> to vector<16xf32>
    %615 = vector.shape_cast %614 : vector<16xf32> to vector<16x1xf32>
    %cst_151 = arith.constant 1.280000e+02 : f32
    %616 = vector.broadcast %cst_151 : f32 to vector<16x1xf32>
    %617 = arith.divf %615, %616 : vector<16x1xf32>
    %618 = vector.broadcast %610 : vector<16x1xf32> to vector<16x128xf32>
    %619 = arith.subf %603, %618 : vector<16x128xf32>
    %cst_152 = arith.constant 9.99999974E-6 : f32
    %620 = vector.broadcast %cst_152 : f32 to vector<16x1xf32>
    %621 = arith.addf %617, %620 : vector<16x1xf32>
    %622 = math.rsqrt %621 : vector<16x1xf32>
    %623 = vector.broadcast %622 : vector<16x1xf32> to vector<16x128xf32>
    %624 = arith.mulf %619, %623 : vector<16x128xf32>
    %625 = vector.broadcast %605 : vector<1x128xf32> to vector<16x128xf32>
    %626 = arith.mulf %624, %625 : vector<16x128xf32>
    %627 = vector.broadcast %606 : vector<1x128xf32> to vector<16x128xf32>
    %628 = arith.addf %626, %627 : vector<16x128xf32>
    %629 = vector.shape_cast %628 : vector<16x128xf32> to vector<2x8x128xf32>
    %c0_153 = arith.constant 0 : index
    %c0_154 = arith.constant 0 : index
    %c0_155 = arith.constant 0 : index
    %630 = vector.load %arg9[%c0_153, %c0_154, %c0_155] : memref<2x8x128xf32, #tpu.memory_space<vmem>>, vector<2x8x128xf32>
    tpu.vector_store %arg9[%c0_153, %c0_154, %c0_155], %629 {strides = array<i32>} : memref<2x8x128xf32, #tpu.memory_space<vmem>>, vector<2x8x128xf32>,
    return
  }
  func.func @transform_0(%arg0: i32) -> (i32, i32, i32) {
    %c0_i32 = arith.constant 0 : i32
    %c0_i32_0 = arith.constant 0 : i32
    %c0_i32_1 = arith.constant 0 : i32
    return %arg0, %c0_i32, %c0_i32_0 : i32, i32, i32
  }
  func.func @transform_1(%arg0: i32) -> (i32, i32, i32, i32) {
    %c0_i32 = arith.constant 0 : i32
    %c0_i32_0 = arith.constant 0 : i32
    %c0_i32_1 = arith.constant 0 : i32
    %c0_i32_2 = arith.constant 0 : i32
    return %c0_i32, %arg0, %c0_i32_0, %c0_i32_1 : i32, i32, i32, i32
  }
  func.func @transform_2(%arg0: i32) -> (i32, i32, i32) {
    %c0_i32 = arith.constant 0 : i32
    %c0_i32_0 = arith.constant 0 : i32
    %c0_i32_1 = arith.constant 0 : i32
    %c0_i32_2 = arith.constant 0 : i32
    return %c0_i32, %c0_i32_0, %c0_i32_1 : i32, i32, i32
  }
  func.func @transform_3(%arg0: i32) -> (i32, i32, i32) {
    %c0_i32 = arith.constant 0 : i32
    %c0_i32_0 = arith.constant 0 : i32
    %c0_i32_1 = arith.constant 0 : i32
    %c0_i32_2 = arith.constant 0 : i32
    return %c0_i32, %c0_i32_0, %c0_i32_1 : i32, i32, i32
  }
  func.func @transform_4(%arg0: i32) -> (i32, i32, i32) {
    %c0_i32 = arith.constant 0 : i32
    %c0_i32_0 = arith.constant 0 : i32
    %c0_i32_1 = arith.constant 0 : i32
    %c0_i32_2 = arith.constant 0 : i32
    return %c0_i32, %c0_i32_0, %c0_i32_1 : i32, i32, i32
  }
  func.func @transform_5(%arg0: i32) -> (i32, i32, i32) {
    %c0_i32 = arith.constant 0 : i32
    %c0_i32_0 = arith.constant 0 : i32
    %c0_i32_1 = arith.constant 0 : i32
    %c0_i32_2 = arith.constant 0 : i32
    return %c0_i32, %c0_i32_0, %c0_i32_1 : i32, i32, i32
  }
  func.func @transform_6(%arg0: i32) -> (i32, i32, i32) {
    %c0_i32 = arith.constant 0 : i32
    %c0_i32_0 = arith.constant 0 : i32
    %c0_i32_1 = arith.constant 0 : i32
    %c0_i32_2 = arith.constant 0 : i32
    return %c0_i32, %c0_i32_0, %c0_i32_1 : i32, i32, i32
  }
  func.func @transform_7(%arg0: i32) -> (i32, i32) {
    %c0_i32 = arith.constant 0 : i32
    %c0_i32_0 = arith.constant 0 : i32
    %c0_i32_1 = arith.constant 0 : i32
    return %c0_i32, %c0_i32_0 : i32, i32
  }
  func.func @transform_8(%arg0: i32) -> (i32, i32, i32) {
    %c0_i32 = arith.constant 0 : i32
    %c0_i32_0 = arith.constant 0 : i32
    %c0_i32_1 = arith.constant 0 : i32
    return %arg0, %c0_i32, %c0_i32_0 : i32, i32, i32
  }
}

</mosaic_0001>

<bundles_post_ra>
// kernel: tree_bias_attention_forward.1
= control target key start
LH: loop header
LB: loop body
LE: loop exit
PB: predicated region body
PF: predicated region fallthrough
CT: control target
= control target key end

     0   :  { %v8536_v4 = vmov 0.0   ;;  %s10375_s0 = inlined_call_operand.vmem [shape: f32[2,8,128], index: 0, kind: input, shape index: {}]   ;;  %s10376_s1 = inlined_call_operand.vmem [shape: f32[4,2,8,8], index: 1, kind: input, shape index: {}]   ;;  %s10377_s2 = inlined_call_operand.vmem [shape: bf16[4,128,384], index: 2, kind: input, shape index: {}]   ;;  %s10378_s3 = inlined_call_operand.vmem [shape: bf16[4,128,128], index: 3, kind: input, shape index: {}]   ;;  %s10379_s4 = inlined_call_operand.vmem [shape: bf16[4,128,128], index: 4, kind: input, shape index: {}]   ;;  %s10380_s5 = inlined_call_operand.vmem [shape: bf16[4,128,128], index: 5, kind: input, shape index: {}]   ;;  %s10381_s6 = inlined_call_operand.vmem [shape: f32[4,10,128], index: 6, kind: input, shape index: {}]   ;;  %s10382_s7 = inlined_call_operand.vmem [shape: f32[2,128], index: 7, kind: input, shape index: {}]   ;;  %s10383_s8 = inlined_call_operand.hbm [shape: f32[2,8,128], index: 8, kind: output, shape index: {}]  }
   0x1   :  { %v31_v0 = vld [vmem:[%s10375_s0] sm:$0xff]  ;;  %v32_v1 = vld [vmem:[%s10375_s0 + $0x8] sm:$0xff]  ;;  %7309 = vmatprep.subr.bf16.mxu1 %v8536_v4 }
   0x2   :  { %43 = vadd.xlane.f32.xlu0 %v31_v0  ;;  %v8082_v2 = vld [vmem:[%s10377_s2 + $0x4] ss:$12 sps:$4 sm:$0xff]   ;;  %v8084_v3 = vld [vmem:[%s10377_s2] ss:$12 sps:$4 sm:$0xff]   ;;  %v8085_v5 = vld [vmem:[%s10377_s2 + $0x8] ss:$12 sps:$4 sm:$0xff]  }
   0x3   :  { %v8086_v6 = vld [vmem:[%s10377_s2 + $0x1c] ss:$12 sps:$4 sm:$0xff]   ;;  %239 = vmatprep.subr.bf16.mxu0 %v8082_v2  ;;  %7310 = vmatpush3.bf16.msra.mxu1 %v8085_v5 }
   0x4   :  { %240 = vmatpush1.bf16.msra.mxu0 %v8084_v3  ;;  %7311 = vmatprep.subr.bf16.mxu1 %v8536_v4 }
   0x5   :  { %241 = vmatprep.subr.bf16.mxu0 %v8086_v6 }
   0x6   :  { %45 = vadd.xlane.f32.xlu0 %v32_v1 }
   0x7   :  { %13 = vsyncpa [#allocation3], 0  ;;  %v8088_v15 = vld [vmem:[%s10377_s2 + $0x18] ss:$12 sps:$4 sm:$0xff]   ;;  %v8089_v16 = vld [vmem:[%s10377_s2 + $0x20] ss:$12 sps:$4 sm:$0xff]   ;;  %v66_v40 = vlaneseq }
   0x8   :  { %242 = vmatpush1.bf16.msra.mxu0 %v8088_v15  ;;  %7312 = vmatpush3.bf16.msra.mxu1 %v8089_v16  ;;  %v8090_v17 = vld [vmem:[%s10377_s2 + $0x34] ss:$12 sps:$4 sm:$0xff]   ;;  %v8092_v18 = vld [vmem:[%s10377_s2 + $0x30] ss:$12 sps:$4 sm:$0xff]   ;;  %v8093_v19 = vld [vmem:[%s10377_s2 + $0x38] ss:$12 sps:$4 sm:$0xff]  }
   0x9   :  { %7313 = vmatprep.subr.bf16.mxu1 %v8536_v4  ;;  %243 = vmatprep.subr.bf16.mxu0 %v8090_v17  ;;  %v8094_v20 = vld [vmem:[%s10377_s2 + $0x4c] ss:$12 sps:$4 sm:$0xff]   ;;  %v8096_v21 = vld [vmem:[%s10377_s2 + $0x48] ss:$12 sps:$4 sm:$0xff]   ;;  %v8097_v22 = vld [vmem:[%s10377_s2 + $0x50] ss:$12 sps:$4 sm:$0xff]  }
   0xa   :  { %v8098_v23 = vld [vmem:[%s10377_s2 + $0x64] ss:$12 sps:$4 sm:$0xff]   ;;  %v8100_v24 = vld [vmem:[%s10377_s2 + $0x60] ss:$12 sps:$4 sm:$0xff]   ;;  %v8101_v25 = vld [vmem:[%s10377_s2 + $0x68] ss:$12 sps:$4 sm:$0xff]  }
   0xb   :  { %v8102_v26 = vld [vmem:[%s10377_s2 + $0x7c] ss:$12 sps:$4 sm:$0xff]   ;;  %v8104_v27 = vld [vmem:[%s10377_s2 + $0x78] ss:$12 sps:$4 sm:$0xff]   ;;  %v8105_v28 = vld [vmem:[%s10377_s2 + $0x80] ss:$12 sps:$4 sm:$0xff]  }
   0xc   :  { %244 = vmatpush1.bf16.msra.mxu0 %v8092_v18  ;;  %7314 = vmatpush3.bf16.msra.mxu1 %v8093_v19  ;;  %v8106_v29 = vld [vmem:[%s10377_s2 + $0x94] ss:$12 sps:$4 sm:$0xff]   ;;  %v8537_v30 = vmov 0   ;;  %vm8538_vm0 = vmmov 0   ;;  %v8108_v31 = vld [vmem:[%s10377_s2 + $0x90] ss:$12 sps:$4 sm:$0xff]  }
   0xd   :  { %7315 = vmatprep.subr.bf16.mxu1 %v8536_v4  ;;  %245 = vmatprep.subr.bf16.mxu0 %v8094_v20  ;;  %v8109_v32 = vld [vmem:[%s10377_s2 + $0x98] ss:$12 sps:$4 sm:$0xff]   ;;  %v8112_v34 = vld [vmem:[%s10377_s2 + $0xa8] ss:$12 sps:$4 sm:$0xff]   ;;  %v8113_v35 = vld [vmem:[%s10377_s2 + $0xb0] ss:$12 sps:$4 sm:$0xff]  }
   0xe   :  { %271 = vmatprep.mubr.bf16.mxu0 %v8537_v30  ;;  %7325 = vmatprep.mubr.msk.bf16.mxu1 %vm8538_vm0, %v8536_v4  ;;  %v8110_v33 = vld [vmem:[%s10377_s2 + $0xac] ss:$12 sps:$4 sm:$0xff]   ;;  %v8689_v43 = vshrl.u32 %v66_v40, 7  ;;  %v8697_v45 = vld [vmem:[%s10381_s6] sm:$0xff]  ;;  %vm395_vm1 = vcmask 261120   ;;  %s8539_s15 = smov 96  }
   0xf   :  { %s8540_s16 = smov 64   ;;  %s8541_s17 = smov 32   ;;  %vm864_vm2 = vcmask 1043456   ;;  %vm764_vm3 = vcmask 64512   ;;  %vm1256_vm4 = vcmask 523264   ;;  %vm1259_vm5 = vcmask 785408  }
  0x10   :  { %246 = vmatpush1.bf16.msra.mxu0 %v8096_v21  ;;  %7316 = vmatpush3.bf16.msra.mxu1 %v8097_v22  ;;  %v8692_v44 = vsub.s32 0, %v8689_v43  ;;  %v8703_v49 = vsub.s32 1, %v8689_v43  ;;  %v8713_v58 = vsub.s32 2, %v8689_v43  ;;  %v8716_v59 = vsub.s32 3, %v8689_v43  ;;  %s8542_s23 = smov [#allocation2]  }
  0x11   :  { %7317 = vmatprep.subr.bf16.mxu1 %v8536_v4  ;;  %247 = vmatprep.subr.bf16.mxu0 %v8098_v23  ;;  %v8749_v22 = vsub.s32 4, %v8689_v43  ;;  %s6476_s24 = sshll.u32 %s8542_s23, 4  ;;  %s6477_s24 = int_to_ptr.vmem [resolvable:$true] %s6476_s24 }
  0x12   :  { %v69_v48 = vrot.slane %v8697_v45, %v8692_v44  ;;  %v75_v53 = vrot.slane %v8697_v45, %v8703_v49  ;;  %v326_v60 = vrot.slane %v8697_v45, %v8713_v58  ;;  %v333_v61 = vrot.slane %v8697_v45, %v8716_v59  ;;  %s8512_s25 = scalar_lea.vmem %s6477_s24, 256  ;;  %p8517_p1 = scmp.lt.s32.totalorder %s6477_s24, %s6477_s24 }
  0x13   :  { %p8513_p0 = scmp.ne.s32.totalorder %s6477_s24, %s8512_s25  ;;  %p8518_p2 = scmp.lt.s32.totalorder %s8512_s25, %s8512_s25 }
  0x14   :  { %248 = vmatpush1.bf16.msra.mxu0 %v8100_v24  ;;  %7318 = vmatpush3.bf16.msra.mxu1 %v8101_v25 }
  0x15   :  { %249 = vmatprep.subr.bf16.mxu0 %v8102_v26  ;;  %7319 = vmatprep.subr.bf16.mxu1 %v8536_v4  ;;  %v340_v26 = vrot.slane %v8697_v45, %v8749_v22  ;;  %p8519_p3 = por %p8518_p2, %p8517_p1 }
  0x17   :  { %p8520_p4 = pnand %p8519_p3, %p8513_p0 }
  0x18   :  { %250 = vmatpush1.bf16.msra.mxu0 %v8104_v27  ;;  %7320 = vmatpush3.bf16.msra.mxu1 %v8105_v28 }
  0x19   :  { %251 = vmatprep.subr.bf16.mxu0 %v8106_v29  ;;  %7321 = vmatprep.subr.bf16.mxu1 %v8536_v4 }
  0x1c   :  { %252 = vmatpush1.bf16.msra.mxu0 %v8108_v31  ;;  %7322 = vmatpush3.bf16.msra.mxu1 %v8109_v32 }
  0x1d   :  { %253 = vmatprep.subr.bf16.mxu0 %v8110_v33  ;;  %7323 = vmatprep.subr.bf16.mxu1 %v8536_v4 }
  0x20   :  { %254 = vmatpush1.bf16.msra.mxu0 %v8112_v34  ;;  %7324 = vmatpush3.bf16.msra.mxu1 %v8113_v35 }
  0x21   :  { %7329 = vmatprep.subr.bf16.mxu1 %v8536_v4  ;;  %7353 = vmatprep.subr.bf16.mxu0 %v8536_v4 }
  0x8f   :  { %v44_v7 = vpop.xlane.xlu0 %43 }
  0x90   :  { %v48_v8 = vmul.f32 0.0078125, %v44_v7 }
  0x92   :  { %v8610_v9 = vsub.f32 %v31_v0, %v48_v8 }
  0x93   :  { %v46_v10 = vpop.xlane.xlu0 %45 }
  0x94   :  { %v49_v11 = vmul.f32 0.0078125, %v46_v10  ;;  %v52_v12 = vmul.f32 %v8610_v9, %v8610_v9 }
  0x96   :  { %54 = vadd.xlane.f32.xlu1 %v52_v12  ;;  %v8614_v13 = vsub.f32 %v32_v1, %v49_v11 }
  0x98   :  { %v53_v14 = vmul.f32 %v8614_v13, %v8614_v13 }
  0x9a   :  { %56 = vadd.xlane.f32.xlu1 %v53_v14 }
 0x123   :  { %v55_v36 = vpop.xlane.xlu1 %54 }
 0x124   :  { %v58_v37 = vmul.f32 0.0078125, %v55_v36 }
 0x126   :  { %v60_v38 = vadd.f32 1e-05, %v58_v37 }
 0x127   :  { %v57_v39 = vpop.xlane.xlu1 %56 }
 0x128   :  { %8306 = vrsqrt.f32 %v60_v38  ;;  %v59_v41 = vmul.f32 0.0078125, %v57_v39 }
 0x12a   :  { %v61_v42 = vadd.f32 1e-05, %v59_v41 }
 0x12c   :  { %8308 = vrsqrt.f32 %v61_v42 }
 0x132   :  { %v8307_v46 = vpop.eup %8306 }
 0x133   :  { %v64_v47 = vmul.f32 %v8307_v46, %v8610_v9 }
 0x135   :  { %v70_v52 = vmul.f32 %v69_v48, %v64_v47  ;;  %v33_v47 = vld [vmem:[%s10376_s1] sm:$0xff] }
 0x136   :  { %v8309_v50 = vpop.eup %8308 }
 0x137   :  { %v65_v51 = vmul.f32 %v8309_v50, %v8614_v13  ;;  %v76_v55 = vadd.f32 %v75_v53, %v70_v52 }
 0x139   :  { %v71_v54 = vmul.f32 %v69_v48, %v65_v51 }
 0x13b   :  { %v77_v56 = vadd.f32 %v75_v53, %v71_v54 }
 0x13d   :  { %v78_v57 = vpack.c.bf16 %v77_v56, %v76_v55  ;;  %v34_v55 = vld [vmem:[%s10376_s1 + $0x8] sm:$0xff] }
 0x13f   :  { %272 = vmatmul.mubr.bf16.vlgmr.msra.gmra.mrb[0].mxu0 %v78_v57  ;;  %7326 = vmatmul.mubr.bf16.vlgmr.msra.gmra.mrb[0].mxu1 %v78_v57 }
 0x140   :  { %7331 = vmatprep.mubr.msk.bf16.mxu1 %vm8538_vm0, %v8536_v4  ;;  %7355 = vmatprep.mubr.msk.bf16.mxu0 %vm8538_vm0, %v8536_v4 }
 0x212   :  { %v273_v62 = vpop.f32.mrb[0].mxu0  ;;  %v316_v63 = vpop.f32.mrb[0].mxu1 }
 0x213   :  { %v327_v0 = vadd.f32 %v326_v60, %v273_v62  ;;  %v275_v1 = vpop.f32.mrb[1].mxu0  ;;  %v7327_v2 = vpop.f32.mrb[1].mxu1  ;;  %v341_v31 = vadd.f32 %v340_v26, %v316_v63 }
 0x214   :  { %v334_v3 = vadd.f32 %v333_v61, %v275_v1  ;;  %v277_v5 = vpop.f32.mrb[2].mxu0  ;;  %v8722_v6 = vpop.f32.mrb[2].mxu1 }
 0x215   :  { %v7013_v7 = vpack.c.bf16 %v327_v0, %v327_v0  ;;  %v279_v8 = vpop.f32.mrb[3].mxu0  ;;  %v7328_v9 = vpop.f32.mrb[3].mxu1  ;;  %v328_v14 = vadd.f32 %v326_v60, %v277_v5  ;;  %v8765_v34 = vpack.c.bf16 %v341_v31, %v341_v31  ;;  %v342_v39 = vadd.f32 %v340_v26, %v8722_v6  ;;  %v35_v0 = vld [vmem:[%s10376_s1 + $0x10] sm:$0xff]  ;;  %v38_v26 = vld [vmem:[%s10376_s1 + $0x28] sm:$0xff] }
 0x216   :  { %v7015_v10 = vpack.c.bf16 %v334_v3, %v334_v3  ;;  %v335_v11 = vadd.f32 %v333_v61, %v279_v8 }
 0x217   :  { %349 = vrot.lane.b32.xlu1 %v7013_v7, %s8539_s15  ;;  %v7014_v15 = vpack.c.bf16 %v328_v14, %v328_v14  ;;  %v866_v37 = vsel %vm864_vm2, %v8765_v34, 0  ;;  %v8784_v41 = vpack.c.bf16 %v342_v39, %v342_v39  ;;  %v40_v39 = vld [vmem:[%s10376_s1 + $0x38] sm:$0xff] }
 0x218   :  { %v7016_v12 = vpack.c.bf16 %v335_v11, %v335_v11  ;;  %366 = vrot.lane.b32.xlu0 %v7015_v10, %s8539_s15  ;;  %v400_v13 = vsel %vm395_vm1, %v7015_v10, 0  ;;  %v36_v11 = vld [vmem:[%s10376_s1 + $0x18] sm:$0xff] }
 0x219   :  { %7330 = vmatpush3.bf16.xpose.msra.mxu1 %v400_v13  ;;  %v912_v46 = vsel %vm864_vm2, %v8784_v41, 0  ;;  %v37_v13 = vld [vmem:[%s10376_s1 + $0x20] sm:$0xff] }
 0x21a   :  { %7335 = vmatprep.subr.bf16.mxu1 %v8536_v4  ;;  %v446_v16 = vsel %vm395_vm1, %v7016_v12, 0 }
 0x21b   :  { %368 = vrot.lane.b32.xlu1 %v7016_v12, %s8539_s15 }
 0x21c   :  { %370 = vrot.lane.b32.xlu0 %v7015_v10, %s8540_s16 }
 0x21f   :  { %351 = vrot.lane.b32.xlu1 %v7014_v15, %s8539_s15 }
 0x220   :  { %353 = vrot.lane.b32.xlu0 %v7013_v7, %s8540_s16  ;;  %7332 = vmatmul.mubr.msk.bf16.vlgmr.msra.gmra.mrb[4].mxu1 %vm395_vm1, %v7013_v7 }
 0x221   :  { %7336 = vmatpush3.bf16.xpose.msra.mxu1 %v446_v16  ;;  %7337 = vmatprep.mubr.msk.bf16.mxu1 %vm8538_vm0, %v8536_v4 }
 0x222   :  { %7341 = vmatprep.subr.bf16.mxu1 %v8536_v4 }
 0x223   :  { %372 = vrot.lane.b32.xlu1 %v7016_v12, %s8540_s16 }
 0x224   :  { %374 = vrot.lane.b32.xlu0 %v7015_v10, %s8541_s17 }
 0x227   :  { %355 = vrot.lane.b32.xlu1 %v7014_v15, %s8540_s16 }
 0x228   :  { %357 = vrot.lane.b32.xlu0 %v7013_v7, %s8541_s17  ;;  %7338 = vmatmul.mubr.msk.bf16.vlgmr.msra.gmra.mrb[8].mxu1 %vm395_vm1, %v7014_v15 }
 0x229   :  { %7343 = vmatprep.mubr.msk.bf16.mxu1 %vm8538_vm0, %v8536_v4 }
 0x22b   :  { %376 = vrot.lane.b32.xlu1 %v7016_v12, %s8541_s17 }
 0x22f   :  { %359 = vrot.lane.b32.xlu1 %v7014_v15, %s8541_s17 }
 0x289   :  { %v350_v17 = vpop.permute.xlu1 %349 }
 0x28a   :  { %v367_v18 = vpop.permute.xlu0 %366 }
 0x28b   :  { %v492_v19 = vsel %vm395_vm1, %v367_v18, 0 }
 0x28c   :  { %7342 = vmatpush3.bf16.xpose.msra.mxu1 %v492_v19 }
 0x28d   :  { %v369_v20 = vpop.permute.xlu1 %368  ;;  %7347 = vmatprep.subr.bf16.mxu1 %v8536_v4 }
 0x28e   :  { %v371_v21 = vpop.permute.xlu0 %370  ;;  %v538_v27 = vsel %vm395_vm1, %v369_v20, 0 }
 0x28f   :  { %v584_v23 = vsel %vm395_vm1, %v371_v21, 0  ;;  %v39_v21 = vld [vmem:[%s10376_s1 + $0x30] sm:$0xff] }
 0x290   :  { %7354 = vmatpush3.bf16.xpose.msra.mxu0 %v584_v23 }
 0x291   :  { %v352_v24 = vpop.permute.xlu1 %351  ;;  %7365 = vmatprep.subr.bf16.mxu0 %v8536_v4 }
 0x292   :  { %v354_v25 = vpop.permute.xlu0 %353 }
 0x293   :  { %7344 = vmatmul.mubr.msk.bf16.vlgmr.msra.gmra.mrb[12].mxu1 %vm395_vm1, %v350_v17 }
 0x294   :  { %7348 = vmatpush3.bf16.xpose.msra.mxu1 %v538_v27  ;;  %7349 = vmatprep.mubr.msk.bf16.mxu1 %vm8538_vm0, %v8536_v4 }
 0x295   :  { %v373_v28 = vpop.permute.xlu1 %372  ;;  %7359 = vmatprep.subr.bf16.mxu1 %v8536_v4 }
 0x296   :  { %v375_v29 = vpop.permute.xlu0 %374  ;;  %v630_v35 = vsel %vm395_vm1, %v373_v28, 0 }
 0x297   :  { %v676_v32 = vsel %vm395_vm1, %v375_v29, 0  ;;  %7356 = vmatmul.mubr.msk.bf16.vlgmr.msra.gmra.mrb[4].mxu0 %vm395_vm1, %v354_v25 }
 0x298   :  { %7366 = vmatpush3.bf16.xpose.msra.mxu0 %v676_v32  ;;  %7367 = vmatprep.mubr.msk.bf16.mxu0 %vm8538_vm0, %v8536_v4 }
 0x299   :  { %7377 = vmatprep.subr.bf16.mxu0 %v8536_v4  ;;  %v356_v33 = vpop.permute.xlu1 %355 }
 0x29a   :  { %v358_v36 = vpop.permute.xlu0 %357 }
 0x29b   :  { %7350 = vmatmul.mubr.msk.bf16.vlgmr.msra.gmra.mrb[16].mxu1 %vm395_vm1, %v352_v24 }
 0x29c   :  { %7360 = vmatpush3.bf16.xpose.msra.mxu1 %v630_v35  ;;  %7361 = vmatprep.mubr.msk.bf16.mxu1 %vm8538_vm0, %v8536_v4 }
 0x29d   :  { %7371 = vmatprep.subr.bf16.mxu1 %v8536_v4  ;;  %v377_v38 = vpop.permute.xlu1 %376 }
 0x29e   :  { %v722_v40 = vsel %vm395_vm1, %v377_v38, 0 }
 0x29f   :  { %7368 = vmatmul.mubr.msk.bf16.vlgmr.msra.gmra.mrb[8].mxu0 %vm395_vm1, %v358_v36 }
 0x2a0   :  { %7378 = vmatpush3.bf16.msra.mxu0 %v866_v37  ;;  %7379 = vmatprep.mubr.msk.bf16.mxu0 %vm8538_vm0, %v8536_v4 }
 0x2a1   :  { %7389 = vmatprep.subr.bf16.mxu0 %v8536_v4  ;;  %v360_v42 = vpop.permute.xlu1 %359 }
 0x2a3   :  { %7362 = vmatmul.mubr.msk.bf16.vlgmr.msra.gmra.mrb[20].mxu1 %vm395_vm1, %v356_v33 }
 0x2a4   :  { %7372 = vmatpush3.bf16.xpose.msra.mxu1 %v722_v40  ;;  %7373 = vmatprep.mubr.msk.bf16.mxu1 %vm8538_vm0, %v8536_v4 }
 0x2a5   :  { %7383 = vmatprep.subr.bf16.mxu1 %v8536_v4 }
 0x2ab   :  { %7374 = vmatmul.mubr.msk.bf16.vlgmr.msra.gmra.mrb[24].mxu1 %vm395_vm1, %v360_v42 }
 0x2ac   :  { %7384 = vmatpush3.bf16.msra.mxu1 %v912_v46  ;;  %7385 = vmatprep.mubr.msk.bf16.mxu1 %vm8538_vm0, %v8536_v4 }
 0x2ad   :  { %7395 = vmatprep.subr.bf16.mxu1 %v8536_v4 }
 0x2f3   :  { %v436_v48 = vpop.f32.mrb[4].mxu1 }
 0x2f4   :  { %v8795_v50 = vadd.f32 %v436_v48, %v33_v47  ;;  %v7333_v51 = vpop.f32.mrb[5].mxu1 }
 0x2f5   :  { %v439_v52 = vpop.f32.mrb[6].mxu1 }
 0x2f6   :  { %v7334_v53 = vpop.f32.mrb[7].mxu1  ;;  %v765_v54 = vsel %vm764_vm3, %v8795_v50, -inf }
 0x2f7   :  { %766 = vmax.xlane.f32.xlu0 %v765_v54 }
 0x2fb   :  { %v482_v56 = vpop.f32.mrb[8].mxu1 }
 0x2fc   :  { %v483_v57 = vadd.f32 %v482_v56, %v34_v55  ;;  %v7339_v60 = vpop.f32.mrb[9].mxu1 }
 0x2fd   :  { %v485_v61 = vpop.f32.mrb[10].mxu1 }
 0x2fe   :  { %v7340_v62 = vpop.f32.mrb[11].mxu1  ;;  %v768_v63 = vsel %vm764_vm3, %v483_v57, -inf }
 0x2ff   :  { %769 = vmax.xlane.f32.xlu1 %v768_v63 }
 0x366   :  { %v528_v1 = vpop.f32.mrb[12].mxu1 }
 0x367   :  { %v8806_v2 = vadd.f32 %v528_v1, %v35_v0  ;;  %v7345_v3 = vpop.f32.mrb[13].mxu1 }
 0x368   :  { %v531_v5 = vpop.f32.mrb[14].mxu1 }
 0x369   :  { %v7346_v6 = vpop.f32.mrb[15].mxu1  ;;  %v771_v7 = vsel %vm764_vm3, %v8806_v2, -inf }
 0x36a   :  { %v620_v8 = vpop.f32.mrb[4].mxu0  ;;  %772 = vmax.xlane.f32.xlu0 %v771_v7 }
 0x36b   :  { %v7357_v9 = vpop.f32.mrb[5].mxu0  ;;  %v8816_v18 = vadd.f32 %v620_v8, %v37_v13 }
 0x36c   :  { %v623_v10 = vpop.f32.mrb[6].mxu0 }
 0x36d   :  { %v7358_v12 = vpop.f32.mrb[7].mxu0  ;;  %v777_v29 = vsel %vm764_vm3, %v8816_v18, -inf }
 0x36e   :  { %v574_v14 = vpop.f32.mrb[16].mxu1 }
 0x36f   :  { %v575_v15 = vadd.f32 %v574_v14, %v36_v11  ;;  %v7351_v16 = vpop.f32.mrb[17].mxu1 }
 0x370   :  { %v577_v17 = vpop.f32.mrb[18].mxu1 }
 0x371   :  { %v7352_v19 = vpop.f32.mrb[19].mxu1  ;;  %v774_v20 = vsel %vm764_vm3, %v575_v15, -inf }
 0x372   :  { %v712_v23 = vpop.f32.mrb[8].mxu0  ;;  %775 = vmax.xlane.f32.xlu0 %v774_v20 }
 0x373   :  { %v7369_v24 = vpop.f32.mrb[9].mxu0  ;;  %v8825_v27 = vadd.f32 %v712_v23, %v39_v21 }
 0x374   :  { %v715_v25 = vpop.f32.mrb[10].mxu0 }
 0x375   :  { %v7370_v28 = vpop.f32.mrb[11].mxu0  ;;  %v783_v37 = vsel %vm764_vm3, %v8825_v27, -inf }
 0x376   :  { %778 = vmax.xlane.f32.xlu0 %v777_v29  ;;  %v666_v31 = vpop.f32.mrb[20].mxu1 }
 0x377   :  { %v667_v32 = vadd.f32 %v666_v31, %v38_v26  ;;  %v7363_v33 = vpop.f32.mrb[21].mxu1 }
 0x378   :  { %v669_v35 = vpop.f32.mrb[22].mxu1 }
 0x379   :  { %v7364_v36 = vpop.f32.mrb[23].mxu1  ;;  %v780_v38 = vsel %vm764_vm3, %v667_v32, -inf }
 0x37a   :  { %784 = vmax.xlane.f32.xlu0 %v783_v37  ;;  %781 = vmax.xlane.f32.xlu1 %v780_v38 }
 0x37e   :  { %v758_v40 = vpop.f32.mrb[24].mxu1 }
 0x37f   :  { %v759_v42 = vadd.f32 %v758_v40, %v40_v39  ;;  %v7375_v46 = vpop.f32.mrb[25].mxu1 }
 0x380   :  { %v761_v47 = vpop.f32.mrb[26].mxu1 }
 0x381   :  { %v7376_v48 = vpop.f32.mrb[27].mxu1  ;;  %v786_v51 = vsel %vm764_vm3, %v759_v42, -inf }
 0x382   :  { %787 = vmax.xlane.f32.xlu1 %v786_v51 }
 0x384   :  { %v767_v52 = vpop.xlane.xlu0 %766 }
 0x385   :  { %v789_v53 = vsub.f32 %v8795_v50, %v767_v52 }
 0x387   :  { %v797_v54 = vmul.f32 1.442695, %v789_v53 }
 0x389   :  { %8310 = vpow2.f32 %v797_v54 }
 0x38c   :  { %v770_v55 = vpop.xlane.xlu1 %769 }
 0x38d   :  { %v790_v56 = vsub.f32 %v483_v57, %v770_v55 }
 0x38f   :  { %v799_v60 = vmul.f32 1.442695, %v790_v56 }
 0x391   :  { %8312 = vpow2.f32 %v799_v60 }
 0x393   :  { %v8311_v61 = vpop.eup %8310 }
 0x394   :  { %v813_v62 = vsel %vm764_vm3, %v8311_v61, 0.0 }
 0x395   :  { %814 = vadd.xlane.f32.xlu0 %v813_v62 }
 0x39b   :  { %v8313_v63 = vpop.eup %8312 }
 0x39c   :  { %v816_v0 = vsel %vm764_vm3, %v8313_v63, 0.0 }
 0x39d   :  { %817 = vadd.xlane.f32.xlu1 %v816_v0 }
 0x3ae   :  { %385 = vrot.lane.b32.xlu1 %v8784_v41, %s8539_s15 }
 0x3b2   :  { %387 = vrot.lane.b32.xlu1 %v8765_v34, %s8540_s16 }
 0x3b6   :  { %389 = vrot.lane.b32.xlu1 %v8784_v41, %s8540_s16 }
 0x3f7   :  { %v773_v50 = vpop.xlane.xlu0 %772 }
 0x3f8   :  { %v791_v57 = vsub.f32 %v8806_v2, %v773_v50 }
 0x3fa   :  { %v801_v1 = vmul.f32 1.442695, %v791_v57 }
 0x3fc   :  { %8314 = vpow2.f32 %v801_v1 }
 0x3ff   :  { %v776_v3 = vpop.xlane.xlu0 %775 }
 0x400   :  { %v792_v5 = vsub.f32 %v575_v15, %v776_v3 }
 0x402   :  { %v803_v6 = vmul.f32 1.442695, %v792_v5 }
 0x403   :  { %v779_v17 = vpop.xlane.xlu0 %778 }
 0x404   :  { %8316 = vpow2.f32 %v803_v6  ;;  %v793_v25 = vsub.f32 %v8816_v18, %v779_v17 }
 0x406   :  { %v8846_v7 = vpop.eup %8314  ;;  %v805_v28 = vmul.f32 1.442695, %v793_v25 }
 0x407   :  { %v782_v8 = vpop.xlane.xlu1 %781  ;;  %v819_v9 = vsel %vm764_vm3, %v8846_v7, 0.0  ;;  %v785_v21 = vpop.xlane.xlu0 %784 }
 0x408   :  { %v794_v10 = vsub.f32 %v667_v32, %v782_v8  ;;  %820 = vadd.xlane.f32.xlu0 %v819_v9  ;;  %v795_v29 = vsub.f32 %v8825_v27, %v785_v21 }
 0x40a   :  { %v807_v11 = vmul.f32 1.442695, %v794_v10  ;;  %v809_v33 = vmul.f32 1.442695, %v795_v29 }
 0x40c   :  { %8318 = vpow2.f32 %v807_v11 }
 0x40e   :  { %v8850_v12 = vpop.eup %8316 }
 0x40f   :  { %v788_v13 = vpop.xlane.xlu1 %787  ;;  %v822_v2 = vsel %vm764_vm3, %v8850_v12, 0.0 }
 0x410   :  { %v796_v14 = vsub.f32 %v759_v42, %v788_v13  ;;  %823 = vadd.xlane.f32.xlu1 %v822_v2 }
 0x412   :  { %v811_v15 = vmul.f32 1.442695, %v796_v14 }
 0x414   :  { %8320 = vpow2.f32 %v811_v15 }
 0x416   :  { %v8854_v16 = vpop.eup %8318 }
 0x417   :  { %v828_v19 = vsel %vm764_vm3, %v8854_v16, 0.0 }
 0x418   :  { %829 = vadd.xlane.f32.xlu1 %v828_v19 }
 0x41e   :  { %v8858_v20 = vpop.eup %8320  ;;  %383 = vrot.lane.b32.xlu0 %v8765_v34, %s8539_s15 }
 0x41f   :  { %v834_v23 = vsel %vm764_vm3, %v8858_v20, 0.0 }
 0x420   :  { %835 = vadd.xlane.f32.xlu1 %v834_v23 }
 0x422   :  { %v815_v24 = vpop.xlane.xlu0 %814 }
 0x423   :  { %8322 = vrcp.f32 %v815_v24 }
 0x42a   :  { %v818_v26 = vpop.xlane.xlu1 %817 }
 0x42b   :  { %8324 = vrcp.f32 %v818_v26 }
 0x42c   :  { %8326 = vpow2.f32 %v805_v28 }
 0x42d   :  { %v8323_v31 = vpop.eup %8322  ;;  %8328 = vpow2.f32 %v809_v33 }
 0x42e   :  { %v845_v32 = vmul.f32 %v8323_v31, %v8311_v61  ;;  %v386_v37 = vpop.permute.xlu1 %385 }
 0x42f   :  { %v1004_v39 = vsel %vm864_vm2, %v386_v37, 0  ;;  %v8116_v37 = vld [vmem:[%s10378_s3 + $0x10] sm:$0xff]  }
 0x430   :  { %v853_v35 = vpack.c.bf16 %v845_v32, %v845_v32  ;;  %v8114_v32 = vld [vmem:[%s10378_s3] sm:$0xff]  }
 0x431   :  { %393 = vrot.lane.b32.xlu1 %v8784_v41, %s8541_s17 }
 0x432   :  { %7380 = vmatmul.mubr.msk.bf16.vlgmr.msra.gmra.mrb[12].mxu0 %vm764_vm3, %v853_v35  ;;  %v388_v46 = vpop.permute.xlu1 %387 }
 0x433   :  { %7391 = vmatprep.mubr.msk.bf16.mxu0 %vm8538_vm0, %v8536_v4  ;;  %v1050_v60 = vsel %vm864_vm2, %v388_v46, 0  ;;  %v8118_v46 = vld [vmem:[%s10378_s3 + $0x20] sm:$0xff]  }
 0x435   :  { %v8325_v18 = vpop.eup %8324 }
 0x436   :  { %v846_v36 = vmul.f32 %v8325_v18, %v8313_v63  ;;  %v8327_v27 = vpop.eup %8326  ;;  %v390_v48 = vpop.permute.xlu1 %389  ;;  %v8115_v18 = vld [vmem:[%s10378_s3 + $0x8] sm:$0xff]  }
 0x437   :  { %v825_v41 = vsel %vm764_vm3, %v8327_v27, 0.0  ;;  %v8329_v40 = vpop.eup %8328  ;;  %v1096_v0 = vsel %vm864_vm2, %v390_v48, 0 }
 0x438   :  { %v854_v38 = vpack.c.bf16 %v846_v36, %v846_v36  ;;  %v831_v42 = vsel %vm764_vm3, %v8329_v40, 0.0 }
 0x43a   :  { %7386 = vmatmul.mubr.msk.bf16.vlgmr.msra.gmra.mrb[28].mxu1 %vm764_vm3, %v854_v38 }
 0x43b   :  { %7396 = vmatpush3.bf16.msra.mxu1 %v1004_v39  ;;  %7397 = vmatprep.mubr.msk.bf16.mxu1 %vm8538_vm0, %v8536_v4 }
 0x43c   :  { %7407 = vmatprep.subr.bf16.mxu1 %v8536_v4 }
 0x43d   :  { %826 = vadd.xlane.f32.xlu0 %v825_v41 }
 0x441   :  { %832 = vadd.xlane.f32.xlu0 %v831_v42 }
 0x457   :  { %391 = vrot.lane.b32.xlu0 %v8765_v34, %s8541_s17 }
 0x495   :  { %v821_v47 = vpop.xlane.xlu0 %820 }
 0x496   :  { %8330 = vrcp.f32 %v821_v47 }
 0x499   :  { %v384_v51 = vpop.permute.xlu0 %383 }
 0x49a   :  { %v958_v52 = vsel %vm864_vm2, %v384_v51, 0 }
 0x49b   :  { %7390 = vmatpush3.bf16.msra.mxu0 %v958_v52 }
 0x49c   :  { %7401 = vmatprep.subr.bf16.mxu0 %v8536_v4 }
 0x49d   :  { %v824_v53 = vpop.xlane.xlu1 %823 }
 0x49e   :  { %8332 = vrcp.f32 %v824_v53 }
 0x4a0   :  { %v8331_v54 = vpop.eup %8330 }
 0x4a1   :  { %v847_v55 = vmul.f32 %v8331_v54, %v8846_v7 }
 0x4a3   :  { %v855_v56 = vpack.c.bf16 %v847_v55, %v847_v55 }
 0x4a5   :  { %7392 = vmatmul.mubr.msk.bf16.vlgmr.msra.gmra.mrb[16].mxu0 %vm764_vm3, %v855_v56  ;;  %v830_v34 = vpop.xlane.xlu1 %829 }
 0x4a6   :  { %7402 = vmatpush3.bf16.msra.mxu0 %v1050_v60  ;;  %7403 = vmatprep.mubr.msk.bf16.mxu0 %vm8538_vm0, %v8536_v4  ;;  %8334 = vrcp.f32 %v830_v34  ;;  %v8119_v60 = vld [vmem:[%s10378_s3 + $0x28] sm:$0xff]   ;;  %v8120_v34 = vld [vmem:[%s10378_s3 + $0x30] sm:$0xff]  }
 0x4a7   :  { %7413 = vmatprep.subr.bf16.mxu0 %v8536_v4 }
 0x4a8   :  { %v8333_v61 = vpop.eup %8332 }
 0x4a9   :  { %v848_v62 = vmul.f32 %v8333_v61, %v8850_v12 }
 0x4ab   :  { %v856_v63 = vpack.c.bf16 %v848_v62, %v848_v62  ;;  %v8121_v62 = vld [vmem:[%s10378_s3 + $0x38] sm:$0xff]  }
 0x4ad   :  { %7398 = vmatmul.mubr.msk.bf16.vlgmr.msra.gmra.mrb[32].mxu1 %vm764_vm3, %v856_v63  ;;  %v836_v50 = vpop.xlane.xlu1 %835 }
 0x4ae   :  { %7408 = vmatpush3.bf16.msra.mxu1 %v1096_v0  ;;  %8336 = vrcp.f32 %v836_v50  ;;  %7409 = vmatprep.mubr.msk.bf16.mxu1 %vm8538_vm0, %v8536_v4 }
 0x4af   :  { %7419 = vmatprep.subr.bf16.mxu1 %v8536_v4 }
 0x4b0   :  { %v8335_v57 = vpop.eup %8334 }
 0x4b1   :  { %v850_v1 = vmul.f32 %v8335_v57, %v8854_v16  ;;  %v394_v3 = vpop.permute.xlu1 %393 }
 0x4b2   :  { %v1188_v6 = vsel %vm864_vm2, %v394_v3, 0 }
 0x4b3   :  { %v858_v5 = vpack.c.bf16 %v850_v1, %v850_v1 }
 0x4b5   :  { %7410 = vmatmul.mubr.msk.bf16.vlgmr.msra.gmra.mrb[36].mxu1 %vm764_vm3, %v858_v5 }
 0x4b6   :  { %7420 = vmatpush3.bf16.msra.mxu1 %v1188_v6  ;;  %7421 = vmatprep.mubr.msk.bf16.mxu1 %vm8538_vm0, %v8536_v4 }
 0x4b7   :  { %7445 = vmatprep.subr.bf16.mxu1 %v8536_v4 }
 0x4b8   :  { %v8337_v7 = vpop.eup %8336 }
 0x4b9   :  { %v852_v8 = vmul.f32 %v8337_v7, %v8858_v20 }
 0x4bb   :  { %v860_v9 = vpack.c.bf16 %v852_v8, %v852_v8 }
 0x4bd   :  { %7422 = vmatmul.mubr.msk.bf16.vlgmr.msra.gmra.mrb[40].mxu1 %vm764_vm3, %v860_v9 }
 0x4be   :  { %7461 = vmatprep.mubr.msk.bf16.mxu1 %vm8538_vm0, %v8536_v4 }
 0x4ca   :  { %v827_v10 = vpop.xlane.xlu0 %826 }
 0x4cb   :  { %8338 = vrcp.f32 %v827_v10 }
 0x4ce   :  { %v833_v11 = vpop.xlane.xlu0 %832 }
 0x4cf   :  { %8340 = vrcp.f32 %v833_v11 }
 0x4d2   :  { %v392_v2 = vpop.permute.xlu0 %391 }
 0x4d3   :  { %v1142_v16 = vsel %vm864_vm2, %v392_v2, 0 }
 0x4d5   :  { %v8339_v12 = vpop.eup %8338 }
 0x4d6   :  { %v849_v13 = vmul.f32 %v8339_v12, %v8327_v27 }
 0x4d8   :  { %v857_v14 = vpack.c.bf16 %v849_v13, %v849_v13 }
 0x4d9   :  { %v8341_v15 = vpop.eup %8340 }
 0x4da   :  { %7404 = vmatmul.mubr.msk.bf16.vlgmr.msra.gmra.mrb[20].mxu0 %vm764_vm3, %v857_v14  ;;  %v851_v17 = vmul.f32 %v8341_v15, %v8329_v40  ;;  %v8117_v40 = vld [vmem:[%s10378_s3 + $0x18] sm:$0xff]  }
 0x4db   :  { %7414 = vmatpush3.bf16.msra.mxu0 %v1142_v16  ;;  %7415 = vmatprep.mubr.msk.bf16.mxu0 %vm8538_vm0, %v8536_v4 }
 0x4dc   :  { %7425 = vmatprep.subr.bf16.mxu0 %v8536_v4  ;;  %v859_v19 = vpack.c.bf16 %v851_v17, %v851_v17 }
 0x4e2   :  { %7416 = vmatmul.mubr.msk.bf16.vlgmr.msra.gmra.mrb[24].mxu0 %vm764_vm3, %v859_v19 }
 0x4e3   :  { %7441 = vmatprep.mubr.msk.bf16.mxu0 %vm8538_vm0, %v8536_v4  ;;  %7426 = vmatpush3.bf16.msra.mxu0 %v8114_v32 }
 0x4e4   :  { %7427 = vmatprep.subr.bf16.mxu0 %v8536_v4 }
 0x4e7   :  { %7428 = vmatpush3.bf16.msra.mxu0 %v8115_v18 }
 0x4e8   :  { %7429 = vmatprep.subr.bf16.mxu0 %v8536_v4 }
 0x4eb   :  { %7430 = vmatpush3.bf16.msra.mxu0 %v8116_v37  ;;  %v8487_v37 = vld [vmem:[%s10375_s0 + $0x8] sm:$0xff] }
 0x4ec   :  { %7431 = vmatprep.subr.bf16.mxu0 %v8536_v4 }
 0x4ef   :  { %7432 = vmatpush3.bf16.msra.mxu0 %v8117_v40 }
 0x4f0   :  { %7433 = vmatprep.subr.bf16.mxu0 %v8536_v4 }
 0x4f3   :  { %7434 = vmatpush3.bf16.msra.mxu0 %v8118_v46 }
 0x4f4   :  { %7435 = vmatprep.subr.bf16.mxu0 %v8536_v4 }
 0x4f7   :  { %7436 = vmatpush3.bf16.msra.mxu0 %v8119_v60  ;;  %v8128_v60 = vld [vmem:[%s10379_s4 + $0x30] sm:$0xff]  }
 0x4f8   :  { %7437 = vmatprep.subr.bf16.mxu0 %v8536_v4 }
 0x4fb   :  { %7438 = vmatpush3.bf16.msra.mxu0 %v8120_v34  ;;  %v8129_v34 = vld [vmem:[%s10379_s4 + $0x38] sm:$0xff]  }
 0x4fc   :  { %7439 = vmatprep.subr.bf16.mxu0 %v8536_v4 }
 0x4ff   :  { %7440 = vmatpush3.bf16.msra.mxu0 %v8121_v62  ;;  %v8131_v62 = vld [vmem:[%s10380_s5 + $0x8] sm:$0xff]  }
 0x500   :  { %7465 = vmatprep.subr.bf16.mxu0 %v8536_v4 }
 0x505   :  { %v8912_v20 = vpop.f32.mrb[12].mxu0 }
 0x506   :  { %v7381_v21 = vpop.f32.mrb[13].mxu0 }
 0x507   :  { %v905_v23 = vpop.f32.mrb[14].mxu0 }
 0x508   :  { %v7382_v24 = vpop.f32.mrb[15].mxu0 }
 0x50d   :  { %v8914_v25 = vpop.f32.mrb[28].mxu1 }
 0x50e   :  { %v7387_v26 = vpop.f32.mrb[29].mxu1 }
 0x50f   :  { %v951_v28 = vpop.f32.mrb[30].mxu1 }
 0x510   :  { %v7388_v29 = vpop.f32.mrb[31].mxu1 }
 0x578   :  { %v994_v31 = vpop.f32.mrb[16].mxu0 }
 0x579   :  { %v7393_v33 = vpop.f32.mrb[17].mxu0 }
 0x57a   :  { %v997_v35 = vpop.f32.mrb[18].mxu0  ;;  %v8486_v33 = vld [vmem:[%s10375_s0] sm:$0xff] }
 0x57b   :  { %v7394_v36 = vpop.f32.mrb[19].mxu0 }
 0x580   :  { %v1040_v38 = vpop.f32.mrb[32].mxu1 }
 0x581   :  { %v8022_v27 = vpack.i.bf16 %v1040_v38, %v994_v31  ;;  %v7399_v39 = vpop.f32.mrb[33].mxu1 }
 0x582   :  { %v1043_v41 = vpop.f32.mrb[34].mxu1 }
 0x583   :  { %8023 = vrot.lane.b32.xlu0 %v8022_v27, %s8541_s17  ;;  %v7400_v42 = vpop.f32.mrb[35].mxu1  ;;  %v8122_v27 = vld [vmem:[%s10379_s4] sm:$0xff]  }
 0x584   :  { %7446 = vmatpush3.bf16.msra.mxu1 %v8122_v27 }
 0x585   :  { %7447 = vmatprep.subr.bf16.mxu1 %v8536_v4 }
 0x588   :  { %v1132_v47 = vpop.f32.mrb[36].mxu1 }
 0x589   :  { %v7411_v48 = vpop.f32.mrb[37].mxu1 }
 0x58a   :  { %v1135_v51 = vpop.f32.mrb[38].mxu1 }
 0x58b   :  { %v7412_v52 = vpop.f32.mrb[39].mxu1 }
 0x58c   :  { %v8123_v52 = vld [vmem:[%s10379_s4 + $0x8] sm:$0xff]  }
 0x58d   :  { %7448 = vmatpush3.bf16.msra.mxu1 %v8123_v52 }
 0x58e   :  { %7449 = vmatprep.subr.bf16.mxu1 %v8536_v4 }
 0x590   :  { %v1224_v53 = vpop.f32.mrb[40].mxu1 }
 0x591   :  { %v7423_v54 = vpop.f32.mrb[41].mxu1 }
 0x592   :  { %v1227_v55 = vpop.f32.mrb[42].mxu1  ;;  %v8125_v54 = vld [vmem:[%s10379_s4 + $0x18] sm:$0xff]  }
 0x593   :  { %v7424_v56 = vpop.f32.mrb[43].mxu1  ;;  %v8126_v55 = vld [vmem:[%s10379_s4 + $0x20] sm:$0xff]  }
 0x594   :  { %v8127_v56 = vld [vmem:[%s10379_s4 + $0x28] sm:$0xff]  }
 0x5ad   :  { %v1086_v61 = vpop.f32.mrb[20].mxu0 }
 0x5ae   :  { %v8027_v63 = vpack.i.bf16 %v1132_v47, %v1086_v61  ;;  %v7405_v0 = vpop.f32.mrb[21].mxu0  ;;  %v8130_v61 = vld [vmem:[%s10380_s5] sm:$0xff]  }
 0x5af   :  { %v1089_v50 = vpop.f32.mrb[22].mxu0 }
 0x5b0   :  { %v7406_v57 = vpop.f32.mrb[23].mxu0  ;;  %8028 = vrot.lane.b32.xlu1 %v8027_v63, %s8540_s16 }
 0x5b5   :  { %v1178_v1 = vpop.f32.mrb[24].mxu0 }
 0x5b6   :  { %v8032_v3 = vpack.i.bf16 %v1224_v53, %v1178_v1  ;;  %v7417_v5 = vpop.f32.mrb[25].mxu0  ;;  %v8124_v53 = vld [vmem:[%s10379_s4 + $0x10] sm:$0xff]  }
 0x5b7   :  { %v1181_v6 = vpop.f32.mrb[26].mxu0  ;;  %7450 = vmatpush3.bf16.msra.mxu1 %v8124_v53  ;;  %v9020_v5 = vsub.s32 6, %v8689_v43 }
 0x5b8   :  { %v7418_v7 = vpop.f32.mrb[27].mxu0  ;;  %8033 = vrot.lane.b32.xlu0 %v8032_v3, %s8539_s15  ;;  %7451 = vmatprep.subr.bf16.mxu1 %v8536_v4 }
 0x5bb   :  { %7452 = vmatpush3.bf16.msra.mxu1 %v8125_v54 }
 0x5bc   :  { %7453 = vmatprep.subr.bf16.mxu1 %v8536_v4 }
 0x5bf   :  { %7454 = vmatpush3.bf16.msra.mxu1 %v8126_v55 }
 0x5c0   :  { %7455 = vmatprep.subr.bf16.mxu1 %v8536_v4 }
 0x5c3   :  { %7456 = vmatpush3.bf16.msra.mxu1 %v8127_v56 }
 0x5c4   :  { %7457 = vmatprep.subr.bf16.mxu1 %v8536_v4 }
 0x5c7   :  { %7458 = vmatpush3.bf16.msra.mxu1 %v8128_v60 }
 0x5c8   :  { %7459 = vmatprep.subr.bf16.mxu1 %v8536_v4 }
 0x5cb   :  { %7460 = vmatpush3.bf16.msra.mxu1 %v8129_v34 }
 0x5f5   :  { %v8024_v8 = vpop.permute.xlu0 %8023 }
 0x5f6   :  { %v8026_v10 = vunpack.i.h.bf16 %v8024_v8  ;;  %v8025_v11 = vunpack.i.l.bf16 %v8024_v8  ;;  %v1399_v8 = vrot.slane %v8697_v45, %v9020_v5 }
 0x5f8   :  { %v1255_v14 = vsel %vm395_vm1, %v8914_v25, %v8026_v10  ;;  %v1254_v15 = vsel %vm395_vm1, %v8912_v20, %v8025_v11  ;;  %v8962_v25 = vsub.s32 5, %v8689_v43 }
 0x5fa   :  { %v1282_v20 = vrot.slane %v8697_v45, %v8962_v25 }
 0x622   :  { %v8029_v9 = vpop.permute.xlu1 %8028 }
 0x623   :  { %v8031_v12 = vunpack.i.h.bf16 %v8029_v9  ;;  %v8030_v13 = vunpack.i.l.bf16 %v8029_v9  ;;  %v9025_v9 = vsub.s32 7, %v8689_v43  ;;  %v8133_v43 = vld [vmem:[%s10380_s5 + $0x18] sm:$0xff]  }
 0x625   :  { %v1258_v19 = vsel %vm1256_vm4, %v1255_v14, %v8031_v12  ;;  %v1257_v21 = vsel %vm1256_vm4, %v1254_v15, %v8030_v13  ;;  %v1405_v13 = vrot.slane %v8697_v45, %v9025_v9  ;;  %v8134_v45 = vld [vmem:[%s10380_s5 + $0x20] sm:$0xff]  }
 0x62a   :  { %v8034_v2 = vpop.permute.xlu0 %8033 }
 0x62b   :  { %v8036_v16 = vunpack.i.h.bf16 %v8034_v2  ;;  %v8035_v17 = vunpack.i.l.bf16 %v8034_v2 }
 0x62d   :  { %v1261_v23 = vsel %vm1259_vm5, %v1258_v19, %v8036_v16  ;;  %v1260_v24 = vsel %vm1259_vm5, %v1257_v21, %v8035_v17  ;;  %v8132_v17 = vld [vmem:[%s10380_s5 + $0x10] sm:$0xff]   ;;  %v8135_v19 = vld [vmem:[%s10380_s5 + $0x28] sm:$0xff]  }
 0x62e   :  { %v1262_v26 = vpack.c.bf16 %v1261_v23, %v1260_v24  ;;  %v8136_v21 = vld [vmem:[%s10380_s5 + $0x30] sm:$0xff]   ;;  %v8137_v23 = vld [vmem:[%s10380_s5 + $0x38] sm:$0xff]   ;;  %v42_v24 = vld [vmem:[%s10381_s6 + $0x8] sm:$0x3] }
 0x630   :  { %7442 = vmatmul.mubr.bf16.vlgmr.msra.gmra.mrb[28].mxu0 %v1262_v26  ;;  %v1428_v26 = vrot.slane %v42_v24, %v8692_v44 }
 0x631   :  { %7481 = vmatprep.mubr.msk.bf16.mxu0 %vm8538_vm0, %v8536_v4  ;;  %7466 = vmatpush3.bf16.msra.mxu0 %v8130_v61 }
 0x632   :  { %7467 = vmatprep.subr.bf16.mxu0 %v8536_v4 }
 0x635   :  { %7468 = vmatpush3.bf16.msra.mxu0 %v8131_v62  ;;  %v8138_v62 = vld [vmem:[%s10377_s2 + $0xc0] ss:$12 sps:$4 sm:$0xff]  }
 0x636   :  { %7469 = vmatprep.subr.bf16.mxu0 %v8536_v4 }
 0x639   :  { %7470 = vmatpush3.bf16.msra.mxu0 %v8132_v17  ;;  %v8156_v17 = vld [vmem:[%s10377_s2 + $0x124] ss:$12 sps:$4 sm:$0xff]  }
 0x63a   :  { %7471 = vmatprep.subr.bf16.mxu0 %v8536_v4 }
 0x63d   :  { %7472 = vmatpush3.bf16.msra.mxu0 %v8133_v43  ;;  %v8154_v43 = vld [vmem:[%s10377_s2 + $0x120] ss:$12 sps:$4 sm:$0xff]  }
 0x63e   :  { %7473 = vmatprep.subr.bf16.mxu0 %v8536_v4 }
 0x641   :  { %7474 = vmatpush3.bf16.msra.mxu0 %v8134_v45  ;;  %v8157_v45 = vld [vmem:[%s10377_s2 + $0x128] ss:$12 sps:$4 sm:$0xff]  }
 0x642   :  { %7475 = vmatprep.subr.bf16.mxu0 %v8536_v4 }
 0x645   :  { %7476 = vmatpush3.bf16.msra.mxu0 %v8135_v19  ;;  %v8160_v19 = vld [vmem:[%s10377_s2 + $0x13c] ss:$12 sps:$4 sm:$0xff]  }
 0x646   :  { %7477 = vmatprep.subr.bf16.mxu0 %v8536_v4 }
 0x649   :  { %7478 = vmatpush3.bf16.msra.mxu0 %v8136_v21  ;;  %v8158_v21 = vld [vmem:[%s10377_s2 + $0x138] ss:$12 sps:$4 sm:$0xff]  }
 0x64a   :  { %7479 = vmatprep.subr.bf16.mxu0 %v8536_v4 }
 0x64d   :  { %7480 = vmatpush3.bf16.msra.mxu0 %v8137_v23  ;;  %v8161_v23 = vld [vmem:[%s10377_s2 + $0x140] ss:$12 sps:$4 sm:$0xff]  }
 0x64e   :  { %7485 = vmatprep.subr.bf16.mxu0 %v8536_v4 }
 0x703   :  { %v1365_v28 = vpop.f32.mrb[28].mxu0 }
 0x704   :  { %v1366_v29 = vadd.f32 %v1365_v28, %v1282_v20  ;;  %v7443_v31 = vpop.f32.mrb[29].mxu0 }
 0x705   :  { %v1368_v32 = vpop.f32.mrb[30].mxu0 }
 0x706   :  { %v8969_v35 = vadd.f32 %v8486_v33, %v1366_v29  ;;  %v1369_v18 = vadd.f32 %v1368_v32, %v1282_v20  ;;  %v7444_v36 = vpop.f32.mrb[31].mxu0 }
 0x708   :  { %v8974_v38 = vadd.f32 %v8487_v37, %v1369_v18  ;;  %1374 = vadd.xlane.f32.xlu1 %v8969_v35 }
 0x70a   :  { %1376 = vadd.xlane.f32.xlu0 %v8974_v38 }
 0x795   :  { %v1375_v39 = vpop.xlane.xlu1 %1374 }
 0x796   :  { %v1378_v41 = vmul.f32 0.0078125, %v1375_v39 }
 0x797   :  { %v1377_v40 = vpop.xlane.xlu0 %1376 }
 0x798   :  { %v1379_v42 = vmul.f32 0.0078125, %v1377_v40  ;;  %v1380_v46 = vsub.f32 %v8969_v35, %v1378_v41 }
 0x79a   :  { %v1382_v47 = vmul.f32 %v1380_v46, %v1380_v46  ;;  %v1381_v48 = vsub.f32 %v8974_v38, %v1379_v42 }
 0x79c   :  { %1384 = vadd.xlane.f32.xlu0 %v1382_v47  ;;  %v1383_v51 = vmul.f32 %v1381_v48, %v1381_v48 }
 0x7a0   :  { %1386 = vadd.xlane.f32.xlu0 %v1383_v51  ;;  %v1548_v51 = vrot.slane %v42_v24, %v8703_v49  ;;  %v8164_v24 = vld [vmem:[%s10377_s2 + $0x154] ss:$12 sps:$4 sm:$0xff]  }
 0x829   :  { %v1385_v63 = vpop.xlane.xlu0 %1384 }
 0x82a   :  { %v1388_v0 = vmul.f32 0.0078125, %v1385_v63  ;;  %v8140_v63 = vld [vmem:[%s10377_s2 + $0xc4] ss:$12 sps:$4 sm:$0xff]  }
 0x82b   :  { %1839 = vmatprep.subr.bf16.mxu1 %v8140_v63 }
 0x82c   :  { %v1390_v50 = vadd.f32 1e-05, %v1388_v0  ;;  %v8145_v0 = vld [vmem:[%s10377_s2 + $0xe0] ss:$12 sps:$4 sm:$0xff]  }
 0x82d   :  { %v1387_v57 = vpop.xlane.xlu0 %1386 }
 0x82e   :  { %8342 = vrsqrt.f32 %v1390_v50  ;;  %v1389_v1 = vmul.f32 0.0078125, %v1387_v57  ;;  %v8142_v50 = vld [vmem:[%s10377_s2 + $0xd8] ss:$12 sps:$4 sm:$0xff]  }
 0x830   :  { %v1391_v3 = vadd.f32 1e-05, %v1389_v1 }
 0x832   :  { %8344 = vrsqrt.f32 %v1391_v3 }
 0x838   :  { %v8343_v6 = vpop.eup %8342 }
 0x839   :  { %v1394_v7 = vmul.f32 %v8343_v6, %v1380_v46 }
 0x83b   :  { %v1400_v12 = vmul.f32 %v1399_v8, %v1394_v7 }
 0x83c   :  { %v8345_v10 = vpop.eup %8344 }
 0x83d   :  { %v1395_v11 = vmul.f32 %v8345_v10, %v1381_v48  ;;  %v1406_v14 = vadd.f32 %v1405_v13, %v1400_v12  ;;  %v8148_v12 = vld [vmem:[%s10377_s2 + $0xf4] ss:$12 sps:$4 sm:$0xff]  }
 0x83f   :  { %v1401_v2 = vmul.f32 %v1399_v8, %v1395_v11 }
 0x841   :  { %v1407_v15 = vadd.f32 %v1405_v13, %v1401_v2  ;;  %v8146_v13 = vld [vmem:[%s10377_s2 + $0xf0] ss:$12 sps:$4 sm:$0xff]   ;;  %v8149_v2 = vld [vmem:[%s10377_s2 + $0xf8] ss:$12 sps:$4 sm:$0xff]  }
 0x843   :  { %v1408_v16 = vpack.c.bf16 %v1407_v15, %v1406_v14  ;;  %v8152_v14 = vld [vmem:[%s10377_s2 + $0x10c] ss:$12 sps:$4 sm:$0xff]   ;;  %v8150_v15 = vld [vmem:[%s10377_s2 + $0x108] ss:$12 sps:$4 sm:$0xff]  }
 0x845   :  { %7462 = vmatmul.mubr.bf16.vlgmr.msra.gmra.mrb[44].mxu1 %v1408_v16  ;;  %v8153_v16 = vld [vmem:[%s10377_s2 + $0x110] ss:$12 sps:$4 sm:$0xff]  }
 0x846   :  { %1871 = vmatprep.mubr.bf16.mxu1 %v8537_v30  ;;  %1840 = vmatpush1.bf16.msra.mxu1 %v8138_v62 }
 0x918   :  { %v1511_v20 = vpop.f32.mrb[44].mxu1 }
 0x919   :  { %v1512_v28 = vadd.f32 %v1511_v20, %v1428_v26  ;;  %v7463_v29 = vpop.f32.mrb[45].mxu1  ;;  %v8165_v20 = vld [vmem:[%s10377_s2 + $0x158] ss:$12 sps:$4 sm:$0xff]  }
 0x91a   :  { %v1514_v31 = vpop.f32.mrb[46].mxu1  ;;  %v8166_v29 = vld [vmem:[%s10377_s2 + $0x168] ss:$12 sps:$4 sm:$0xff]  }
 0x91b   :  { %v1520_v32 = vmul.f32 0.70710677, %v1512_v28  ;;  %v1515_v33 = vadd.f32 %v1514_v31, %v1428_v26  ;;  %v7464_v18 = vpop.f32.mrb[47].mxu1  ;;  %v1518_v41 = vmul.f32 0.5, %v1512_v28  ;;  %v8162_v26 = vld [vmem:[%s10377_s2 + $0x150] ss:$12 sps:$4 sm:$0xff]  }
 0x91c   :  { %v8168_v28 = vld [vmem:[%s10377_s2 + $0x16c] ss:$12 sps:$4 sm:$0xff]   ;;  %v8169_v31 = vld [vmem:[%s10377_s2 + $0x170] ss:$12 sps:$4 sm:$0xff]  }
 0x91d   :  { %8346 = verf.f32 %v1520_v32  ;;  %v1521_v36 = vmul.f32 0.70710677, %v1515_v33  ;;  %v1519_v40 = vmul.f32 0.5, %v1515_v33 }
 0x91f   :  { %8348 = verf.f32 %v1521_v36 }
 0x927   :  { %v8347_v37 = vpop.eup %8346 }
 0x928   :  { %v1524_v27 = vadd.f32 1.0, %v8347_v37 }
 0x929   :  { %v8349_v39 = vpop.eup %8348 }
 0x92a   :  { %v1525_v42 = vadd.f32 1.0, %v8349_v39  ;;  %v1526_v46 = vmul.f32 %v1524_v27, %v1518_v41  ;;  %v9155_v39 = vld [vmem:[%s10381_s6 + $0x10] sm:$0xff] }
 0x92b   :  { %v1668_v41 = vrot.slane %v9155_v39, %v8692_v44 }
 0x92c   :  { %v1527_v47 = vmul.f32 %v1525_v42, %v1519_v40 }
 0x92e   :  { %v1528_v48 = vpack.c.bf16 %v1527_v47, %v1526_v46 }
 0x930   :  { %7482 = vmatmul.mubr.bf16.vlgmr.msra.gmra.mrb[32].mxu0 %v1528_v48 }
 0x931   :  { %7501 = vmatprep.mubr.msk.bf16.mxu0 %vm8538_vm0, %v8536_v4 }
 0xa03   :  { %v1631_v52 = vpop.f32.mrb[32].mxu0 }
 0xa04   :  { %v1632_v53 = vadd.f32 %v1631_v52, %v1548_v51  ;;  %v7483_v54 = vpop.f32.mrb[33].mxu0 }
 0xa05   :  { %v1634_v55 = vpop.f32.mrb[34].mxu0 }
 0xa06   :  { %v9062_v56 = vadd.f32 %v1632_v53, %v8969_v35  ;;  %v1635_v60 = vadd.f32 %v1634_v55, %v1548_v51  ;;  %v7484_v34 = vpop.f32.mrb[35].mxu0  ;;  %v8141_v35 = vld [vmem:[%s10377_s2 + $0xc8] ss:$12 sps:$4 sm:$0xff]   ;;  %v1674_v51 = vrot.slane %v9155_v39, %v8703_v49 }
 0xa07   :  { %7486 = vmatpush3.bf16.msra.mxu0 %v8141_v35  ;;  %v1933_v34 = vrot.slane %v9155_v39, %v8716_v59 }
 0xa08   :  { %v9065_v61 = vadd.f32 %v1635_v60, %v8974_v38  ;;  %1643 = vadd.xlane.f32.xlu1 %v9062_v56  ;;  %v8144_v38 = vld [vmem:[%s10377_s2 + $0xdc] ss:$12 sps:$4 sm:$0xff]   ;;  %7487 = vmatprep.subr.bf16.mxu0 %v8536_v4  ;;  %v1926_v60 = vrot.slane %v9155_v39, %v8713_v58 }
 0xa09   :  { %1841 = vmatprep.subr.bf16.mxu1 %v8144_v38 }
 0xa0a   :  { %1645 = vadd.xlane.f32.xlu0 %v9065_v61  ;;  %1842 = vmatpush1.bf16.msra.mxu1 %v8142_v50 }
 0xa0b   :  { %7488 = vmatpush3.bf16.msra.mxu0 %v8145_v0  ;;  %1843 = vmatprep.subr.bf16.mxu1 %v8148_v12 }
 0xa0c   :  { %7489 = vmatprep.subr.bf16.mxu0 %v8536_v4 }
 0xa0e   :  { %1844 = vmatpush1.bf16.msra.mxu1 %v8146_v13 }
 0xa0f   :  { %7490 = vmatpush3.bf16.msra.mxu0 %v8149_v2  ;;  %1845 = vmatprep.subr.bf16.mxu1 %v8152_v14 }
 0xa10   :  { %7491 = vmatprep.subr.bf16.mxu0 %v8536_v4 }
 0xa12   :  { %1846 = vmatpush1.bf16.msra.mxu1 %v8150_v15 }
 0xa13   :  { %7492 = vmatpush3.bf16.msra.mxu0 %v8153_v16  ;;  %1847 = vmatprep.subr.bf16.mxu1 %v8156_v17 }
 0xa14   :  { %7493 = vmatprep.subr.bf16.mxu0 %v8536_v4 }
 0xa16   :  { %1848 = vmatpush1.bf16.msra.mxu1 %v8154_v43 }
 0xa17   :  { %7494 = vmatpush3.bf16.msra.mxu0 %v8157_v45  ;;  %1849 = vmatprep.subr.bf16.mxu1 %v8160_v19 }
 0xa18   :  { %7495 = vmatprep.subr.bf16.mxu0 %v8536_v4 }
 0xa1a   :  { %1850 = vmatpush1.bf16.msra.mxu1 %v8158_v21 }
 0xa1b   :  { %7496 = vmatpush3.bf16.msra.mxu0 %v8161_v23  ;;  %1851 = vmatprep.subr.bf16.mxu1 %v8164_v24 }
 0xa1c   :  { %7497 = vmatprep.subr.bf16.mxu0 %v8536_v4 }
 0xa1e   :  { %1852 = vmatpush1.bf16.msra.mxu1 %v8162_v26 }
 0xa1f   :  { %7498 = vmatpush3.bf16.msra.mxu0 %v8165_v20  ;;  %1853 = vmatprep.subr.bf16.mxu1 %v8168_v28  ;;  %v1940_v28 = vrot.slane %v9155_v39, %v8749_v22 }
 0xa20   :  { %7499 = vmatprep.subr.bf16.mxu0 %v8536_v4 }
 0xa22   :  { %1854 = vmatpush1.bf16.msra.mxu1 %v8166_v29 }
 0xa23   :  { %7500 = vmatpush3.bf16.msra.mxu0 %v8169_v31  ;;  %7505 = vmatprep.subr.bf16.mxu1 %v8536_v4 }
 0xa24   :  { %7529 = vmatprep.subr.bf16.mxu0 %v8536_v4 }
 0xa95   :  { %v1644_v57 = vpop.xlane.xlu1 %1643 }
 0xa96   :  { %v1647_v1 = vmul.f32 0.0078125, %v1644_v57 }
 0xa97   :  { %v1646_v3 = vpop.xlane.xlu0 %1645 }
 0xa98   :  { %v1648_v6 = vmul.f32 0.0078125, %v1646_v3  ;;  %v1649_v7 = vsub.f32 %v9062_v56, %v1647_v1 }
 0xa9a   :  { %v1651_v8 = vmul.f32 %v1649_v7, %v1649_v7  ;;  %v1650_v10 = vsub.f32 %v9065_v61, %v1648_v6 }
 0xa9c   :  { %1653 = vadd.xlane.f32.xlu1 %v1651_v8  ;;  %v1652_v11 = vmul.f32 %v1650_v10, %v1650_v10 }
 0xa9e   :  { %1655 = vadd.xlane.f32.xlu0 %v1652_v11 }
 0xb29   :  { %v1654_v32 = vpop.xlane.xlu1 %1653 }
 0xb2a   :  { %v1657_v33 = vmul.f32 0.0078125, %v1654_v32 }
 0xb2b   :  { %v1656_v18 = vpop.xlane.xlu0 %1655 }
 0xb2c   :  { %v1659_v36 = vadd.f32 1e-05, %v1657_v33  ;;  %v1658_v37 = vmul.f32 0.0078125, %v1656_v18 }
 0xb2e   :  { %8350 = vrsqrt.f32 %v1659_v36  ;;  %v1660_v27 = vadd.f32 1e-05, %v1658_v37 }
 0xb30   :  { %8352 = vrsqrt.f32 %v1660_v27 }
 0xb38   :  { %v8351_v40 = vpop.eup %8350 }
 0xb39   :  { %v1663_v42 = vmul.f32 %v8351_v40, %v1649_v7 }
 0xb3a   :  { %v8353_v46 = vpop.eup %8352 }
 0xb3b   :  { %v1664_v47 = vmul.f32 %v8353_v46, %v1650_v10  ;;  %v1669_v48 = vmul.f32 %v1668_v41, %v1663_v42 }
 0xb3d   :  { %v1670_v52 = vmul.f32 %v1668_v41, %v1664_v47  ;;  %v1675_v53 = vadd.f32 %v1674_v51, %v1669_v48 }
 0xb3f   :  { %v1676_v54 = vadd.f32 %v1674_v51, %v1670_v52  ;;  %v8488_v51 = vld [vmem:[%s10376_s1] sm:$0xff] }
 0xb41   :  { %v1677_v55 = vpack.c.bf16 %v1676_v54, %v1675_v53 }
 0xb43   :  { %1872 = vmatmul.mubr.bf16.vlgmr.msra.gmra.mrb[48].mxu1 %v1677_v55  ;;  %7502 = vmatmul.mubr.bf16.vlgmr.msra.gmra.mrb[36].mxu0 %v1677_v55 }
 0xb44   :  { %7507 = vmatprep.mubr.msk.bf16.mxu1 %vm8538_vm0, %v8536_v4  ;;  %7531 = vmatprep.mubr.msk.bf16.mxu0 %vm8538_vm0, %v8536_v4 }
 0xc16   :  { %v1873_v62 = vpop.f32.mrb[48].mxu1  ;;  %v9169_v63 = vpop.f32.mrb[36].mxu0 }
 0xc17   :  { %v1927_v35 = vadd.f32 %v1926_v60, %v1873_v62  ;;  %v1875_v38 = vpop.f32.mrb[49].mxu1  ;;  %v7503_v0 = vpop.f32.mrb[37].mxu0  ;;  %v1941_v32 = vadd.f32 %v1940_v28, %v9169_v63  ;;  %v8489_v62 = vld [vmem:[%s10376_s1 + $0x8] sm:$0xff] }
 0xc18   :  { %v1934_v50 = vadd.f32 %v1933_v34, %v1875_v38  ;;  %v1877_v57 = vpop.f32.mrb[50].mxu1  ;;  %v9171_v1 = vpop.f32.mrb[38].mxu0 }
 0xc19   :  { %v7019_v3 = vpack.c.bf16 %v1927_v35, %v1927_v35  ;;  %v1879_v6 = vpop.f32.mrb[51].mxu1  ;;  %v7504_v7 = vpop.f32.mrb[39].mxu0  ;;  %v1928_v13 = vadd.f32 %v1926_v60, %v1877_v57  ;;  %v9217_v36 = vpack.c.bf16 %v1941_v32, %v1941_v32  ;;  %v1942_v37 = vadd.f32 %v1940_v28, %v9171_v1  ;;  %v8490_v1 = vld [vmem:[%s10376_s1 + $0x10] sm:$0xff] }
 0xc1a   :  { %v7021_v8 = vpack.c.bf16 %v1934_v50, %v1934_v50  ;;  %v1935_v10 = vadd.f32 %v1933_v34, %v1879_v6 }
 0xc1b   :  { %1949 = vrot.lane.b32.xlu0 %v7019_v3, %s8539_s15  ;;  %v7020_v2 = vpack.c.bf16 %v1928_v13, %v1928_v13  ;;  %v9225_v40 = vpack.c.bf16 %v1942_v37, %v1942_v37  ;;  %v2463_v42 = vsel %vm864_vm2, %v9217_v36, 0  ;;  %v8494_v37 = vld [vmem:[%s10376_s1 + $0x30] sm:$0xff] }
 0xc1c   :  { %v7022_v11 = vpack.c.bf16 %v1935_v10, %v1935_v10  ;;  %1966 = vrot.lane.b32.xlu1 %v7021_v8, %s8539_s15  ;;  %v1999_v12 = vsel %vm395_vm1, %v7021_v8, 0 }
 0xc1d   :  { %7506 = vmatpush3.bf16.xpose.msra.mxu1 %v1999_v12  ;;  %v2509_v47 = vsel %vm864_vm2, %v9225_v40, 0  ;;  %v8491_v12 = vld [vmem:[%s10376_s1 + $0x18] sm:$0xff] }
 0xc1e   :  { %7511 = vmatprep.subr.bf16.mxu1 %v8536_v4  ;;  %v2045_v14 = vsel %vm395_vm1, %v7022_v11, 0 }
 0xc1f   :  { %1972 = vrot.lane.b32.xlu0 %v7022_v11, %s8540_s16 }
 0xc20   :  { %1968 = vrot.lane.b32.xlu1 %v7022_v11, %s8539_s15 }
 0xc23   :  { %1955 = vrot.lane.b32.xlu0 %v7020_v2, %s8540_s16 }
 0xc24   :  { %7508 = vmatmul.mubr.msk.bf16.vlgmr.msra.gmra.mrb[52].mxu1 %vm395_vm1, %v7019_v3  ;;  %1951 = vrot.lane.b32.xlu1 %v7020_v2, %s8539_s15 }
 0xc25   :  { %7512 = vmatpush3.bf16.xpose.msra.mxu1 %v2045_v14  ;;  %7513 = vmatprep.mubr.msk.bf16.mxu1 %vm8538_vm0, %v8536_v4 }
 0xc26   :  { %7517 = vmatprep.subr.bf16.mxu1 %v8536_v4 }
 0xc27   :  { %1976 = vrot.lane.b32.xlu0 %v7022_v11, %s8541_s17 }
 0xc28   :  { %1970 = vrot.lane.b32.xlu1 %v7021_v8, %s8540_s16 }
 0xc2b   :  { %1959 = vrot.lane.b32.xlu0 %v7020_v2, %s8541_s17 }
 0xc2c   :  { %1953 = vrot.lane.b32.xlu1 %v7019_v3, %s8540_s16  ;;  %7514 = vmatmul.mubr.msk.bf16.vlgmr.msra.gmra.mrb[56].mxu1 %vm395_vm1, %v7020_v2 }
 0xc2d   :  { %7519 = vmatprep.mubr.msk.bf16.mxu1 %vm8538_vm0, %v8536_v4 }
 0xc30   :  { %1974 = vrot.lane.b32.xlu1 %v7021_v8, %s8541_s17 }
 0xc34   :  { %1957 = vrot.lane.b32.xlu1 %v7019_v3, %s8541_s17 }
 0xc8d   :  { %v1950_v17 = vpop.permute.xlu0 %1949 }
 0xc8e   :  { %v1967_v15 = vpop.permute.xlu1 %1966 }
 0xc8f   :  { %v2091_v16 = vsel %vm395_vm1, %v1967_v15, 0 }
 0xc90   :  { %7518 = vmatpush3.bf16.xpose.msra.mxu1 %v2091_v16 }
 0xc91   :  { %7523 = vmatprep.subr.bf16.mxu1 %v8536_v4  ;;  %v1973_v21 = vpop.permute.xlu0 %1972 }
 0xc92   :  { %v1969_v43 = vpop.permute.xlu1 %1968  ;;  %v2229_v29 = vsel %vm395_vm1, %v1973_v21, 0 }
 0xc93   :  { %v2137_v19 = vsel %vm395_vm1, %v1969_v43, 0  ;;  %v8492_v43 = vld [vmem:[%s10376_s1 + $0x20] sm:$0xff] }
 0xc95   :  { %v1956_v26 = vpop.permute.xlu0 %1955 }
 0xc96   :  { %v1952_v45 = vpop.permute.xlu1 %1951 }
 0xc97   :  { %7520 = vmatmul.mubr.msk.bf16.vlgmr.msra.gmra.mrb[60].mxu1 %vm395_vm1, %v1950_v17 }
 0xc98   :  { %7524 = vmatpush3.bf16.xpose.msra.mxu1 %v2137_v19  ;;  %7525 = vmatprep.mubr.msk.bf16.mxu1 %vm8538_vm0, %v8536_v4 }
 0xc99   :  { %7535 = vmatprep.subr.bf16.mxu1 %v8536_v4  ;;  %v1977_v18 = vpop.permute.xlu0 %1976 }
 0xc9a   :  { %v1971_v23 = vpop.permute.xlu1 %1970  ;;  %v2321_v27 = vsel %vm395_vm1, %v1977_v18, 0 }
 0xc9b   :  { %v2183_v24 = vsel %vm395_vm1, %v1971_v23, 0 }
 0xc9c   :  { %7530 = vmatpush3.bf16.xpose.msra.mxu0 %v2183_v24 }
 0xc9d   :  { %7541 = vmatprep.subr.bf16.mxu0 %v8536_v4  ;;  %v1960_v46 = vpop.permute.xlu0 %1959 }
 0xc9e   :  { %v1954_v20 = vpop.permute.xlu1 %1953 }
 0xc9f   :  { %7526 = vmatmul.mubr.msk.bf16.vlgmr.msra.gmra.mrb[64].mxu1 %vm395_vm1, %v1952_v45 }
 0xca0   :  { %7536 = vmatpush3.bf16.xpose.msra.mxu1 %v2229_v29  ;;  %7537 = vmatprep.mubr.msk.bf16.mxu1 %vm8538_vm0, %v8536_v4 }
 0xca1   :  { %7547 = vmatprep.subr.bf16.mxu1 %v8536_v4 }
 0xca2   :  { %v1975_v31 = vpop.permute.xlu1 %1974 }
 0xca3   :  { %v2275_v33 = vsel %vm395_vm1, %v1975_v31, 0  ;;  %7532 = vmatmul.mubr.msk.bf16.vlgmr.msra.gmra.mrb[40].mxu0 %vm395_vm1, %v1954_v20  ;;  %v8493_v20 = vld [vmem:[%s10376_s1 + $0x28] sm:$0xff] }
 0xca4   :  { %7542 = vmatpush3.bf16.xpose.msra.mxu0 %v2275_v33  ;;  %7543 = vmatprep.mubr.msk.bf16.mxu0 %vm8538_vm0, %v8536_v4 }
 0xca5   :  { %7553 = vmatprep.subr.bf16.mxu0 %v8536_v4 }
 0xca6   :  { %v1958_v41 = vpop.permute.xlu1 %1957 }
 0xca7   :  { %7538 = vmatmul.mubr.msk.bf16.vlgmr.msra.gmra.mrb[68].mxu1 %vm395_vm1, %v1956_v26 }
 0xca8   :  { %7548 = vmatpush3.bf16.xpose.msra.mxu1 %v2321_v27  ;;  %7549 = vmatprep.mubr.msk.bf16.mxu1 %vm8538_vm0, %v8536_v4 }
 0xca9   :  { %7559 = vmatprep.subr.bf16.mxu1 %v8536_v4 }
 0xcab   :  { %7544 = vmatmul.mubr.msk.bf16.vlgmr.msra.gmra.mrb[44].mxu0 %vm395_vm1, %v1958_v41 }
 0xcac   :  { %7554 = vmatpush3.bf16.msra.mxu0 %v2463_v42  ;;  %7555 = vmatprep.mubr.msk.bf16.mxu0 %vm8538_vm0, %v8536_v4 }
 0xcad   :  { %7565 = vmatprep.subr.bf16.mxu0 %v8536_v4 }
 0xcaf   :  { %7550 = vmatmul.mubr.msk.bf16.vlgmr.msra.gmra.mrb[72].mxu1 %vm395_vm1, %v1960_v46 }
 0xcb0   :  { %7560 = vmatpush3.bf16.msra.mxu1 %v2509_v47  ;;  %7561 = vmatprep.mubr.msk.bf16.mxu1 %vm8538_vm0, %v8536_v4 }
 0xcb1   :  { %7571 = vmatprep.subr.bf16.mxu1 %v8536_v4 }
 0xcf7   :  { %v2035_v48 = vpop.f32.mrb[52].mxu1 }
 0xcf8   :  { %v9242_v52 = vadd.f32 %v8488_v51, %v2035_v48  ;;  %v7509_v53 = vpop.f32.mrb[53].mxu1  ;;  %v8495_v51 = vld [vmem:[%s10376_s1 + $0x38] sm:$0xff] }
 0xcf9   :  { %v2038_v54 = vpop.f32.mrb[54].mxu1 }
 0xcfa   :  { %v7510_v55 = vpop.f32.mrb[55].mxu1  ;;  %v2363_v60 = vsel %vm764_vm3, %v9242_v52, -inf }
 0xcfb   :  { %2364 = vmax.xlane.f32.xlu1 %v2363_v60 }
 0xcff   :  { %v2081_v34 = vpop.f32.mrb[56].mxu1 }
 0xd00   :  { %v2082_v63 = vadd.f32 %v8489_v62, %v2081_v34  ;;  %v7515_v35 = vpop.f32.mrb[57].mxu1 }
 0xd01   :  { %v2084_v38 = vpop.f32.mrb[58].mxu1 }
 0xd02   :  { %v7516_v0 = vpop.f32.mrb[59].mxu1  ;;  %v2366_v50 = vsel %vm764_vm3, %v2082_v63, -inf }
 0xd03   :  { %2367 = vmax.xlane.f32.xlu0 %v2366_v50 }
 0xd6a   :  { %v2127_v57 = vpop.f32.mrb[60].mxu1 }
 0xd6b   :  { %v9253_v3 = vadd.f32 %v8490_v1, %v2127_v57  ;;  %v7521_v6 = vpop.f32.mrb[61].mxu1 }
 0xd6c   :  { %v2130_v7 = vpop.f32.mrb[62].mxu1 }
 0xd6d   :  { %v7522_v8 = vpop.f32.mrb[63].mxu1  ;;  %v2369_v10 = vsel %vm764_vm3, %v9253_v3, -inf }
 0xd6e   :  { %2370 = vmax.xlane.f32.xlu0 %v2369_v10 }
 0xd72   :  { %v2173_v11 = vpop.f32.mrb[64].mxu1 }
 0xd73   :  { %v2174_v13 = vadd.f32 %v8491_v12, %v2173_v11  ;;  %v7527_v2 = vpop.f32.mrb[65].mxu1 }
 0xd74   :  { %v2176_v14 = vpop.f32.mrb[66].mxu1 }
 0xd75   :  { %v7528_v15 = vpop.f32.mrb[67].mxu1  ;;  %v2372_v16 = vsel %vm764_vm3, %v2174_v13, -inf }
 0xd76   :  { %v2219_v17 = vpop.f32.mrb[40].mxu0  ;;  %2373 = vmax.xlane.f32.xlu0 %v2372_v16 }
 0xd77   :  { %v2220_v45 = vadd.f32 %v8492_v43, %v2219_v17  ;;  %v7533_v19 = vpop.f32.mrb[41].mxu0 }
 0xd78   :  { %v2222_v21 = vpop.f32.mrb[42].mxu0 }
 0xd79   :  { %v7534_v23 = vpop.f32.mrb[43].mxu0  ;;  %v2375_v24 = vsel %vm764_vm3, %v2220_v45, -inf }
 0xd7a   :  { %2376 = vmax.xlane.f32.xlu1 %v2375_v24  ;;  %v2265_v26 = vpop.f32.mrb[68].mxu1 }
 0xd7b   :  { %v9268_v28 = vadd.f32 %v8493_v20, %v2265_v26  ;;  %v7539_v29 = vpop.f32.mrb[69].mxu1 }
 0xd7c   :  { %v2268_v31 = vpop.f32.mrb[70].mxu1 }
 0xd7d   :  { %v7540_v32 = vpop.f32.mrb[71].mxu1  ;;  %v2378_v33 = vsel %vm764_vm3, %v9268_v28, -inf }
 0xd7e   :  { %v2311_v18 = vpop.f32.mrb[44].mxu0  ;;  %2379 = vmax.xlane.f32.xlu0 %v2378_v33 }
 0xd7f   :  { %v9275_v27 = vadd.f32 %v8494_v37, %v2311_v18  ;;  %v7545_v41 = vpop.f32.mrb[45].mxu0 }
 0xd80   :  { %v2314_v42 = vpop.f32.mrb[46].mxu0 }
 0xd81   :  { %v7546_v46 = vpop.f32.mrb[47].mxu0  ;;  %v2381_v47 = vsel %vm764_vm3, %v9275_v27, -inf }
 0xd82   :  { %2382 = vmax.xlane.f32.xlu1 %v2381_v47  ;;  %v2357_v48 = vpop.f32.mrb[72].mxu1 }
 0xd83   :  { %v2358_v53 = vadd.f32 %v8495_v51, %v2357_v48  ;;  %v7551_v54 = vpop.f32.mrb[73].mxu1 }
 0xd84   :  { %v2360_v55 = vpop.f32.mrb[74].mxu1 }
 0xd85   :  { %v7552_v60 = vpop.f32.mrb[75].mxu1  ;;  %v2384_v34 = vsel %vm764_vm3, %v2358_v53, -inf }
 0xd86   :  { %2385 = vmax.xlane.f32.xlu0 %v2384_v34 }
 0xd88   :  { %v2365_v0 = vpop.xlane.xlu1 %2364 }
 0xd89   :  { %v2387_v1 = vsub.f32 %v9242_v52, %v2365_v0 }
 0xd8b   :  { %v2395_v6 = vmul.f32 1.442695, %v2387_v1 }
 0xd90   :  { %v2368_v62 = vpop.xlane.xlu0 %2367 }
 0xd91   :  { %v2388_v35 = vsub.f32 %v2082_v63, %v2368_v62 }
 0xd93   :  { %v2397_v38 = vmul.f32 1.442695, %v2388_v35  ;;  %1983 = vrot.lane.b32.xlu1 %v9217_v36, %s8539_s15 }
 0xd95   :  { %8354 = vpow2.f32 %v2397_v38 }
 0xd96   :  { %8356 = vpow2.f32 %v2395_v6 }
 0xd9f   :  { %v8355_v50 = vpop.eup %8354 }
 0xda0   :  { %v2414_v57 = vsel %vm764_vm3, %v8355_v50, 0.0  ;;  %v8357_v7 = vpop.eup %8356 }
 0xda1   :  { %2415 = vadd.xlane.f32.xlu0 %v2414_v57  ;;  %v2411_v8 = vsel %vm764_vm3, %v8357_v7, 0.0 }
 0xdb7   :  { %2412 = vadd.xlane.f32.xlu1 %v2411_v8 }
 0xdfb   :  { %v2371_v10 = vpop.xlane.xlu0 %2370 }
 0xdfc   :  { %v2389_v63 = vsub.f32 %v9253_v3, %v2371_v10 }
 0xdfe   :  { %v2399_v11 = vmul.f32 1.442695, %v2389_v63 }
 0xe00   :  { %8358 = vpow2.f32 %v2399_v11 }
 0xe03   :  { %v2374_v12 = vpop.xlane.xlu0 %2373 }
 0xe04   :  { %v2390_v2 = vsub.f32 %v2174_v13, %v2374_v12 }
 0xe06   :  { %v2401_v14 = vmul.f32 1.442695, %v2390_v2 }
 0xe07   :  { %v2377_v15 = vpop.xlane.xlu1 %2376 }
 0xe08   :  { %8360 = vpow2.f32 %v2401_v14  ;;  %v2391_v16 = vsub.f32 %v2220_v45, %v2377_v15 }
 0xe0a   :  { %v8359_v17 = vpop.eup %8358  ;;  %v2403_v52 = vmul.f32 1.442695, %v2391_v16 }
 0xe0b   :  { %v2417_v43 = vsel %vm764_vm3, %v8359_v17, 0.0  ;;  %v2380_v23 = vpop.xlane.xlu0 %2379 }
 0xe0c   :  { %8362 = vpow2.f32 %v2403_v52  ;;  %2418 = vadd.xlane.f32.xlu1 %v2417_v43  ;;  %v2392_v26 = vsub.f32 %v9268_v28, %v2380_v23 }
 0xe0e   :  { %v2405_v20 = vmul.f32 1.442695, %v2392_v26 }
 0xe0f   :  { %v2383_v31 = vpop.xlane.xlu1 %2382 }
 0xe10   :  { %v2393_v18 = vsub.f32 %v9275_v27, %v2383_v31 }
 0xe12   :  { %v9290_v19 = vpop.eup %8360  ;;  %v2407_v42 = vmul.f32 1.442695, %v2393_v18 }
 0xe13   :  { %v2420_v21 = vsel %vm764_vm3, %v9290_v19, 0.0  ;;  %v2386_v45 = vpop.xlane.xlu0 %2385  ;;  %v1984_v46 = vpop.permute.xlu1 %1983 }
 0xe14   :  { %2421 = vadd.xlane.f32.xlu0 %v2420_v21  ;;  %v2394_v29 = vsub.f32 %v2358_v53, %v2386_v45  ;;  %v2555_v62 = vsel %vm864_vm2, %v1984_v46, 0 }
 0xe16   :  { %v9294_v3 = vpop.eup %8362  ;;  %v2409_v37 = vmul.f32 1.442695, %v2394_v29 }
 0xe17   :  { %v2423_v13 = vsel %vm764_vm3, %v9294_v3, 0.0 }
 0xe18   :  { %2424 = vadd.xlane.f32.xlu1 %v2423_v13 }
 0xe29   :  { %1987 = vrot.lane.b32.xlu1 %v9217_v36, %s8540_s16 }
 0xe2a   :  { %1985 = vrot.lane.b32.xlu0 %v9225_v40, %s8539_s15 }
 0xe2d   :  { %1989 = vrot.lane.b32.xlu1 %v9225_v40, %s8540_s16 }
 0xe2e   :  { %v2416_v24 = vpop.xlane.xlu0 %2415 }
 0xe2f   :  { %8364 = vrcp.f32 %v2416_v24 }
 0xe30   :  { %8366 = vpow2.f32 %v2405_v20 }
 0xe31   :  { %8368 = vpow2.f32 %v2409_v37 }
 0xe32   :  { %8370 = vpow2.f32 %v2407_v42 }
 0xe39   :  { %v8365_v32 = vpop.eup %8364 }
 0xe3a   :  { %v2444_v33 = vmul.f32 %v8365_v32, %v8355_v50  ;;  %v8367_v47 = vpop.eup %8366 }
 0xe3b   :  { %v2426_v48 = vsel %vm764_vm3, %v8367_v47, 0.0  ;;  %v9310_v51 = vpop.eup %8368 }
 0xe3c   :  { %v2452_v41 = vpack.c.bf16 %v2444_v33, %v2444_v33  ;;  %v2432_v27 = vsel %vm764_vm3, %v9310_v51, 0.0  ;;  %v9314_v53 = vpop.eup %8370 }
 0xe3d   :  { %v2429_v55 = vsel %vm764_vm3, %v9314_v53, 0.0 }
 0xe3e   :  { %7562 = vmatmul.mubr.msk.bf16.vlgmr.msra.gmra.mrb[76].mxu1 %vm764_vm3, %v2452_v41 }
 0xe3f   :  { %7573 = vmatprep.mubr.msk.bf16.mxu1 %vm8538_vm0, %v8536_v4 }
 0xe44   :  { %v2413_v28 = vpop.xlane.xlu1 %2412 }
 0xe45   :  { %8372 = vrcp.f32 %v2413_v28 }
 0xe49   :  { %2427 = vadd.xlane.f32.xlu0 %v2426_v48 }
 0xe4d   :  { %2433 = vadd.xlane.f32.xlu0 %v2432_v27 }
 0xe4f   :  { %v8373_v54 = vpop.eup %8372 }
 0xe50   :  { %v2443_v60 = vmul.f32 %v8373_v54, %v8357_v7  ;;  %v8171_v54 = vld [vmem:[%s10378_s3 + $0x48] sm:$0xff]  }
 0xe51   :  { %2430 = vadd.xlane.f32.xlu1 %v2429_v55 }
 0xe52   :  { %v2451_v34 = vpack.c.bf16 %v2443_v60, %v2443_v60  ;;  %v8172_v60 = vld [vmem:[%s10378_s3 + $0x50] sm:$0xff]  }
 0xe54   :  { %7556 = vmatmul.mubr.msk.bf16.vlgmr.msra.gmra.mrb[48].mxu0 %vm764_vm3, %v2451_v34 }
 0xe55   :  { %7566 = vmatpush3.bf16.msra.mxu0 %v2555_v62  ;;  %7567 = vmatprep.mubr.msk.bf16.mxu0 %vm8538_vm0, %v8536_v4 }
 0xe56   :  { %7577 = vmatprep.subr.bf16.mxu0 %v8536_v4 }
 0xe62   :  { %1991 = vrot.lane.b32.xlu1 %v9217_v36, %s8541_s17 }
 0xe63   :  { %1993 = vrot.lane.b32.xlu0 %v9225_v40, %s8541_s17 }
 0xe99   :  { %v2419_v35 = vpop.xlane.xlu1 %2418 }
 0xe9a   :  { %8374 = vrcp.f32 %v2419_v35 }
 0xea1   :  { %v2422_v38 = vpop.xlane.xlu0 %2421 }
 0xea2   :  { %8376 = vrcp.f32 %v2422_v38 }
 0xea4   :  { %v8375_v0 = vpop.eup %8374 }
 0xea5   :  { %v2425_v50 = vpop.xlane.xlu1 %2424  ;;  %v1986_v57 = vpop.permute.xlu0 %1985  ;;  %v2445_v1 = vmul.f32 %v8375_v0, %v8359_v17  ;;  %v8173_v0 = vld [vmem:[%s10378_s3 + $0x58] sm:$0xff]  }
 0xea6   :  { %8378 = vrcp.f32 %v2425_v50  ;;  %v2601_v6 = vsel %vm864_vm2, %v1986_v57, 0 }
 0xea7   :  { %7572 = vmatpush3.bf16.msra.mxu1 %v2601_v6  ;;  %v2453_v7 = vpack.c.bf16 %v2445_v1, %v2445_v1 }
 0xea8   :  { %7583 = vmatprep.subr.bf16.mxu1 %v8536_v4 }
 0xea9   :  { %7568 = vmatmul.mubr.msk.bf16.vlgmr.msra.gmra.mrb[52].mxu0 %vm764_vm3, %v2453_v7  ;;  %v1988_v36 = vpop.permute.xlu1 %1987  ;;  %v8174_v7 = vld [vmem:[%s10378_s3 + $0x60] sm:$0xff]  }
 0xeaa   :  { %v2647_v40 = vsel %vm864_vm2, %v1988_v36, 0  ;;  %7579 = vmatprep.mubr.msk.bf16.mxu0 %vm8538_vm0, %v8536_v4 }
 0xeab   :  { %7578 = vmatpush3.bf16.msra.mxu0 %v2647_v40  ;;  %v8175_v40 = vld [vmem:[%s10378_s3 + $0x68] sm:$0xff]  }
 0xeac   :  { %v8377_v8 = vpop.eup %8376  ;;  %7589 = vmatprep.subr.bf16.mxu0 %v8536_v4 }
 0xead   :  { %v2446_v10 = vmul.f32 %v8377_v8, %v9290_v19  ;;  %v1990_v63 = vpop.permute.xlu1 %1989  ;;  %v8176_v8 = vld [vmem:[%s10378_s3 + $0x70] sm:$0xff]  }
 0xeae   :  { %v2693_v2 = vsel %vm864_vm2, %v1990_v63, 0  ;;  %v8177_v63 = vld [vmem:[%s10378_s3 + $0x78] sm:$0xff]  }
 0xeaf   :  { %v2454_v11 = vpack.c.bf16 %v2446_v10, %v2446_v10 }
 0xeb0   :  { %v8379_v12 = vpop.eup %8378 }
 0xeb1   :  { %7574 = vmatmul.mubr.msk.bf16.vlgmr.msra.gmra.mrb[80].mxu1 %vm764_vm3, %v2454_v11  ;;  %v2447_v14 = vmul.f32 %v8379_v12, %v9294_v3 }
 0xeb2   :  { %7584 = vmatpush3.bf16.msra.mxu1 %v2693_v2  ;;  %7585 = vmatprep.mubr.msk.bf16.mxu1 %vm8538_vm0, %v8536_v4 }
 0xeb3   :  { %v2455_v15 = vpack.c.bf16 %v2447_v14, %v2447_v14  ;;  %7595 = vmatprep.subr.bf16.mxu1 %v8536_v4 }
 0xeb5   :  { %7580 = vmatmul.mubr.msk.bf16.vlgmr.msra.gmra.mrb[56].mxu0 %vm764_vm3, %v2455_v15 }
 0xeb6   :  { %7591 = vmatprep.mubr.msk.bf16.mxu0 %vm8538_vm0, %v8536_v4 }
 0xed6   :  { %v2428_v16 = vpop.xlane.xlu0 %2427 }
 0xed7   :  { %8380 = vrcp.f32 %v2428_v16 }
 0xeda   :  { %v2434_v17 = vpop.xlane.xlu0 %2433 }
 0xedb   :  { %8382 = vrcp.f32 %v2434_v17 }
 0xede   :  { %v2431_v52 = vpop.xlane.xlu1 %2430  ;;  %v1994_v3 = vpop.permute.xlu0 %1993 }
 0xedf   :  { %8384 = vrcp.f32 %v2431_v52  ;;  %v2785_v24 = vsel %vm864_vm2, %v1994_v3, 0 }
 0xee1   :  { %v8381_v43 = vpop.eup %8380 }
 0xee2   :  { %v1992_v19 = vpop.permute.xlu1 %1991  ;;  %v2448_v21 = vmul.f32 %v8381_v43, %v8367_v47 }
 0xee3   :  { %v2739_v13 = vsel %vm864_vm2, %v1992_v19, 0 }
 0xee4   :  { %7590 = vmatpush3.bf16.msra.mxu0 %v2739_v13  ;;  %v2456_v23 = vpack.c.bf16 %v2448_v21, %v2448_v21 }
 0xee5   :  { %v8383_v45 = vpop.eup %8382  ;;  %7601 = vmatprep.subr.bf16.mxu0 %v8536_v4 }
 0xee6   :  { %7586 = vmatmul.mubr.msk.bf16.vlgmr.msra.gmra.mrb[84].mxu1 %vm764_vm3, %v2456_v23  ;;  %v2450_v26 = vmul.f32 %v8383_v45, %v9310_v51  ;;  %v8170_v51 = vld [vmem:[%s10378_s3 + $0x40] sm:$0xff]  }
 0xee7   :  { %7596 = vmatpush3.bf16.msra.mxu1 %v2785_v24  ;;  %7597 = vmatprep.mubr.msk.bf16.mxu1 %vm8538_vm0, %v8536_v4 }
 0xee8   :  { %7621 = vmatprep.subr.bf16.mxu1 %v8536_v4  ;;  %v2458_v32 = vpack.c.bf16 %v2450_v26, %v2450_v26 }
 0xee9   :  { %v8385_v20 = vpop.eup %8384 }
 0xeea   :  { %v2449_v29 = vmul.f32 %v8385_v20, %v9314_v53 }
 0xeec   :  { %v2457_v31 = vpack.c.bf16 %v2449_v29, %v2449_v29 }
 0xeee   :  { %7592 = vmatmul.mubr.msk.bf16.vlgmr.msra.gmra.mrb[60].mxu0 %vm764_vm3, %v2457_v31  ;;  %7598 = vmatmul.mubr.msk.bf16.vlgmr.msra.gmra.mrb[88].mxu1 %vm764_vm3, %v2458_v32 }
 0xeef   :  { %7617 = vmatprep.mubr.msk.bf16.mxu0 %vm8538_vm0, %v8536_v4  ;;  %7637 = vmatprep.mubr.msk.bf16.mxu1 %vm8538_vm0, %v8536_v4 }
 0xef0   :  { %7602 = vmatpush3.bf16.msra.mxu0 %v8170_v51 }
 0xef1   :  { %7603 = vmatprep.subr.bf16.mxu0 %v8536_v4 }
 0xef4   :  { %7604 = vmatpush3.bf16.msra.mxu0 %v8171_v54 }
 0xef5   :  { %7605 = vmatprep.subr.bf16.mxu0 %v8536_v4 }
 0xef8   :  { %7606 = vmatpush3.bf16.msra.mxu0 %v8172_v60 }
 0xef9   :  { %7607 = vmatprep.subr.bf16.mxu0 %v8536_v4 }
 0xefc   :  { %7608 = vmatpush3.bf16.msra.mxu0 %v8173_v0 }
 0xefd   :  { %7609 = vmatprep.subr.bf16.mxu0 %v8536_v4 }
 0xf00   :  { %7610 = vmatpush3.bf16.msra.mxu0 %v8174_v7  ;;  %v8179_v7 = vld [vmem:[%s10379_s4 + $0x48] sm:$0xff]  }
 0xf01   :  { %7611 = vmatprep.subr.bf16.mxu0 %v8536_v4 }
 0xf04   :  { %7612 = vmatpush3.bf16.msra.mxu0 %v8175_v40  ;;  %v8181_v40 = vld [vmem:[%s10379_s4 + $0x58] sm:$0xff]  }
 0xf05   :  { %7613 = vmatprep.subr.bf16.mxu0 %v8536_v4 }
 0xf08   :  { %7614 = vmatpush3.bf16.msra.mxu0 %v8176_v8  ;;  %v8182_v8 = vld [vmem:[%s10379_s4 + $0x60] sm:$0xff]  }
 0xf09   :  { %7615 = vmatprep.subr.bf16.mxu0 %v8536_v4 }
 0xf0c   :  { %7616 = vmatpush3.bf16.msra.mxu0 %v8177_v63  ;;  %v8184_v63 = vld [vmem:[%s10379_s4 + $0x70] sm:$0xff]  }
 0xf0d   :  { %7641 = vmatprep.subr.bf16.mxu0 %v8536_v4 }
 0xf11   :  { %v9359_v33 = vpop.f32.mrb[76].mxu1 }
 0xf12   :  { %v7563_v18 = vpop.f32.mrb[77].mxu1 }
 0xf13   :  { %v2548_v37 = vpop.f32.mrb[78].mxu1 }
 0xf14   :  { %v7564_v41 = vpop.f32.mrb[79].mxu1 }
 0xf27   :  { %v9361_v42 = vpop.f32.mrb[48].mxu0 }
 0xf28   :  { %v7557_v46 = vpop.f32.mrb[49].mxu0 }
 0xf29   :  { %v2502_v28 = vpop.f32.mrb[50].mxu0 }
 0xf2a   :  { %v7558_v47 = vpop.f32.mrb[51].mxu0 }
 0xf7c   :  { %v2591_v48 = vpop.f32.mrb[52].mxu0 }
 0xf7d   :  { %v7569_v27 = vpop.f32.mrb[53].mxu0 }
 0xf7e   :  { %v2594_v53 = vpop.f32.mrb[54].mxu0 }
 0xf7f   :  { %v7570_v55 = vpop.f32.mrb[55].mxu0 }
 0xf84   :  { %v2637_v34 = vpop.f32.mrb[80].mxu1 }
 0xf85   :  { %v8037_v62 = vpack.i.bf16 %v2637_v34, %v2591_v48  ;;  %v7575_v35 = vpop.f32.mrb[81].mxu1 }
 0xf86   :  { %v2640_v38 = vpop.f32.mrb[82].mxu1  ;;  %v8178_v35 = vld [vmem:[%s10379_s4 + $0x40] sm:$0xff]  }
 0xf87   :  { %8038 = vrot.lane.b32.xlu1 %v8037_v62, %s8541_s17  ;;  %v7576_v50 = vpop.f32.mrb[83].mxu1  ;;  %7622 = vmatpush3.bf16.msra.mxu1 %v8178_v35 }
 0xf88   :  { %v2683_v57 = vpop.f32.mrb[56].mxu0  ;;  %7623 = vmatprep.subr.bf16.mxu1 %v8536_v4 }
 0xf89   :  { %v7581_v1 = vpop.f32.mrb[57].mxu0 }
 0xf8a   :  { %v2686_v6 = vpop.f32.mrb[58].mxu0 }
 0xf8b   :  { %v7582_v36 = vpop.f32.mrb[59].mxu0  ;;  %7624 = vmatpush3.bf16.msra.mxu1 %v8179_v7 }
 0xf8c   :  { %7625 = vmatprep.subr.bf16.mxu1 %v8536_v4  ;;  %v8180_v36 = vld [vmem:[%s10379_s4 + $0x50] sm:$0xff]  }
 0xf8f   :  { %7626 = vmatpush3.bf16.msra.mxu1 %v8180_v36 }
 0xf90   :  { %7627 = vmatprep.subr.bf16.mxu1 %v8536_v4 }
 0xf93   :  { %7628 = vmatpush3.bf16.msra.mxu1 %v8181_v40 }
 0xf94   :  { %7629 = vmatprep.subr.bf16.mxu1 %v8536_v4 }
 0xf97   :  { %7630 = vmatpush3.bf16.msra.mxu1 %v8182_v8 }
 0xf98   :  { %7631 = vmatprep.subr.bf16.mxu1 %v8536_v4 }
 0xfb9   :  { %v2729_v10 = vpop.f32.mrb[84].mxu1 }
 0xfba   :  { %v8042_v11 = vpack.i.bf16 %v2729_v10, %v2683_v57  ;;  %v7587_v12 = vpop.f32.mrb[85].mxu1  ;;  %v8183_v10 = vld [vmem:[%s10379_s4 + $0x68] sm:$0xff]  }
 0xfbb   :  { %v2732_v2 = vpop.f32.mrb[86].mxu1  ;;  %7632 = vmatpush3.bf16.msra.mxu1 %v8183_v10  ;;  %v8186_v12 = vld [vmem:[%s10380_s5 + $0x40] sm:$0xff]  }
 0xfbc   :  { %8043 = vrot.lane.b32.xlu0 %v8042_v11, %s8540_s16  ;;  %v7588_v14 = vpop.f32.mrb[87].mxu1  ;;  %7633 = vmatprep.subr.bf16.mxu1 %v8536_v4  ;;  %v8185_v11 = vld [vmem:[%s10379_s4 + $0x78] sm:$0xff]   ;;  %v8187_v2 = vld [vmem:[%s10380_s5 + $0x48] sm:$0xff]  }
 0xfbf   :  { %7634 = vmatpush3.bf16.msra.mxu1 %v8184_v63 }
 0xfc0   :  { %7635 = vmatprep.subr.bf16.mxu1 %v8536_v4 }
 0xfc1   :  { %v2775_v15 = vpop.f32.mrb[60].mxu0  ;;  %v2821_v16 = vpop.f32.mrb[88].mxu1 }
 0xfc2   :  { %v8047_v17 = vpack.i.bf16 %v2821_v16, %v2775_v15  ;;  %v7593_v52 = vpop.f32.mrb[61].mxu0  ;;  %v7599_v43 = vpop.f32.mrb[89].mxu1 }
 0xfc3   :  { %v2778_v19 = vpop.f32.mrb[62].mxu0  ;;  %v2824_v21 = vpop.f32.mrb[90].mxu1  ;;  %7636 = vmatpush3.bf16.msra.mxu1 %v8185_v11 }
 0xfc4   :  { %v7594_v3 = vpop.f32.mrb[63].mxu0  ;;  %8048 = vrot.lane.b32.xlu1 %v8047_v17, %s8539_s15  ;;  %v7600_v13 = vpop.f32.mrb[91].mxu1 }
 0xfc5   :  { %v2995_v3 = vrot.slane %v9155_v39, %v9020_v5 }
 0xff9   :  { %v8039_v23 = vpop.permute.xlu1 %8038 }
 0xffa   :  { %v8041_v24 = vunpack.i.h.bf16 %v8039_v23  ;;  %v8040_v26 = vunpack.i.l.bf16 %v8039_v23 }
 0xffc   :  { %v2852_v32 = vsel %vm395_vm1, %v9359_v33, %v8041_v24  ;;  %v2851_v18 = vsel %vm395_vm1, %v9361_v42, %v8040_v26  ;;  %v2878_v33 = vrot.slane %v9155_v39, %v8962_v25  ;;  %v3001_v24 = vrot.slane %v9155_v39, %v9025_v9  ;;  %v8190_v39 = vld [vmem:[%s10380_s5 + $0x60] sm:$0xff]  }
0x102e   :  { %v8044_v45 = vpop.permute.xlu0 %8043 }
0x102f   :  { %v8046_v20 = vunpack.i.h.bf16 %v8044_v45  ;;  %v8045_v29 = vunpack.i.l.bf16 %v8044_v45 }
0x1031   :  { %v2854_v46 = vsel %vm1256_vm4, %v2852_v32, %v8046_v20  ;;  %v2853_v28 = vsel %vm1256_vm4, %v2851_v18, %v8045_v29  ;;  %v8188_v32 = vld [vmem:[%s10380_s5 + $0x50] sm:$0xff]   ;;  %v8189_v18 = vld [vmem:[%s10380_s5 + $0x58] sm:$0xff]  }
0x1036   :  { %v8049_v31 = vpop.permute.xlu1 %8048 }
0x1037   :  { %v8051_v37 = vunpack.i.h.bf16 %v8049_v31  ;;  %v8050_v41 = vunpack.i.l.bf16 %v8049_v31 }
0x1039   :  { %v2856_v47 = vsel %vm1259_vm5, %v2854_v46, %v8051_v37  ;;  %v2855_v48 = vsel %vm1259_vm5, %v2853_v28, %v8050_v41  ;;  %v8191_v37 = vld [vmem:[%s10380_s5 + $0x68] sm:$0xff]   ;;  %v8192_v41 = vld [vmem:[%s10380_s5 + $0x70] sm:$0xff]   ;;  %v8193_v46 = vld [vmem:[%s10380_s5 + $0x78] sm:$0xff]  }
0x103a   :  { %v2857_v51 = vpack.c.bf16 %v2856_v47, %v2855_v48  ;;  %v6558_v28 = vld [vmem:[%s10381_s6 + $0x18] sm:$0x3] }
0x103b   :  { %v3025_v47 = vrot.slane %v6558_v28, %v8692_v44 }
0x103c   :  { %7618 = vmatmul.mubr.bf16.vlgmr.msra.gmra.mrb[64].mxu0 %v2857_v51 }
0x103d   :  { %7657 = vmatprep.mubr.msk.bf16.mxu0 %vm8538_vm0, %v8536_v4  ;;  %7642 = vmatpush3.bf16.msra.mxu0 %v8186_v12 }
0x103e   :  { %7643 = vmatprep.subr.bf16.mxu0 %v8536_v4 }
0x1041   :  { %7644 = vmatpush3.bf16.msra.mxu0 %v8187_v2  ;;  %v8194_v2 = vld [vmem:[%s10377_s2 + $0x180] ss:$12 sps:$4 sm:$0xff]  }
0x1042   :  { %7645 = vmatprep.subr.bf16.mxu0 %v8536_v4 }
0x1045   :  { %7646 = vmatpush3.bf16.msra.mxu0 %v8188_v32  ;;  %v8212_v32 = vld [vmem:[%s10377_s2 + $0x1e4] ss:$12 sps:$4 sm:$0xff]  }
0x1046   :  { %7647 = vmatprep.subr.bf16.mxu0 %v8536_v4 }
0x1049   :  { %7648 = vmatpush3.bf16.msra.mxu0 %v8189_v18  ;;  %v8210_v18 = vld [vmem:[%s10377_s2 + $0x1e0] ss:$12 sps:$4 sm:$0xff]  }
0x104a   :  { %7649 = vmatprep.subr.bf16.mxu0 %v8536_v4 }
0x104d   :  { %7650 = vmatpush3.bf16.msra.mxu0 %v8190_v39  ;;  %v8213_v39 = vld [vmem:[%s10377_s2 + $0x1e8] ss:$12 sps:$4 sm:$0xff]  }
0x104e   :  { %7651 = vmatprep.subr.bf16.mxu0 %v8536_v4 }
0x1051   :  { %7652 = vmatpush3.bf16.msra.mxu0 %v8191_v37  ;;  %v8216_v37 = vld [vmem:[%s10377_s2 + $0x1fc] ss:$12 sps:$4 sm:$0xff]  }
0x1052   :  { %7653 = vmatprep.subr.bf16.mxu0 %v8536_v4 }
0x1055   :  { %7654 = vmatpush3.bf16.msra.mxu0 %v8192_v41  ;;  %v8214_v41 = vld [vmem:[%s10377_s2 + $0x1f8] ss:$12 sps:$4 sm:$0xff]  }
0x1056   :  { %7655 = vmatprep.subr.bf16.mxu0 %v8536_v4 }
0x1059   :  { %7656 = vmatpush3.bf16.msra.mxu0 %v8193_v46  ;;  %v8217_v46 = vld [vmem:[%s10377_s2 + $0x200] ss:$12 sps:$4 sm:$0xff]  }
0x105a   :  { %7661 = vmatprep.subr.bf16.mxu0 %v8536_v4 }
0x110f   :  { %v2961_v27 = vpop.f32.mrb[64].mxu0 }
0x1110   :  { %v2962_v42 = vadd.f32 %v2961_v27, %v2878_v33  ;;  %v7619_v53 = vpop.f32.mrb[65].mxu0 }
0x1111   :  { %v2964_v54 = vpop.f32.mrb[66].mxu0 }
0x1112   :  { %v9411_v55 = vadd.f32 %v2962_v42, %v9062_v56  ;;  %v2965_v60 = vadd.f32 %v2964_v54, %v2878_v33  ;;  %v7620_v34 = vpop.f32.mrb[67].mxu0 }
0x1114   :  { %v9414_v62 = vadd.f32 %v2965_v60, %v9065_v61  ;;  %2970 = vadd.xlane.f32.xlu0 %v9411_v55 }
0x1116   :  { %2972 = vadd.xlane.f32.xlu1 %v9414_v62 }
0x11a1   :  { %v2971_v38 = vpop.xlane.xlu0 %2970 }
0x11a2   :  { %v2974_v0 = vmul.f32 0.0078125, %v2971_v38 }
0x11a3   :  { %v2973_v56 = vpop.xlane.xlu1 %2972 }
0x11a4   :  { %v2975_v50 = vmul.f32 0.0078125, %v2973_v56  ;;  %v2976_v57 = vsub.f32 %v9411_v55, %v2974_v0 }
0x11a6   :  { %v2977_v61 = vsub.f32 %v9414_v62, %v2975_v50  ;;  %v2978_v1 = vmul.f32 %v2976_v57, %v2976_v57 }
0x11a8   :  { %2980 = vadd.xlane.f32.xlu0 %v2978_v1  ;;  %v2979_v6 = vmul.f32 %v2977_v61, %v2977_v61 }
0x11ac   :  { %2982 = vadd.xlane.f32.xlu0 %v2979_v6  ;;  %v3146_v6 = vrot.slane %v6558_v28, %v8703_v49  ;;  %v8218_v28 = vld [vmem:[%s10377_s2 + $0x210] ss:$12 sps:$4 sm:$0xff]  }
0x1235   :  { %v2981_v14 = vpop.xlane.xlu0 %2980 }
0x1236   :  { %v2984_v15 = vmul.f32 0.0078125, %v2981_v14  ;;  %v8196_v14 = vld [vmem:[%s10377_s2 + $0x184] ss:$12 sps:$4 sm:$0xff]  }
0x1237   :  { %3437 = vmatprep.subr.bf16.mxu1 %v8196_v14 }
0x1238   :  { %v2986_v16 = vadd.f32 1e-05, %v2984_v15  ;;  %v8201_v15 = vld [vmem:[%s10377_s2 + $0x1a0] ss:$12 sps:$4 sm:$0xff]  }
0x1239   :  { %v2983_v17 = vpop.xlane.xlu0 %2982 }
0x123a   :  { %8386 = vrsqrt.f32 %v2986_v16  ;;  %v2985_v52 = vmul.f32 0.0078125, %v2983_v17  ;;  %v8198_v16 = vld [vmem:[%s10377_s2 + $0x198] ss:$12 sps:$4 sm:$0xff]  }
0x123c   :  { %v2987_v43 = vadd.f32 1e-05, %v2985_v52 }
0x123e   :  { %8388 = vrsqrt.f32 %v2987_v43 }
0x1244   :  { %v8387_v19 = vpop.eup %8386 }
0x1245   :  { %v2990_v21 = vmul.f32 %v8387_v19, %v2976_v57 }
0x1247   :  { %v2996_v45 = vmul.f32 %v2995_v3, %v2990_v21 }
0x1248   :  { %v8389_v13 = vpop.eup %8388 }
0x1249   :  { %v2991_v23 = vmul.f32 %v8389_v13, %v2977_v61  ;;  %v3002_v20 = vadd.f32 %v3001_v24, %v2996_v45  ;;  %v8204_v45 = vld [vmem:[%s10377_s2 + $0x1b4] ss:$12 sps:$4 sm:$0xff]  }
0x124b   :  { %v2997_v26 = vmul.f32 %v2995_v3, %v2991_v23 }
0x124d   :  { %v3003_v29 = vadd.f32 %v3001_v24, %v2997_v26  ;;  %v8202_v24 = vld [vmem:[%s10377_s2 + $0x1b0] ss:$12 sps:$4 sm:$0xff]   ;;  %v8205_v26 = vld [vmem:[%s10377_s2 + $0x1b8] ss:$12 sps:$4 sm:$0xff]  }
0x124f   :  { %v3004_v31 = vpack.c.bf16 %v3003_v29, %v3002_v20  ;;  %v8208_v20 = vld [vmem:[%s10377_s2 + $0x1cc] ss:$12 sps:$4 sm:$0xff]   ;;  %v8206_v29 = vld [vmem:[%s10377_s2 + $0x1c8] ss:$12 sps:$4 sm:$0xff]  }
0x1251   :  { %7638 = vmatmul.mubr.bf16.vlgmr.msra.gmra.mrb[92].mxu1 %v3004_v31  ;;  %v8209_v31 = vld [vmem:[%s10377_s2 + $0x1d0] ss:$12 sps:$4 sm:$0xff]  }
0x1252   :  { %3469 = vmatprep.mubr.bf16.mxu1 %v8537_v30  ;;  %3438 = vmatpush1.bf16.msra.mxu1 %v8194_v2 }
0x1324   :  { %v3108_v48 = vpop.f32.mrb[92].mxu1 }
0x1325   :  { %v3109_v51 = vadd.f32 %v3108_v48, %v3025_v47  ;;  %v7639_v33 = vpop.f32.mrb[93].mxu1  ;;  %v8221_v48 = vld [vmem:[%s10377_s2 + $0x218] ss:$12 sps:$4 sm:$0xff]  }
0x1326   :  { %v3111_v27 = vpop.f32.mrb[94].mxu1  ;;  %v8222_v33 = vld [vmem:[%s10377_s2 + $0x228] ss:$12 sps:$4 sm:$0xff]  }
0x1327   :  { %v3117_v42 = vmul.f32 0.70710677, %v3109_v51  ;;  %v3112_v53 = vadd.f32 %v3111_v27, %v3025_v47  ;;  %v7640_v54 = vpop.f32.mrb[95].mxu1  ;;  %v3115_v0 = vmul.f32 0.5, %v3109_v51  ;;  %v8220_v47 = vld [vmem:[%s10377_s2 + $0x214] ss:$12 sps:$4 sm:$0xff]  }
0x1328   :  { %v8224_v51 = vld [vmem:[%s10377_s2 + $0x22c] ss:$12 sps:$4 sm:$0xff]   ;;  %v8225_v27 = vld [vmem:[%s10377_s2 + $0x230] ss:$12 sps:$4 sm:$0xff]  }
0x1329   :  { %8390 = verf.f32 %v3117_v42  ;;  %v3118_v60 = vmul.f32 0.70710677, %v3112_v53  ;;  %v3116_v56 = vmul.f32 0.5, %v3112_v53 }
0x132b   :  { %8392 = verf.f32 %v3118_v60 }
0x1333   :  { %v8391_v34 = vpop.eup %8390 }
0x1334   :  { %v3121_v35 = vadd.f32 1.0, %v8391_v34 }
0x1335   :  { %v8393_v38 = vpop.eup %8392 }
0x1336   :  { %v3122_v50 = vadd.f32 1.0, %v8393_v38  ;;  %v3123_v57 = vmul.f32 %v3121_v35, %v3115_v0  ;;  %v9589_v38 = vld [vmem:[%s10381_s6 + $0x20] sm:$0xff] }
0x1337   :  { %v3266_v0 = vrot.slane %v9589_v38, %v8692_v44 }
0x1338   :  { %v3124_v61 = vmul.f32 %v3122_v50, %v3116_v56 }
0x133a   :  { %v3125_v1 = vpack.c.bf16 %v3124_v61, %v3123_v57 }
0x133c   :  { %7658 = vmatmul.mubr.bf16.vlgmr.msra.gmra.mrb[68].mxu0 %v3125_v1 }
0x133d   :  { %7677 = vmatprep.mubr.msk.bf16.mxu0 %vm8538_vm0, %v8536_v4 }
0x140f   :  { %v3229_v7 = vpop.f32.mrb[68].mxu0 }
0x1410   :  { %v3230_v36 = vadd.f32 %v3229_v7, %v3146_v6  ;;  %v7659_v40 = vpop.f32.mrb[69].mxu0 }
0x1411   :  { %v3232_v8 = vpop.f32.mrb[70].mxu0 }
0x1412   :  { %v9496_v10 = vadd.f32 %v3230_v36, %v9411_v55  ;;  %v3233_v63 = vadd.f32 %v3232_v8, %v3146_v6  ;;  %v7660_v11 = vpop.f32.mrb[71].mxu0  ;;  %v8197_v55 = vld [vmem:[%s10377_s2 + $0x188] ss:$12 sps:$4 sm:$0xff]   ;;  %v3272_v6 = vrot.slane %v9589_v38, %v8703_v49 }
0x1413   :  { %7662 = vmatpush3.bf16.msra.mxu0 %v8197_v55  ;;  %v3531_v11 = vrot.slane %v9589_v38, %v8716_v59 }
0x1414   :  { %v9499_v12 = vadd.f32 %v3233_v63, %v9414_v62  ;;  %3241 = vadd.xlane.f32.xlu0 %v9496_v10  ;;  %v8200_v62 = vld [vmem:[%s10377_s2 + $0x19c] ss:$12 sps:$4 sm:$0xff]   ;;  %7663 = vmatprep.subr.bf16.mxu0 %v8536_v4  ;;  %v3524_v63 = vrot.slane %v9589_v38, %v8713_v58 }
0x1415   :  { %3439 = vmatprep.subr.bf16.mxu1 %v8200_v62 }
0x1416   :  { %3243 = vadd.xlane.f32.xlu1 %v9499_v12  ;;  %3440 = vmatpush1.bf16.msra.mxu1 %v8198_v16 }
0x1417   :  { %7664 = vmatpush3.bf16.msra.mxu0 %v8201_v15  ;;  %3441 = vmatprep.subr.bf16.mxu1 %v8204_v45 }
0x1418   :  { %7665 = vmatprep.subr.bf16.mxu0 %v8536_v4 }
0x141a   :  { %3442 = vmatpush1.bf16.msra.mxu1 %v8202_v24 }
0x141b   :  { %7666 = vmatpush3.bf16.msra.mxu0 %v8205_v26  ;;  %3443 = vmatprep.subr.bf16.mxu1 %v8208_v20 }
0x141c   :  { %7667 = vmatprep.subr.bf16.mxu0 %v8536_v4 }
0x141e   :  { %3444 = vmatpush1.bf16.msra.mxu1 %v8206_v29 }
0x141f   :  { %7668 = vmatpush3.bf16.msra.mxu0 %v8209_v31  ;;  %3445 = vmatprep.subr.bf16.mxu1 %v8212_v32 }
0x1420   :  { %7669 = vmatprep.subr.bf16.mxu0 %v8536_v4 }
0x1422   :  { %3446 = vmatpush1.bf16.msra.mxu1 %v8210_v18 }
0x1423   :  { %7670 = vmatpush3.bf16.msra.mxu0 %v8213_v39  ;;  %3447 = vmatprep.subr.bf16.mxu1 %v8216_v37 }
0x1424   :  { %7671 = vmatprep.subr.bf16.mxu0 %v8536_v4 }
0x1426   :  { %3448 = vmatpush1.bf16.msra.mxu1 %v8214_v41 }
0x1427   :  { %7672 = vmatpush3.bf16.msra.mxu0 %v8217_v46  ;;  %3449 = vmatprep.subr.bf16.mxu1 %v8220_v47 }
0x1428   :  { %7673 = vmatprep.subr.bf16.mxu0 %v8536_v4 }
0x142a   :  { %3450 = vmatpush1.bf16.msra.mxu1 %v8218_v28  ;;  %v3538_v28 = vrot.slane %v9589_v38, %v8749_v22 }
0x142b   :  { %7674 = vmatpush3.bf16.msra.mxu0 %v8221_v48  ;;  %3451 = vmatprep.subr.bf16.mxu1 %v8224_v51 }
0x142c   :  { %7675 = vmatprep.subr.bf16.mxu0 %v8536_v4 }
0x142e   :  { %3452 = vmatpush1.bf16.msra.mxu1 %v8222_v33 }
0x142f   :  { %7676 = vmatpush3.bf16.msra.mxu0 %v8225_v27  ;;  %7681 = vmatprep.subr.bf16.mxu1 %v8536_v4 }
0x1430   :  { %7705 = vmatprep.subr.bf16.mxu0 %v8536_v4 }
0x14a1   :  { %v3242_v17 = vpop.xlane.xlu0 %3241 }
0x14a2   :  { %v3245_v52 = vmul.f32 0.0078125, %v3242_v17 }
0x14a3   :  { %v3244_v43 = vpop.xlane.xlu1 %3243 }
0x14a4   :  { %v3247_v19 = vsub.f32 %v9496_v10, %v3245_v52  ;;  %v3246_v21 = vmul.f32 0.0078125, %v3244_v43 }
0x14a6   :  { %v3248_v3 = vsub.f32 %v9499_v12, %v3246_v21  ;;  %v3249_v13 = vmul.f32 %v3247_v19, %v3247_v19 }
0x14a8   :  { %3251 = vadd.xlane.f32.xlu0 %v3249_v13  ;;  %v3250_v23 = vmul.f32 %v3248_v3, %v3248_v3 }
0x14aa   :  { %3253 = vadd.xlane.f32.xlu1 %v3250_v23 }
0x1535   :  { %v3252_v42 = vpop.xlane.xlu0 %3251 }
0x1536   :  { %v3255_v53 = vmul.f32 0.0078125, %v3252_v42 }
0x1537   :  { %v3254_v54 = vpop.xlane.xlu1 %3253 }
0x1538   :  { %v3257_v60 = vadd.f32 1e-05, %v3255_v53  ;;  %v3256_v34 = vmul.f32 0.0078125, %v3254_v54 }
0x153a   :  { %8394 = vrsqrt.f32 %v3257_v60  ;;  %v3258_v35 = vadd.f32 1e-05, %v3256_v34 }
0x153c   :  { %8396 = vrsqrt.f32 %v3258_v35 }
0x1544   :  { %v8395_v56 = vpop.eup %8394 }
0x1545   :  { %v3261_v50 = vmul.f32 %v8395_v56, %v3247_v19 }
0x1546   :  { %v8397_v57 = vpop.eup %8396 }
0x1547   :  { %v3262_v61 = vmul.f32 %v8397_v57, %v3248_v3  ;;  %v3267_v1 = vmul.f32 %v3266_v0, %v3261_v50 }
0x1549   :  { %v3268_v7 = vmul.f32 %v3266_v0, %v3262_v61  ;;  %v3273_v36 = vadd.f32 %v3272_v6, %v3267_v1 }
0x154b   :  { %v3274_v40 = vadd.f32 %v3272_v6, %v3268_v7  ;;  %v8496_v6 = vld [vmem:[%s10376_s1] sm:$0xff] }
0x154d   :  { %v3275_v8 = vpack.c.bf16 %v3274_v40, %v3273_v36 }
0x154f   :  { %3470 = vmatmul.mubr.bf16.vlgmr.msra.gmra.mrb[96].mxu1 %v3275_v8  ;;  %7678 = vmatmul.mubr.bf16.vlgmr.msra.gmra.mrb[72].mxu0 %v3275_v8 }
0x1550   :  { %7683 = vmatprep.mubr.msk.bf16.mxu1 %vm8538_vm0, %v8536_v4  ;;  %7707 = vmatprep.mubr.msk.bf16.mxu0 %vm8538_vm0, %v8536_v4 }
0x1622   :  { %v3471_v2 = vpop.f32.mrb[96].mxu1  ;;  %v3514_v14 = vpop.f32.mrb[72].mxu0 }
0x1623   :  { %v3525_v55 = vadd.f32 %v3524_v63, %v3471_v2  ;;  %v3473_v62 = vpop.f32.mrb[97].mxu1  ;;  %v7679_v15 = vpop.f32.mrb[73].mxu0  ;;  %v3539_v33 = vadd.f32 %v3538_v28, %v3514_v14  ;;  %v8497_v2 = vld [vmem:[%s10376_s1 + $0x8] sm:$0xff] }
0x1624   :  { %v3532_v16 = vadd.f32 %v3531_v11, %v3473_v62  ;;  %v3475_v17 = vpop.f32.mrb[98].mxu1  ;;  %v9603_v52 = vpop.f32.mrb[74].mxu0 }
0x1625   :  { %v7025_v43 = vpack.c.bf16 %v3525_v55, %v3525_v55  ;;  %v3477_v19 = vpop.f32.mrb[99].mxu1  ;;  %v7680_v21 = vpop.f32.mrb[75].mxu0  ;;  %v3526_v24 = vadd.f32 %v3524_v63, %v3475_v17  ;;  %v9643_v53 = vpack.c.bf16 %v3539_v33, %v3539_v33  ;;  %v3540_v0 = vadd.f32 %v3538_v28, %v9603_v52  ;;  %v8498_v52 = vld [vmem:[%s10376_s1 + $0x10] sm:$0xff] }
0x1626   :  { %v7027_v3 = vpack.c.bf16 %v3532_v16, %v3532_v16  ;;  %v3533_v13 = vadd.f32 %v3531_v11, %v3477_v19 }
0x1627   :  { %3547 = vrot.lane.b32.xlu1 %v7025_v43, %s8539_s15  ;;  %v7026_v26 = vpack.c.bf16 %v3526_v24, %v3526_v24  ;;  %v4061_v34 = vsel %vm864_vm2, %v9643_v53, 0  ;;  %v9662_v50 = vpack.c.bf16 %v3540_v0, %v3540_v0 }
0x1628   :  { %v7028_v23 = vpack.c.bf16 %v3533_v13, %v3533_v13  ;;  %3564 = vrot.lane.b32.xlu0 %v7027_v3, %s8539_s15  ;;  %v3597_v45 = vsel %vm395_vm1, %v7027_v3, 0 }
0x1629   :  { %7682 = vmatpush3.bf16.xpose.msra.mxu1 %v3597_v45  ;;  %v4107_v61 = vsel %vm864_vm2, %v9662_v50, 0 }
0x162a   :  { %7687 = vmatprep.subr.bf16.mxu1 %v8536_v4  ;;  %v3643_v20 = vsel %vm395_vm1, %v7028_v23, 0 }
0x162b   :  { %3566 = vrot.lane.b32.xlu1 %v7028_v23, %s8539_s15 }
0x162c   :  { %3568 = vrot.lane.b32.xlu0 %v7027_v3, %s8540_s16 }
0x162f   :  { %3549 = vrot.lane.b32.xlu1 %v7026_v26, %s8539_s15 }
0x1630   :  { %3551 = vrot.lane.b32.xlu0 %v7025_v43, %s8540_s16  ;;  %7684 = vmatmul.mubr.msk.bf16.vlgmr.msra.gmra.mrb[100].mxu1 %vm395_vm1, %v7025_v43 }
0x1631   :  { %7688 = vmatpush3.bf16.xpose.msra.mxu1 %v3643_v20  ;;  %7689 = vmatprep.mubr.msk.bf16.mxu1 %vm8538_vm0, %v8536_v4 }
0x1632   :  { %7693 = vmatprep.subr.bf16.mxu1 %v8536_v4 }
0x1633   :  { %3570 = vrot.lane.b32.xlu1 %v7028_v23, %s8540_s16 }
0x1634   :  { %3572 = vrot.lane.b32.xlu0 %v7027_v3, %s8541_s17 }
0x1637   :  { %3553 = vrot.lane.b32.xlu1 %v7026_v26, %s8540_s16 }
0x1638   :  { %3555 = vrot.lane.b32.xlu0 %v7025_v43, %s8541_s17  ;;  %7690 = vmatmul.mubr.msk.bf16.vlgmr.msra.gmra.mrb[104].mxu1 %vm395_vm1, %v7026_v26 }
0x1639   :  { %7695 = vmatprep.mubr.msk.bf16.mxu1 %vm8538_vm0, %v8536_v4 }
0x163b   :  { %3574 = vrot.lane.b32.xlu1 %v7028_v23, %s8541_s17 }
0x163f   :  { %3557 = vrot.lane.b32.xlu1 %v7026_v26, %s8541_s17 }
0x1699   :  { %v3548_v29 = vpop.permute.xlu1 %3547 }
0x169a   :  { %v3565_v31 = vpop.permute.xlu0 %3564 }
0x169b   :  { %v3689_v32 = vsel %vm395_vm1, %v3565_v31, 0 }
0x169c   :  { %7694 = vmatpush3.bf16.xpose.msra.mxu1 %v3689_v32 }
0x169d   :  { %v3567_v18 = vpop.permute.xlu1 %3566  ;;  %7699 = vmatprep.subr.bf16.mxu1 %v8536_v4 }
0x169e   :  { %v3569_v39 = vpop.permute.xlu0 %3568  ;;  %v3735_v47 = vsel %vm395_vm1, %v3567_v18, 0 }
0x169f   :  { %v3781_v37 = vsel %vm395_vm1, %v3569_v39, 0  ;;  %v8500_v39 = vld [vmem:[%s10376_s1 + $0x20] sm:$0xff] }
0x16a0   :  { %7706 = vmatpush3.bf16.xpose.msra.mxu0 %v3781_v37 }
0x16a1   :  { %v3550_v41 = vpop.permute.xlu1 %3549  ;;  %7717 = vmatprep.subr.bf16.mxu0 %v8536_v4 }
0x16a2   :  { %v3552_v46 = vpop.permute.xlu0 %3551 }
0x16a3   :  { %7696 = vmatmul.mubr.msk.bf16.vlgmr.msra.gmra.mrb[108].mxu1 %vm395_vm1, %v3548_v29  ;;  %v8499_v29 = vld [vmem:[%s10376_s1 + $0x18] sm:$0xff] }
0x16a4   :  { %7700 = vmatpush3.bf16.xpose.msra.mxu1 %v3735_v47  ;;  %7701 = vmatprep.mubr.msk.bf16.mxu1 %vm8538_vm0, %v8536_v4 }
0x16a5   :  { %v3571_v48 = vpop.permute.xlu1 %3570  ;;  %7711 = vmatprep.subr.bf16.mxu1 %v8536_v4 }
0x16a6   :  { %v3573_v51 = vpop.permute.xlu0 %3572  ;;  %v3827_v54 = vsel %vm395_vm1, %v3571_v48, 0 }
0x16a7   :  { %v3873_v27 = vsel %vm395_vm1, %v3573_v51, 0  ;;  %7708 = vmatmul.mubr.msk.bf16.vlgmr.msra.gmra.mrb[76].mxu0 %vm395_vm1, %v3552_v46  ;;  %v8501_v51 = vld [vmem:[%s10376_s1 + $0x30] sm:$0xff] }
0x16a8   :  { %7718 = vmatpush3.bf16.xpose.msra.mxu0 %v3873_v27  ;;  %7719 = vmatprep.mubr.msk.bf16.mxu0 %vm8538_vm0, %v8536_v4 }
0x16a9   :  { %7729 = vmatprep.subr.bf16.mxu0 %v8536_v4  ;;  %v3554_v42 = vpop.permute.xlu1 %3553 }
0x16aa   :  { %v3556_v60 = vpop.permute.xlu0 %3555 }
0x16ab   :  { %7702 = vmatmul.mubr.msk.bf16.vlgmr.msra.gmra.mrb[112].mxu1 %vm395_vm1, %v3550_v41 }
0x16ac   :  { %7712 = vmatpush3.bf16.xpose.msra.mxu1 %v3827_v54  ;;  %7713 = vmatprep.mubr.msk.bf16.mxu1 %vm8538_vm0, %v8536_v4 }
0x16ad   :  { %7723 = vmatprep.subr.bf16.mxu1 %v8536_v4  ;;  %v3575_v35 = vpop.permute.xlu1 %3574 }
0x16ae   :  { %v3919_v56 = vsel %vm395_vm1, %v3575_v35, 0 }
0x16af   :  { %7720 = vmatmul.mubr.msk.bf16.vlgmr.msra.gmra.mrb[80].mxu0 %vm395_vm1, %v3556_v60  ;;  %v8502_v60 = vld [vmem:[%s10376_s1 + $0x28] sm:$0xff] }
0x16b0   :  { %7730 = vmatpush3.bf16.msra.mxu0 %v4061_v34  ;;  %7731 = vmatprep.mubr.msk.bf16.mxu0 %vm8538_vm0, %v8536_v4 }
0x16b1   :  { %7741 = vmatprep.subr.bf16.mxu0 %v8536_v4  ;;  %v3558_v57 = vpop.permute.xlu1 %3557 }
0x16b3   :  { %7714 = vmatmul.mubr.msk.bf16.vlgmr.msra.gmra.mrb[116].mxu1 %vm395_vm1, %v3554_v42 }
0x16b4   :  { %7724 = vmatpush3.bf16.xpose.msra.mxu1 %v3919_v56  ;;  %7725 = vmatprep.mubr.msk.bf16.mxu1 %vm8538_vm0, %v8536_v4 }
0x16b5   :  { %7735 = vmatprep.subr.bf16.mxu1 %v8536_v4 }
0x16bb   :  { %7726 = vmatmul.mubr.msk.bf16.vlgmr.msra.gmra.mrb[120].mxu1 %vm395_vm1, %v3558_v57 }
0x16bc   :  { %7736 = vmatpush3.bf16.msra.mxu1 %v4107_v61  ;;  %7737 = vmatprep.mubr.msk.bf16.mxu1 %vm8538_vm0, %v8536_v4 }
0x16bd   :  { %7747 = vmatprep.subr.bf16.mxu1 %v8536_v4 }
0x1703   :  { %v3633_v1 = vpop.f32.mrb[100].mxu1 }
0x1704   :  { %v9673_v7 = vadd.f32 %v8496_v6, %v3633_v1  ;;  %v7685_v36 = vpop.f32.mrb[101].mxu1  ;;  %v8503_v6 = vld [vmem:[%s10376_s1 + $0x38] sm:$0xff] }
0x1705   :  { %v3636_v40 = vpop.f32.mrb[102].mxu1 }
0x1706   :  { %v7686_v8 = vpop.f32.mrb[103].mxu1  ;;  %v3961_v63 = vsel %vm764_vm3, %v9673_v7, -inf }
0x1707   :  { %3962 = vmax.xlane.f32.xlu0 %v3961_v63 }
0x170b   :  { %v3679_v11 = vpop.f32.mrb[104].mxu1 }
0x170c   :  { %v3680_v14 = vadd.f32 %v8497_v2, %v3679_v11  ;;  %v7691_v55 = vpop.f32.mrb[105].mxu1 }
0x170d   :  { %v3682_v62 = vpop.f32.mrb[106].mxu1 }
0x170e   :  { %v7692_v15 = vpop.f32.mrb[107].mxu1  ;;  %v3964_v16 = vsel %vm764_vm3, %v3680_v14, -inf }
0x170f   :  { %3965 = vmax.xlane.f32.xlu1 %v3964_v16 }
0x1776   :  { %v3725_v17 = vpop.f32.mrb[108].mxu1 }
0x1777   :  { %v9684_v43 = vadd.f32 %v8498_v52, %v3725_v17  ;;  %v7697_v19 = vpop.f32.mrb[109].mxu1 }
0x1778   :  { %v3728_v21 = vpop.f32.mrb[110].mxu1 }
0x1779   :  { %v7698_v3 = vpop.f32.mrb[111].mxu1  ;;  %v3967_v13 = vsel %vm764_vm3, %v9684_v43, -inf }
0x177a   :  { %v3817_v23 = vpop.f32.mrb[76].mxu0  ;;  %3968 = vmax.xlane.f32.xlu0 %v3967_v13 }
0x177b   :  { %v7709_v45 = vpop.f32.mrb[77].mxu0  ;;  %v9694_v37 = vadd.f32 %v8500_v39, %v3817_v23 }
0x177c   :  { %v3820_v24 = vpop.f32.mrb[78].mxu0 }
0x177d   :  { %v7710_v26 = vpop.f32.mrb[79].mxu0  ;;  %v3973_v42 = vsel %vm764_vm3, %v9694_v37, -inf }
0x177e   :  { %v3771_v20 = vpop.f32.mrb[112].mxu1 }
0x177f   :  { %v3772_v31 = vadd.f32 %v8499_v29, %v3771_v20  ;;  %v7703_v32 = vpop.f32.mrb[113].mxu1 }
0x1780   :  { %v3774_v18 = vpop.f32.mrb[114].mxu1 }
0x1781   :  { %v7704_v41 = vpop.f32.mrb[115].mxu1  ;;  %v3970_v46 = vsel %vm764_vm3, %v3772_v31, -inf }
0x1782   :  { %v3909_v28 = vpop.f32.mrb[80].mxu0  ;;  %3971 = vmax.xlane.f32.xlu0 %v3970_v46 }
0x1783   :  { %v7721_v47 = vpop.f32.mrb[81].mxu0  ;;  %v9700_v33 = vadd.f32 %v8501_v51, %v3909_v28 }
0x1784   :  { %v3912_v48 = vpop.f32.mrb[82].mxu0 }
0x1785   :  { %v7722_v27 = vpop.f32.mrb[83].mxu0  ;;  %v3979_v57 = vsel %vm764_vm3, %v9700_v33, -inf }
0x1786   :  { %3974 = vmax.xlane.f32.xlu0 %v3973_v42  ;;  %v3863_v54 = vpop.f32.mrb[116].mxu1 }
0x1787   :  { %v3864_v34 = vadd.f32 %v8502_v60, %v3863_v54  ;;  %v7715_v35 = vpop.f32.mrb[117].mxu1 }
0x1788   :  { %v3866_v0 = vpop.f32.mrb[118].mxu1 }
0x1789   :  { %v7716_v56 = vpop.f32.mrb[119].mxu1  ;;  %v3976_v61 = vsel %vm764_vm3, %v3864_v34, -inf }
0x178a   :  { %3980 = vmax.xlane.f32.xlu0 %v3979_v57  ;;  %3977 = vmax.xlane.f32.xlu1 %v3976_v61 }
0x178e   :  { %v3955_v1 = vpop.f32.mrb[120].mxu1 }
0x178f   :  { %v3956_v36 = vadd.f32 %v8503_v6, %v3955_v1  ;;  %v7727_v40 = vpop.f32.mrb[121].mxu1 }
0x1790   :  { %v3958_v8 = vpop.f32.mrb[122].mxu1 }
0x1791   :  { %v7728_v63 = vpop.f32.mrb[123].mxu1  ;;  %v3982_v11 = vsel %vm764_vm3, %v3956_v36, -inf }
0x1792   :  { %3983 = vmax.xlane.f32.xlu1 %v3982_v11 }
0x1794   :  { %v3963_v2 = vpop.xlane.xlu0 %3962 }
0x1795   :  { %v3985_v55 = vsub.f32 %v9673_v7, %v3963_v2 }
0x1797   :  { %v3993_v62 = vmul.f32 1.442695, %v3985_v55 }
0x1799   :  { %8398 = vpow2.f32 %v3993_v62 }
0x179c   :  { %v3966_v15 = vpop.xlane.xlu1 %3965 }
0x179d   :  { %v3986_v16 = vsub.f32 %v3680_v14, %v3966_v15 }
0x179f   :  { %v3995_v17 = vmul.f32 1.442695, %v3986_v16 }
0x17a1   :  { %8400 = vpow2.f32 %v3995_v17 }
0x17a3   :  { %v8399_v52 = vpop.eup %8398 }
0x17a4   :  { %v4009_v19 = vsel %vm764_vm3, %v8399_v52, 0.0 }
0x17a5   :  { %4010 = vadd.xlane.f32.xlu0 %v4009_v19 }
0x17ab   :  { %v8401_v21 = vpop.eup %8400 }
0x17ac   :  { %v4012_v3 = vsel %vm764_vm3, %v8401_v21, 0.0 }
0x17ad   :  { %4013 = vadd.xlane.f32.xlu1 %v4012_v3 }
0x17be   :  { %3583 = vrot.lane.b32.xlu1 %v9662_v50, %s8539_s15 }
0x17c2   :  { %3585 = vrot.lane.b32.xlu1 %v9643_v53, %s8540_s16 }
0x17c6   :  { %3587 = vrot.lane.b32.xlu1 %v9662_v50, %s8540_s16 }
0x1807   :  { %v3969_v7 = vpop.xlane.xlu0 %3968 }
0x1808   :  { %v3987_v14 = vsub.f32 %v9684_v43, %v3969_v7 }
0x180a   :  { %v3997_v13 = vmul.f32 1.442695, %v3987_v14 }
0x180c   :  { %8402 = vpow2.f32 %v3997_v13 }
0x180f   :  { %v3972_v23 = vpop.xlane.xlu0 %3971 }
0x1810   :  { %v3988_v45 = vsub.f32 %v3772_v31, %v3972_v23 }
0x1812   :  { %v3999_v24 = vmul.f32 1.442695, %v3988_v45 }
0x1813   :  { %v3975_v47 = vpop.xlane.xlu0 %3974 }
0x1814   :  { %8404 = vpow2.f32 %v3999_v24  ;;  %v3989_v60 = vsub.f32 %v9694_v37, %v3975_v47 }
0x1816   :  { %v9724_v26 = vpop.eup %8402  ;;  %v4001_v35 = vmul.f32 1.442695, %v3989_v60 }
0x1817   :  { %v3978_v20 = vpop.xlane.xlu1 %3977  ;;  %v4015_v29 = vsel %vm764_vm3, %v9724_v26, 0.0  ;;  %v3981_v27 = vpop.xlane.xlu0 %3980 }
0x1818   :  { %v3990_v32 = vsub.f32 %v3864_v34, %v3978_v20  ;;  %4016 = vadd.xlane.f32.xlu0 %v4015_v29  ;;  %v3991_v0 = vsub.f32 %v9700_v33, %v3981_v27 }
0x181a   :  { %v4003_v18 = vmul.f32 1.442695, %v3990_v32  ;;  %v4005_v61 = vmul.f32 1.442695, %v3991_v0 }
0x181c   :  { %8406 = vpow2.f32 %v4003_v18 }
0x181e   :  { %v9728_v39 = vpop.eup %8404 }
0x181f   :  { %v3984_v41 = vpop.xlane.xlu1 %3983  ;;  %v4018_v43 = vsel %vm764_vm3, %v9728_v39, 0.0 }
0x1820   :  { %v3992_v46 = vsub.f32 %v3956_v36, %v3984_v41  ;;  %4019 = vadd.xlane.f32.xlu1 %v4018_v43 }
0x1822   :  { %v4007_v31 = vmul.f32 1.442695, %v3992_v46 }
0x1824   :  { %8408 = vpow2.f32 %v4007_v31 }
0x1826   :  { %v9732_v28 = vpop.eup %8406 }
0x1827   :  { %v4024_v48 = vsel %vm764_vm3, %v9732_v28, 0.0 }
0x1828   :  { %4025 = vadd.xlane.f32.xlu1 %v4024_v48 }
0x182e   :  { %v9736_v51 = vpop.eup %8408  ;;  %3581 = vrot.lane.b32.xlu0 %v9643_v53, %s8539_s15 }
0x182f   :  { %v4030_v42 = vsel %vm764_vm3, %v9736_v51, 0.0 }
0x1830   :  { %4031 = vadd.xlane.f32.xlu1 %v4030_v42 }
0x1832   :  { %v4011_v54 = vpop.xlane.xlu0 %4010 }
0x1833   :  { %8410 = vrcp.f32 %v4011_v54 }
0x183a   :  { %v4014_v34 = vpop.xlane.xlu1 %4013 }
0x183b   :  { %8412 = vrcp.f32 %v4014_v34 }
0x183c   :  { %8414 = vpow2.f32 %v4001_v35 }
0x183d   :  { %v8411_v56 = vpop.eup %8410  ;;  %8416 = vpow2.f32 %v4005_v61 }
0x183e   :  { %v4041_v57 = vmul.f32 %v8411_v56, %v8399_v52  ;;  %v3584_v36 = vpop.permute.xlu1 %3583 }
0x183f   :  { %v4199_v8 = vsel %vm864_vm2, %v3584_v36, 0 }
0x1840   :  { %v4049_v1 = vpack.c.bf16 %v4041_v57, %v4041_v57 }
0x1841   :  { %3591 = vrot.lane.b32.xlu1 %v9662_v50, %s8541_s17 }
0x1842   :  { %7732 = vmatmul.mubr.msk.bf16.vlgmr.msra.gmra.mrb[84].mxu0 %vm764_vm3, %v4049_v1  ;;  %v3586_v2 = vpop.permute.xlu1 %3585 }
0x1843   :  { %7743 = vmatprep.mubr.msk.bf16.mxu0 %vm8538_vm0, %v8536_v4  ;;  %v4245_v3 = vsel %vm864_vm2, %v3586_v2, 0 }
0x1845   :  { %v8413_v37 = vpop.eup %8412 }
0x1846   :  { %v4042_v6 = vmul.f32 %v8413_v37, %v8401_v21  ;;  %v8415_v33 = vpop.eup %8414  ;;  %v3588_v62 = vpop.permute.xlu1 %3587 }
0x1847   :  { %v4021_v50 = vsel %vm764_vm3, %v8415_v33, 0.0  ;;  %v8417_v63 = vpop.eup %8416  ;;  %v4291_v23 = vsel %vm864_vm2, %v3588_v62, 0  ;;  %v8229_v62 = vld [vmem:[%s10378_s3 + $0x98] sm:$0xff]  }
0x1848   :  { %v4050_v40 = vpack.c.bf16 %v4042_v6, %v4042_v6  ;;  %v4027_v11 = vsel %vm764_vm3, %v8417_v63, 0.0  ;;  %v8226_v6 = vld [vmem:[%s10378_s3 + $0x80] sm:$0xff]  }
0x184a   :  { %7738 = vmatmul.mubr.msk.bf16.vlgmr.msra.gmra.mrb[124].mxu1 %vm764_vm3, %v4050_v40 }
0x184b   :  { %7748 = vmatpush3.bf16.msra.mxu1 %v4199_v8  ;;  %7749 = vmatprep.mubr.msk.bf16.mxu1 %vm8538_vm0, %v8536_v4 }
0x184c   :  { %7759 = vmatprep.subr.bf16.mxu1 %v8536_v4 }
0x184d   :  { %4022 = vadd.xlane.f32.xlu0 %v4021_v50  ;;  %v8228_v50 = vld [vmem:[%s10378_s3 + $0x90] sm:$0xff]  }
0x1851   :  { %4028 = vadd.xlane.f32.xlu0 %v4027_v11 }
0x1867   :  { %3589 = vrot.lane.b32.xlu0 %v9643_v53, %s8541_s17 }
0x18a5   :  { %v4017_v55 = vpop.xlane.xlu0 %4016 }
0x18a6   :  { %8418 = vrcp.f32 %v4017_v55 }
0x18a9   :  { %v3582_v15 = vpop.permute.xlu0 %3581 }
0x18aa   :  { %v4153_v16 = vsel %vm864_vm2, %v3582_v15, 0 }
0x18ab   :  { %7742 = vmatpush3.bf16.msra.mxu0 %v4153_v16  ;;  %v8230_v16 = vld [vmem:[%s10378_s3 + $0xa0] sm:$0xff]  }
0x18ac   :  { %7753 = vmatprep.subr.bf16.mxu0 %v8536_v4 }
0x18ad   :  { %v4020_v17 = vpop.xlane.xlu1 %4019 }
0x18ae   :  { %8420 = vrcp.f32 %v4020_v17 }
0x18b0   :  { %v8419_v52 = vpop.eup %8418 }
0x18b1   :  { %v4043_v19 = vmul.f32 %v8419_v52, %v9724_v26 }
0x18b3   :  { %v4051_v21 = vpack.c.bf16 %v4043_v19, %v4043_v19 }
0x18b5   :  { %7744 = vmatmul.mubr.msk.bf16.vlgmr.msra.gmra.mrb[88].mxu0 %vm764_vm3, %v4051_v21  ;;  %v4026_v53 = vpop.xlane.xlu1 %4025 }
0x18b6   :  { %7754 = vmatpush3.bf16.msra.mxu0 %v4245_v3  ;;  %7755 = vmatprep.mubr.msk.bf16.mxu0 %vm8538_vm0, %v8536_v4  ;;  %8422 = vrcp.f32 %v4026_v53 }
0x18b7   :  { %7765 = vmatprep.subr.bf16.mxu0 %v8536_v4 }
0x18b8   :  { %v8421_v7 = vpop.eup %8420 }
0x18b9   :  { %v4044_v14 = vmul.f32 %v8421_v7, %v9728_v39 }
0x18bb   :  { %v4052_v13 = vpack.c.bf16 %v4044_v14, %v4044_v14 }
0x18bd   :  { %7750 = vmatmul.mubr.msk.bf16.vlgmr.msra.gmra.mrb[128].mxu1 %vm764_vm3, %v4052_v13  ;;  %v4032_v45 = vpop.xlane.xlu1 %4031  ;;  %v8231_v13 = vld [vmem:[%s10378_s3 + $0xa8] sm:$0xff]  }
0x18be   :  { %7760 = vmatpush3.bf16.msra.mxu1 %v4291_v23  ;;  %8424 = vrcp.f32 %v4032_v45  ;;  %7761 = vmatprep.mubr.msk.bf16.mxu1 %vm8538_vm0, %v8536_v4  ;;  %v8232_v23 = vld [vmem:[%s10378_s3 + $0xb0] sm:$0xff]  }
0x18bf   :  { %7771 = vmatprep.subr.bf16.mxu1 %v8536_v4 }
0x18c0   :  { %v8423_v24 = vpop.eup %8422 }
0x18c1   :  { %v4046_v26 = vmul.f32 %v8423_v24, %v9732_v28  ;;  %v3592_v20 = vpop.permute.xlu1 %3591  ;;  %v8233_v24 = vld [vmem:[%s10378_s3 + $0xb8] sm:$0xff]  }
0x18c2   :  { %v4383_v32 = vsel %vm864_vm2, %v3592_v20, 0 }
0x18c3   :  { %v4054_v29 = vpack.c.bf16 %v4046_v26, %v4046_v26 }
0x18c5   :  { %7762 = vmatmul.mubr.msk.bf16.vlgmr.msra.gmra.mrb[132].mxu1 %vm764_vm3, %v4054_v29 }
0x18c6   :  { %7772 = vmatpush3.bf16.msra.mxu1 %v4383_v32  ;;  %7773 = vmatprep.mubr.msk.bf16.mxu1 %vm8538_vm0, %v8536_v4 }
0x18c7   :  { %7797 = vmatprep.subr.bf16.mxu1 %v8536_v4 }
0x18c8   :  { %v8425_v18 = vpop.eup %8424 }
0x18c9   :  { %v4048_v39 = vmul.f32 %v8425_v18, %v9736_v51 }
0x18cb   :  { %v4056_v41 = vpack.c.bf16 %v4048_v39, %v4048_v39 }
0x18cd   :  { %7774 = vmatmul.mubr.msk.bf16.vlgmr.msra.gmra.mrb[136].mxu1 %vm764_vm3, %v4056_v41 }
0x18ce   :  { %7813 = vmatprep.mubr.msk.bf16.mxu1 %vm8538_vm0, %v8536_v4 }
0x18da   :  { %v4023_v43 = vpop.xlane.xlu0 %4022 }
0x18db   :  { %8426 = vrcp.f32 %v4023_v43 }
0x18de   :  { %v4029_v46 = vpop.xlane.xlu0 %4028 }
0x18df   :  { %8428 = vrcp.f32 %v4029_v46 }
0x18e2   :  { %v3590_v47 = vpop.permute.xlu0 %3589 }
0x18e3   :  { %v4337_v42 = vsel %vm864_vm2, %v3590_v47, 0 }
0x18e5   :  { %v8427_v31 = vpop.eup %8426 }
0x18e6   :  { %v4045_v28 = vmul.f32 %v8427_v31, %v8415_v33  ;;  %v8227_v33 = vld [vmem:[%s10378_s3 + $0x88] sm:$0xff]  }
0x18e8   :  { %v4053_v48 = vpack.c.bf16 %v4045_v28, %v4045_v28 }
0x18e9   :  { %v8429_v27 = vpop.eup %8428 }
0x18ea   :  { %7756 = vmatmul.mubr.msk.bf16.vlgmr.msra.gmra.mrb[92].mxu0 %vm764_vm3, %v4053_v48  ;;  %v4047_v51 = vmul.f32 %v8429_v27, %v8417_v63 }
0x18eb   :  { %7766 = vmatpush3.bf16.msra.mxu0 %v4337_v42  ;;  %7767 = vmatprep.mubr.msk.bf16.mxu0 %vm8538_vm0, %v8536_v4 }
0x18ec   :  { %7777 = vmatprep.subr.bf16.mxu0 %v8536_v4  ;;  %v4055_v54 = vpack.c.bf16 %v4047_v51, %v4047_v51 }
0x18f2   :  { %7768 = vmatmul.mubr.msk.bf16.vlgmr.msra.gmra.mrb[96].mxu0 %vm764_vm3, %v4055_v54 }
0x18f3   :  { %7793 = vmatprep.mubr.msk.bf16.mxu0 %vm8538_vm0, %v8536_v4  ;;  %7778 = vmatpush3.bf16.msra.mxu0 %v8226_v6 }
0x18f4   :  { %7779 = vmatprep.subr.bf16.mxu0 %v8536_v4 }
0x18f7   :  { %7780 = vmatpush3.bf16.msra.mxu0 %v8227_v33 }
0x18f8   :  { %7781 = vmatprep.subr.bf16.mxu0 %v8536_v4 }
0x18fb   :  { %7782 = vmatpush3.bf16.msra.mxu0 %v8228_v50 }
0x18fc   :  { %7783 = vmatprep.subr.bf16.mxu0 %v8536_v4 }
0x18ff   :  { %7784 = vmatpush3.bf16.msra.mxu0 %v8229_v62 }
0x1900   :  { %7785 = vmatprep.subr.bf16.mxu0 %v8536_v4 }
0x1903   :  { %7786 = vmatpush3.bf16.msra.mxu0 %v8230_v16 }
0x1904   :  { %7787 = vmatprep.subr.bf16.mxu0 %v8536_v4 }
0x1907   :  { %7788 = vmatpush3.bf16.msra.mxu0 %v8231_v13  ;;  %v8241_v13 = vld [vmem:[%s10379_s4 + $0xb8] sm:$0xff]  }
0x1908   :  { %7789 = vmatprep.subr.bf16.mxu0 %v8536_v4 }
0x190b   :  { %7790 = vmatpush3.bf16.msra.mxu0 %v8232_v23  ;;  %v8242_v23 = vld [vmem:[%s10380_s5 + $0x80] sm:$0xff]  }
0x190c   :  { %7791 = vmatprep.subr.bf16.mxu0 %v8536_v4 }
0x190f   :  { %7792 = vmatpush3.bf16.msra.mxu0 %v8233_v24 }
0x1910   :  { %7817 = vmatprep.subr.bf16.mxu0 %v8536_v4 }
0x1915   :  { %v9790_v60 = vpop.f32.mrb[84].mxu0 }
0x1916   :  { %v7733_v34 = vpop.f32.mrb[85].mxu0 }
0x1917   :  { %v4100_v35 = vpop.f32.mrb[86].mxu0 }
0x1918   :  { %v7734_v0 = vpop.f32.mrb[87].mxu0 }
0x191d   :  { %v9792_v56 = vpop.f32.mrb[124].mxu1 }
0x191e   :  { %v7739_v57 = vpop.f32.mrb[125].mxu1 }
0x191f   :  { %v4146_v61 = vpop.f32.mrb[126].mxu1 }
0x1920   :  { %v7740_v1 = vpop.f32.mrb[127].mxu1 }
0x1988   :  { %v4189_v37 = vpop.f32.mrb[88].mxu0 }
0x1989   :  { %v7745_v36 = vpop.f32.mrb[89].mxu0 }
0x198a   :  { %v4192_v40 = vpop.f32.mrb[90].mxu0 }
0x198b   :  { %v7746_v8 = vpop.f32.mrb[91].mxu0 }
0x1990   :  { %v4235_v63 = vpop.f32.mrb[128].mxu1 }
0x1991   :  { %v8052_v11 = vpack.i.bf16 %v4235_v63, %v4189_v37  ;;  %v7751_v2 = vpop.f32.mrb[129].mxu1 }
0x1992   :  { %v4238_v55 = vpop.f32.mrb[130].mxu1  ;;  %v8234_v2 = vld [vmem:[%s10379_s4 + $0x80] sm:$0xff]  }
0x1993   :  { %8053 = vrot.lane.b32.xlu0 %v8052_v11, %s8541_s17  ;;  %v7752_v15 = vpop.f32.mrb[131].mxu1  ;;  %7798 = vmatpush3.bf16.msra.mxu1 %v8234_v2 }
0x1994   :  { %7799 = vmatprep.subr.bf16.mxu1 %v8536_v4 }
0x1998   :  { %v4327_v17 = vpop.f32.mrb[132].mxu1 }
0x1999   :  { %v7763_v52 = vpop.f32.mrb[133].mxu1 }
0x199a   :  { %v4330_v19 = vpop.f32.mrb[134].mxu1 }
0x199b   :  { %v7764_v21 = vpop.f32.mrb[135].mxu1  ;;  %v8235_v19 = vld [vmem:[%s10379_s4 + $0x88] sm:$0xff]  }
0x199c   :  { %7800 = vmatpush3.bf16.msra.mxu1 %v8235_v19  ;;  %v8236_v21 = vld [vmem:[%s10379_s4 + $0x90] sm:$0xff]  }
0x199d   :  { %7801 = vmatprep.subr.bf16.mxu1 %v8536_v4 }
0x19a0   :  { %v4419_v3 = vpop.f32.mrb[136].mxu1  ;;  %7802 = vmatpush3.bf16.msra.mxu1 %v8236_v21 }
0x19a1   :  { %v7775_v53 = vpop.f32.mrb[137].mxu1  ;;  %7803 = vmatprep.subr.bf16.mxu1 %v8536_v4 }
0x19a2   :  { %v4422_v7 = vpop.f32.mrb[138].mxu1  ;;  %v8238_v53 = vld [vmem:[%s10379_s4 + $0xa0] sm:$0xff]  }
0x19a3   :  { %v7776_v14 = vpop.f32.mrb[139].mxu1  ;;  %v8239_v7 = vld [vmem:[%s10379_s4 + $0xa8] sm:$0xff]  }
0x19a4   :  { %v8240_v14 = vld [vmem:[%s10379_s4 + $0xb0] sm:$0xff]  }
0x19bd   :  { %v4281_v45 = vpop.f32.mrb[92].mxu0 }
0x19be   :  { %v8057_v26 = vpack.i.bf16 %v4327_v17, %v4281_v45  ;;  %v7757_v20 = vpop.f32.mrb[93].mxu0  ;;  %v8243_v45 = vld [vmem:[%s10380_s5 + $0x88] sm:$0xff]  }
0x19bf   :  { %v4284_v29 = vpop.f32.mrb[94].mxu0 }
0x19c0   :  { %v7758_v32 = vpop.f32.mrb[95].mxu0  ;;  %8058 = vrot.lane.b32.xlu1 %v8057_v26, %s8540_s16 }
0x19c5   :  { %v4373_v18 = vpop.f32.mrb[96].mxu0 }
0x19c6   :  { %v8062_v39 = vpack.i.bf16 %v4419_v3, %v4373_v18  ;;  %v7769_v41 = vpop.f32.mrb[97].mxu0  ;;  %v8237_v3 = vld [vmem:[%s10379_s4 + $0x98] sm:$0xff]  }
0x19c7   :  { %v4376_v43 = vpop.f32.mrb[98].mxu0  ;;  %7804 = vmatpush3.bf16.msra.mxu1 %v8237_v3 }
0x19c8   :  { %v7770_v46 = vpop.f32.mrb[99].mxu0  ;;  %8063 = vrot.lane.b32.xlu0 %v8062_v39, %s8539_s15  ;;  %7805 = vmatprep.subr.bf16.mxu1 %v8536_v4  ;;  %v4593_v43 = vrot.slane %v9589_v38, %v9020_v5 }
0x19cb   :  { %7806 = vmatpush3.bf16.msra.mxu1 %v8238_v53 }
0x19cc   :  { %7807 = vmatprep.subr.bf16.mxu1 %v8536_v4 }
0x19cf   :  { %7808 = vmatpush3.bf16.msra.mxu1 %v8239_v7 }
0x19d0   :  { %7809 = vmatprep.subr.bf16.mxu1 %v8536_v4 }
0x19d3   :  { %7810 = vmatpush3.bf16.msra.mxu1 %v8240_v14 }
0x19d4   :  { %7811 = vmatprep.subr.bf16.mxu1 %v8536_v4 }
0x19d7   :  { %7812 = vmatpush3.bf16.msra.mxu1 %v8241_v13 }
0x1a05   :  { %v8054_v31 = vpop.permute.xlu0 %8053 }
0x1a06   :  { %v8056_v47 = vunpack.i.h.bf16 %v8054_v31  ;;  %v8055_v48 = vunpack.i.l.bf16 %v8054_v31 }
0x1a08   :  { %v4450_v54 = vsel %vm395_vm1, %v9792_v56, %v8056_v47  ;;  %v4449_v34 = vsel %vm395_vm1, %v9790_v60, %v8055_v48  ;;  %v4476_v56 = vrot.slane %v9589_v38, %v8962_v25  ;;  %v4599_v47 = vrot.slane %v9589_v38, %v9025_v9  ;;  %v8246_v38 = vld [vmem:[%s10380_s5 + $0xa0] sm:$0xff]  }
0x1a32   :  { %v8059_v28 = vpop.permute.xlu1 %8058 }
0x1a33   :  { %v8061_v27 = vunpack.i.h.bf16 %v8059_v28  ;;  %v8060_v42 = vunpack.i.l.bf16 %v8059_v28 }
0x1a35   :  { %v4452_v57 = vsel %vm1256_vm4, %v4450_v54, %v8061_v27  ;;  %v4451_v61 = vsel %vm1256_vm4, %v4449_v34, %v8060_v42  ;;  %v8244_v54 = vld [vmem:[%s10380_s5 + $0x90] sm:$0xff]   ;;  %v8245_v34 = vld [vmem:[%s10380_s5 + $0x98] sm:$0xff]  }
0x1a3a   :  { %v8064_v51 = vpop.permute.xlu0 %8063 }
0x1a3b   :  { %v8066_v35 = vunpack.i.h.bf16 %v8064_v51  ;;  %v8065_v0 = vunpack.i.l.bf16 %v8064_v51 }
0x1a3d   :  { %v4454_v1 = vsel %vm1259_vm5, %v4452_v57, %v8066_v35  ;;  %v4453_v37 = vsel %vm1259_vm5, %v4451_v61, %v8065_v0  ;;  %v8248_v35 = vld [vmem:[%s10380_s5 + $0xb0] sm:$0xff]   ;;  %v8249_v0 = vld [vmem:[%s10380_s5 + $0xb8] sm:$0xff]   ;;  %v6710_v57 = vld [vmem:[%s10381_s6 + $0x28] sm:$0x3] }
0x1a3e   :  { %v4455_v6 = vpack.c.bf16 %v4454_v1, %v4453_v37  ;;  %v4623_v61 = vrot.slane %v6710_v57, %v8692_v44 }
0x1a40   :  { %7794 = vmatmul.mubr.bf16.vlgmr.msra.gmra.mrb[100].mxu0 %v4455_v6 }
0x1a41   :  { %7833 = vmatprep.mubr.msk.bf16.mxu0 %vm8538_vm0, %v8536_v4  ;;  %7818 = vmatpush3.bf16.msra.mxu0 %v8242_v23  ;;  %v8250_v23 = vld [vmem:[%s10377_s2 + $0x240] ss:$12 sps:$4 sm:$0xff]  }
0x1a42   :  { %7819 = vmatprep.subr.bf16.mxu0 %v8536_v4 }
0x1a45   :  { %7820 = vmatpush3.bf16.msra.mxu0 %v8243_v45  ;;  %v8252_v45 = vld [vmem:[%s10377_s2 + $0x244] ss:$12 sps:$4 sm:$0xff]  }
0x1a46   :  { %7821 = vmatprep.subr.bf16.mxu0 %v8536_v4  ;;  %5035 = vmatprep.subr.bf16.mxu1 %v8252_v45 }
0x1a49   :  { %7822 = vmatpush3.bf16.msra.mxu0 %v8244_v54  ;;  %v8266_v54 = vld [vmem:[%s10377_s2 + $0x2a0] ss:$12 sps:$4 sm:$0xff]  }
0x1a4a   :  { %7823 = vmatprep.subr.bf16.mxu0 %v8536_v4 }
0x1a4d   :  { %7824 = vmatpush3.bf16.msra.mxu0 %v8245_v34  ;;  %v8269_v34 = vld [vmem:[%s10377_s2 + $0x2a8] ss:$12 sps:$4 sm:$0xff]  }
0x1a4e   :  { %7825 = vmatprep.subr.bf16.mxu0 %v8536_v4 }
0x1a51   :  { %7826 = vmatpush3.bf16.msra.mxu0 %v8246_v38  ;;  %v8272_v38 = vld [vmem:[%s10377_s2 + $0x2bc] ss:$12 sps:$4 sm:$0xff]  }
0x1a52   :  { %7827 = vmatprep.subr.bf16.mxu0 %v8536_v4 }
0x1b13   :  { %v4559_v36 = vpop.f32.mrb[100].mxu0 }
0x1b14   :  { %v4560_v60 = vadd.f32 %v4559_v36, %v4476_v56  ;;  %v7795_v40 = vpop.f32.mrb[101].mxu0 }
0x1b15   :  { %v4562_v33 = vpop.f32.mrb[102].mxu0 }
0x1b16   :  { %v9842_v8 = vadd.f32 %v4560_v60, %v9496_v10  ;;  %v4563_v50 = vadd.f32 %v4562_v33, %v4476_v56  ;;  %v7796_v63 = vpop.f32.mrb[103].mxu0 }
0x1b18   :  { %v9845_v11 = vadd.f32 %v4563_v50, %v9499_v12  ;;  %4568 = vadd.xlane.f32.xlu1 %v9842_v8 }
0x1b1a   :  { %4570 = vadd.xlane.f32.xlu0 %v9845_v11 }
0x1ba5   :  { %v4569_v55 = vpop.xlane.xlu1 %4568 }
0x1ba6   :  { %v4572_v62 = vmul.f32 0.0078125, %v4569_v55 }
0x1ba7   :  { %v4571_v10 = vpop.xlane.xlu0 %4570 }
0x1ba8   :  { %v4574_v15 = vsub.f32 %v9842_v8, %v4572_v62  ;;  %v4573_v16 = vmul.f32 0.0078125, %v4571_v10 }
0x1baa   :  { %v4575_v12 = vsub.f32 %v9845_v11, %v4573_v16  ;;  %v4576_v17 = vmul.f32 %v4574_v15, %v4574_v15 }
0x1bac   :  { %4578 = vadd.xlane.f32.xlu0 %v4576_v17  ;;  %v4577_v52 = vmul.f32 %v4575_v12, %v4575_v12  ;;  %v4744_v17 = vrot.slane %v6710_v57, %v8703_v49  ;;  %v8276_v57 = vld [vmem:[%s10377_s2 + $0x2d4] ss:$12 sps:$4 sm:$0xff]  }
0x1bb0   :  { %4580 = vadd.xlane.f32.xlu0 %v4577_v52 }
0x1c39   :  { %v4579_v24 = vpop.xlane.xlu0 %4578 }
0x1c3a   :  { %v4582_v26 = vmul.f32 0.0078125, %v4579_v24  ;;  %v8257_v24 = vld [vmem:[%s10377_s2 + $0x260] ss:$12 sps:$4 sm:$0xff]  }
0x1c3c   :  { %v4584_v20 = vadd.f32 1e-05, %v4582_v26  ;;  %v8254_v26 = vld [vmem:[%s10377_s2 + $0x258] ss:$12 sps:$4 sm:$0xff]  }
0x1c3d   :  { %v4581_v29 = vpop.xlane.xlu0 %4580 }
0x1c3e   :  { %8430 = vrsqrt.f32 %v4584_v20  ;;  %v4583_v32 = vmul.f32 0.0078125, %v4581_v29 }
0x1c40   :  { %v4585_v18 = vadd.f32 1e-05, %v4583_v32 }
0x1c42   :  { %8432 = vrsqrt.f32 %v4585_v18 }
0x1c48   :  { %v8431_v39 = vpop.eup %8430 }
0x1c49   :  { %v4588_v41 = vmul.f32 %v8431_v39, %v4574_v15 }
0x1c4b   :  { %v4594_v28 = vmul.f32 %v4593_v43, %v4588_v41 }
0x1c4c   :  { %v8433_v46 = vpop.eup %8432 }
0x1c4d   :  { %v4589_v31 = vmul.f32 %v8433_v46, %v4575_v12  ;;  %v4600_v27 = vadd.f32 %v4599_v47, %v4594_v28  ;;  %v8258_v28 = vld [vmem:[%s10377_s2 + $0x270] ss:$12 sps:$4 sm:$0xff]  }
0x1c4f   :  { %v4595_v48 = vmul.f32 %v4593_v43, %v4589_v31  ;;  %v8260_v31 = vld [vmem:[%s10377_s2 + $0x274] ss:$12 sps:$4 sm:$0xff]  }
0x1c51   :  { %v4601_v42 = vadd.f32 %v4599_v47, %v4595_v48  ;;  %v8261_v47 = vld [vmem:[%s10377_s2 + $0x278] ss:$12 sps:$4 sm:$0xff]  }
0x1c52   :  { %v8264_v48 = vld [vmem:[%s10377_s2 + $0x28c] ss:$12 sps:$4 sm:$0xff]  }
0x1c53   :  { %v4602_v51 = vpack.c.bf16 %v4601_v42, %v4600_v27  ;;  %v8262_v27 = vld [vmem:[%s10377_s2 + $0x288] ss:$12 sps:$4 sm:$0xff]   ;;  %v8265_v42 = vld [vmem:[%s10377_s2 + $0x290] ss:$12 sps:$4 sm:$0xff]  }
0x1c55   :  { %7814 = vmatmul.mubr.bf16.vlgmr.msra.gmra.mrb[140].mxu1 %v4602_v51  ;;  %v8268_v51 = vld [vmem:[%s10377_s2 + $0x2a4] ss:$12 sps:$4 sm:$0xff]  }
0x1c56   :  { %5067 = vmatprep.mubr.bf16.mxu1 %v8537_v30  ;;  %v8247_v30 = vld [vmem:[%s10380_s5 + $0xa8] sm:$0xff]   ;;  %5036 = vmatpush1.bf16.msra.mxu1 %v8250_v23 }
0x1c57   :  { %7828 = vmatpush3.bf16.msra.mxu0 %v8247_v30  ;;  %v8270_v30 = vld [vmem:[%s10377_s2 + $0x2b8] ss:$12 sps:$4 sm:$0xff]  }
0x1c58   :  { %7829 = vmatprep.subr.bf16.mxu0 %v8536_v4 }
0x1c5b   :  { %7830 = vmatpush3.bf16.msra.mxu0 %v8248_v35  ;;  %v8273_v35 = vld [vmem:[%s10377_s2 + $0x2c0] ss:$12 sps:$4 sm:$0xff]  }
0x1c5c   :  { %7831 = vmatprep.subr.bf16.mxu0 %v8536_v4 }
0x1c5f   :  { %7832 = vmatpush3.bf16.msra.mxu0 %v8249_v0  ;;  %v8274_v0 = vld [vmem:[%s10377_s2 + $0x2d0] ss:$12 sps:$4 sm:$0xff]  }
0x1c60   :  { %7837 = vmatprep.subr.bf16.mxu0 %v8536_v4 }
0x1d28   :  { %v4706_v1 = vpop.f32.mrb[140].mxu1 }
0x1d29   :  { %v4707_v37 = vadd.f32 %v4706_v1, %v4623_v61  ;;  %v7815_v6 = vpop.f32.mrb[141].mxu1  ;;  %v8280_v1 = vld [vmem:[%s10377_s2 + $0x2ec] ss:$12 sps:$4 sm:$0xff]  }
0x1d2a   :  { %v4709_v56 = vpop.f32.mrb[142].mxu1  ;;  %v8281_v6 = vld [vmem:[%s10377_s2 + $0x2f0] ss:$12 sps:$4 sm:$0xff]  }
0x1d2b   :  { %v4715_v36 = vmul.f32 0.70710677, %v4707_v37  ;;  %v4710_v60 = vadd.f32 %v4709_v56, %v4623_v61  ;;  %v7816_v40 = vpop.f32.mrb[143].mxu1  ;;  %v4713_v55 = vmul.f32 0.5, %v4707_v37  ;;  %v8277_v61 = vld [vmem:[%s10377_s2 + $0x2d8] ss:$12 sps:$4 sm:$0xff]  }
0x1d2c   :  { %v8278_v37 = vld [vmem:[%s10377_s2 + $0x2e8] ss:$12 sps:$4 sm:$0xff]  }
0x1d2d   :  { %8434 = verf.f32 %v4715_v36  ;;  %v4716_v33 = vmul.f32 0.70710677, %v4710_v60  ;;  %v4714_v62 = vmul.f32 0.5, %v4710_v60 }
0x1d2f   :  { %8436 = verf.f32 %v4716_v33 }
0x1d37   :  { %v8435_v50 = vpop.eup %8434 }
0x1d38   :  { %v4719_v63 = vadd.f32 1.0, %v8435_v50 }
0x1d39   :  { %v8437_v2 = vpop.eup %8436 }
0x1d3a   :  { %v4720_v10 = vadd.f32 1.0, %v8437_v2  ;;  %v4721_v15 = vmul.f32 %v4719_v63, %v4713_v55  ;;  %v10020_v63 = vld [vmem:[%s10381_s6 + $0x30] sm:$0xff] }
0x1d3b   :  { %v4864_v2 = vrot.slane %v10020_v63, %v8692_v44 }
0x1d3c   :  { %v4722_v16 = vmul.f32 %v4720_v10, %v4714_v62 }
0x1d3e   :  { %v4723_v12 = vpack.c.bf16 %v4722_v16, %v4721_v15 }
0x1d40   :  { %7834 = vmatmul.mubr.bf16.vlgmr.msra.gmra.mrb[104].mxu0 %v4723_v12  ;;  %v4870_v12 = vrot.slane %v10020_v63, %v8703_v49 }
0x1d41   :  { %7853 = vmatprep.mubr.msk.bf16.mxu0 %vm8538_vm0, %v8536_v4 }
0x1e13   :  { %v4827_v52 = vpop.f32.mrb[104].mxu0 }
0x1e14   :  { %v4828_v19 = vadd.f32 %v4827_v52, %v4744_v17  ;;  %v7835_v21 = vpop.f32.mrb[105].mxu0 }
0x1e15   :  { %v4830_v3 = vpop.f32.mrb[106].mxu0 }
0x1e16   :  { %v9927_v53 = vadd.f32 %v4828_v19, %v9842_v8  ;;  %v4831_v7 = vadd.f32 %v4830_v3, %v4744_v17  ;;  %v7836_v14 = vpop.f32.mrb[107].mxu0  ;;  %v8253_v8 = vld [vmem:[%s10377_s2 + $0x248] ss:$12 sps:$4 sm:$0xff]   ;;  %v5122_v3 = vrot.slane %v10020_v63, %v8713_v58 }
0x1e17   :  { %7838 = vmatpush3.bf16.msra.mxu0 %v8253_v8 }
0x1e18   :  { %v9930_v13 = vadd.f32 %v4831_v7, %v9845_v11  ;;  %4839 = vadd.xlane.f32.xlu1 %v9927_v53  ;;  %v8256_v11 = vld [vmem:[%s10377_s2 + $0x25c] ss:$12 sps:$4 sm:$0xff]   ;;  %7839 = vmatprep.subr.bf16.mxu0 %v8536_v4  ;;  %v5129_v7 = vrot.slane %v10020_v63, %v8716_v59 }
0x1e19   :  { %5037 = vmatprep.subr.bf16.mxu1 %v8256_v11 }
0x1e1a   :  { %4841 = vadd.xlane.f32.xlu0 %v9930_v13  ;;  %5038 = vmatpush1.bf16.msra.mxu1 %v8254_v26 }
0x1e1b   :  { %7840 = vmatpush3.bf16.msra.mxu0 %v8257_v24  ;;  %5039 = vmatprep.subr.bf16.mxu1 %v8260_v31 }
0x1e1c   :  { %7841 = vmatprep.subr.bf16.mxu0 %v8536_v4 }
0x1e1e   :  { %5040 = vmatpush1.bf16.msra.mxu1 %v8258_v28 }
0x1e1f   :  { %7842 = vmatpush3.bf16.msra.mxu0 %v8261_v47  ;;  %5041 = vmatprep.subr.bf16.mxu1 %v8264_v48 }
0x1e20   :  { %7843 = vmatprep.subr.bf16.mxu0 %v8536_v4 }
0x1e22   :  { %5042 = vmatpush1.bf16.msra.mxu1 %v8262_v27 }
0x1e23   :  { %7844 = vmatpush3.bf16.msra.mxu0 %v8265_v42  ;;  %5043 = vmatprep.subr.bf16.mxu1 %v8268_v51 }
0x1e24   :  { %7845 = vmatprep.subr.bf16.mxu0 %v8536_v4 }
0x1e26   :  { %5044 = vmatpush1.bf16.msra.mxu1 %v8266_v54 }
0x1e27   :  { %7846 = vmatpush3.bf16.msra.mxu0 %v8269_v34  ;;  %5045 = vmatprep.subr.bf16.mxu1 %v8272_v38 }
0x1e28   :  { %7847 = vmatprep.subr.bf16.mxu0 %v8536_v4 }
0x1e2a   :  { %5046 = vmatpush1.bf16.msra.mxu1 %v8270_v30 }
0x1e2b   :  { %7848 = vmatpush3.bf16.msra.mxu0 %v8273_v35  ;;  %5047 = vmatprep.subr.bf16.mxu1 %v8276_v57 }
0x1e2c   :  { %7849 = vmatprep.subr.bf16.mxu0 %v8536_v4 }
0x1e2e   :  { %5048 = vmatpush1.bf16.msra.mxu1 %v8274_v0  ;;  %v5136_v0 = vrot.slane %v10020_v63, %v8749_v22 }
0x1e2f   :  { %7850 = vmatpush3.bf16.msra.mxu0 %v8277_v61  ;;  %5049 = vmatprep.subr.bf16.mxu1 %v8280_v1 }
0x1e30   :  { %7851 = vmatprep.subr.bf16.mxu0 %v8536_v4 }
0x1e32   :  { %5050 = vmatpush1.bf16.msra.mxu1 %v8278_v37 }
0x1e33   :  { %7852 = vmatpush3.bf16.msra.mxu0 %v8281_v6  ;;  %7857 = vmatprep.subr.bf16.mxu1 %v8536_v4 }
0x1e34   :  { %7881 = vmatprep.subr.bf16.mxu0 %v8536_v4 }
0x1ea5   :  { %v4840_v20 = vpop.xlane.xlu1 %4839 }
0x1ea6   :  { %v4843_v29 = vmul.f32 0.0078125, %v4840_v20 }
0x1ea7   :  { %v4842_v32 = vpop.xlane.xlu0 %4841 }
0x1ea8   :  { %v4845_v18 = vsub.f32 %v9927_v53, %v4843_v29  ;;  %v4844_v39 = vmul.f32 0.0078125, %v4842_v32 }
0x1eaa   :  { %v4846_v41 = vsub.f32 %v9930_v13, %v4844_v39  ;;  %v4847_v43 = vmul.f32 %v4845_v18, %v4845_v18 }
0x1eac   :  { %4849 = vadd.xlane.f32.xlu1 %v4847_v43  ;;  %v4848_v46 = vmul.f32 %v4846_v41, %v4846_v41 }
0x1eae   :  { %4851 = vadd.xlane.f32.xlu0 %v4848_v46 }
0x1f39   :  { %v4850_v56 = vpop.xlane.xlu1 %4849 }
0x1f3a   :  { %v4853_v36 = vmul.f32 0.0078125, %v4850_v56 }
0x1f3b   :  { %v4852_v60 = vpop.xlane.xlu0 %4851 }
0x1f3c   :  { %v4855_v40 = vadd.f32 1e-05, %v4853_v36  ;;  %v4854_v33 = vmul.f32 0.0078125, %v4852_v60 }
0x1f3e   :  { %8438 = vrsqrt.f32 %v4855_v40  ;;  %v4856_v50 = vadd.f32 1e-05, %v4854_v33 }
0x1f40   :  { %8440 = vrsqrt.f32 %v4856_v50 }
0x1f48   :  { %v8439_v55 = vpop.eup %8438 }
0x1f49   :  { %v4859_v62 = vmul.f32 %v8439_v55, %v4845_v18 }
0x1f4a   :  { %v8441_v10 = vpop.eup %8440 }
0x1f4b   :  { %v4860_v15 = vmul.f32 %v8441_v10, %v4846_v41  ;;  %v4865_v16 = vmul.f32 %v4864_v2, %v4859_v62  ;;  %v8504_v62 = vld [vmem:[%s10376_s1] sm:$0xff] }
0x1f4d   :  { %v4866_v17 = vmul.f32 %v4864_v2, %v4860_v15  ;;  %v4871_v52 = vadd.f32 %v4870_v12, %v4865_v16 }
0x1f4f   :  { %v4872_v19 = vadd.f32 %v4870_v12, %v4866_v17 }
0x1f51   :  { %v4873_v21 = vpack.c.bf16 %v4872_v19, %v4871_v52  ;;  %v8505_v19 = vld [vmem:[%s10376_s1 + $0x8] sm:$0xff] }
0x1f53   :  { %5068 = vmatmul.mubr.bf16.vlgmr.msra.gmra.mrb[144].mxu1 %v4873_v21  ;;  %7854 = vmatmul.mubr.bf16.vlgmr.msra.gmra.mrb[108].mxu0 %v4873_v21 }
0x1f54   :  { %7859 = vmatprep.mubr.msk.bf16.mxu1 %vm8538_vm0, %v8536_v4  ;;  %7883 = vmatprep.mubr.msk.bf16.mxu0 %vm8538_vm0, %v8536_v4 }
0x2026   :  { %v5069_v14 = vpop.f32.mrb[144].mxu1  ;;  %v10034_v23 = vpop.f32.mrb[108].mxu0 }
0x2027   :  { %v5123_v45 = vadd.f32 %v5122_v3, %v5069_v14  ;;  %v5071_v8 = vpop.f32.mrb[145].mxu1  ;;  %v7855_v11 = vpop.f32.mrb[109].mxu0  ;;  %v5137_v1 = vadd.f32 %v5136_v0, %v10034_v23 }
0x2028   :  { %v5130_v24 = vadd.f32 %v5129_v7, %v5071_v8  ;;  %v5073_v26 = vpop.f32.mrb[146].mxu1  ;;  %v10036_v20 = vpop.f32.mrb[110].mxu0  ;;  %v8506_v8 = vld [vmem:[%s10376_s1 + $0x10] sm:$0xff] }
0x2029   :  { %v7031_v29 = vpack.c.bf16 %v5123_v45, %v5123_v45  ;;  %v5075_v32 = vpop.f32.mrb[147].mxu1  ;;  %v7856_v18 = vpop.f32.mrb[111].mxu0  ;;  %v5124_v43 = vadd.f32 %v5122_v3, %v5073_v26  ;;  %v10082_v22 = vpack.c.bf16 %v5137_v1, %v5137_v1  ;;  %v5138_v56 = vadd.f32 %v5136_v0, %v10036_v20 }
0x202a   :  { %v7033_v39 = vpack.c.bf16 %v5130_v24, %v5130_v24  ;;  %v5131_v41 = vadd.f32 %v5129_v7, %v5075_v32  ;;  %v8507_v18 = vld [vmem:[%s10376_s1 + $0x18] sm:$0xff] }
0x202b   :  { %5145 = vrot.lane.b32.xlu0 %v7031_v29, %s8539_s15  ;;  %v7032_v46 = vpack.c.bf16 %v5124_v43, %v5124_v43  ;;  %v10090_v40 = vpack.c.bf16 %v5138_v56, %v5138_v56  ;;  %v5659_v33 = vsel %vm864_vm2, %v10082_v22, 0 }
0x202c   :  { %v7034_v58 = vpack.c.bf16 %v5131_v41, %v5131_v41  ;;  %5162 = vrot.lane.b32.xlu1 %v7033_v39, %s8539_s15  ;;  %v5195_v59 = vsel %vm395_vm1, %v7033_v39, 0 }
0x202d   :  { %7858 = vmatpush3.bf16.xpose.msra.mxu1 %v5195_v59  ;;  %v5705_v2 = vsel %vm864_vm2, %v10090_v40, 0 }
0x202e   :  { %7863 = vmatprep.subr.bf16.mxu1 %v8536_v4  ;;  %v5241_v31 = vsel %vm395_vm1, %v7034_v58, 0 }
0x202f   :  { %5168 = vrot.lane.b32.xlu0 %v7034_v58, %s8540_s16 }
0x2030   :  { %5164 = vrot.lane.b32.xlu1 %v7034_v58, %s8539_s15 }
0x2033   :  { %5151 = vrot.lane.b32.xlu0 %v7032_v46, %s8540_s16 }
0x2034   :  { %7860 = vmatmul.mubr.msk.bf16.vlgmr.msra.gmra.mrb[148].mxu1 %vm395_vm1, %v7031_v29  ;;  %5147 = vrot.lane.b32.xlu1 %v7032_v46, %s8539_s15 }
0x2035   :  { %7864 = vmatpush3.bf16.xpose.msra.mxu1 %v5241_v31  ;;  %7865 = vmatprep.mubr.msk.bf16.mxu1 %vm8538_vm0, %v8536_v4  ;;  %v8508_v31 = vld [vmem:[%s10376_s1 + $0x20] sm:$0xff] }
0x2036   :  { %7869 = vmatprep.subr.bf16.mxu1 %v8536_v4 }
0x2037   :  { %5172 = vrot.lane.b32.xlu0 %v7034_v58, %s8541_s17 }
0x2038   :  { %5166 = vrot.lane.b32.xlu1 %v7033_v39, %s8540_s16 }
0x203b   :  { %5155 = vrot.lane.b32.xlu0 %v7032_v46, %s8541_s17 }
0x203c   :  { %5149 = vrot.lane.b32.xlu1 %v7031_v29, %s8540_s16  ;;  %7866 = vmatmul.mubr.msk.bf16.vlgmr.msra.gmra.mrb[152].mxu1 %vm395_vm1, %v7032_v46 }
0x203d   :  { %7871 = vmatprep.mubr.msk.bf16.mxu1 %vm8538_vm0, %v8536_v4 }
0x2040   :  { %5170 = vrot.lane.b32.xlu1 %v7033_v39, %s8541_s17 }
0x2044   :  { %5153 = vrot.lane.b32.xlu1 %v7031_v29, %s8541_s17 }
0x209d   :  { %v5146_v48 = vpop.permute.xlu0 %5145 }
0x209e   :  { %v5163_v28 = vpop.permute.xlu1 %5162 }
0x209f   :  { %v5287_v47 = vsel %vm395_vm1, %v5163_v28, 0 }
0x20a0   :  { %7870 = vmatpush3.bf16.xpose.msra.mxu1 %v5287_v47 }
0x20a1   :  { %7875 = vmatprep.subr.bf16.mxu1 %v8536_v4  ;;  %v5169_v54 = vpop.permute.xlu0 %5168 }
0x20a2   :  { %v5165_v27 = vpop.permute.xlu1 %5164  ;;  %v5425_v57 = vsel %vm395_vm1, %v5169_v54, 0  ;;  %v8509_v54 = vld [vmem:[%s10376_s1 + $0x28] sm:$0xff] }
0x20a3   :  { %v5333_v51 = vsel %vm395_vm1, %v5165_v27, 0 }
0x20a5   :  { %v5152_v30 = vpop.permute.xlu0 %5151 }
0x20a6   :  { %v5148_v42 = vpop.permute.xlu1 %5147 }
0x20a7   :  { %7872 = vmatmul.mubr.msk.bf16.vlgmr.msra.gmra.mrb[156].mxu1 %vm395_vm1, %v5146_v48 }
0x20a8   :  { %7876 = vmatpush3.bf16.xpose.msra.mxu1 %v5333_v51  ;;  %7877 = vmatprep.mubr.msk.bf16.mxu1 %vm8538_vm0, %v8536_v4 }
0x20a9   :  { %7887 = vmatprep.subr.bf16.mxu1 %v8536_v4  ;;  %v5173_v6 = vpop.permute.xlu0 %5172 }
0x20aa   :  { %v5167_v34 = vpop.permute.xlu1 %5166  ;;  %v5517_v36 = vsel %vm395_vm1, %v5173_v6, 0 }
0x20ab   :  { %v5379_v38 = vsel %vm395_vm1, %v5167_v34, 0 }
0x20ac   :  { %7882 = vmatpush3.bf16.xpose.msra.mxu0 %v5379_v38 }
0x20ad   :  { %7893 = vmatprep.subr.bf16.mxu0 %v8536_v4  ;;  %v5156_v50 = vpop.permute.xlu0 %5155 }
0x20ae   :  { %v5150_v35 = vpop.permute.xlu1 %5149 }
0x20af   :  { %7878 = vmatmul.mubr.msk.bf16.vlgmr.msra.gmra.mrb[160].mxu1 %vm395_vm1, %v5148_v42 }
0x20b0   :  { %7888 = vmatpush3.bf16.xpose.msra.mxu1 %v5425_v57  ;;  %7889 = vmatprep.mubr.msk.bf16.mxu1 %vm8538_vm0, %v8536_v4 }
0x20b1   :  { %7899 = vmatprep.subr.bf16.mxu1 %v8536_v4 }
0x20b2   :  { %v5171_v61 = vpop.permute.xlu1 %5170 }
0x20b3   :  { %v5471_v37 = vsel %vm395_vm1, %v5171_v61, 0  ;;  %7884 = vmatmul.mubr.msk.bf16.vlgmr.msra.gmra.mrb[112].mxu0 %vm395_vm1, %v5150_v35  ;;  %v8510_v61 = vld [vmem:[%s10376_s1 + $0x30] sm:$0xff] }
0x20b4   :  { %7894 = vmatpush3.bf16.xpose.msra.mxu0 %v5471_v37  ;;  %7895 = vmatprep.mubr.msk.bf16.mxu0 %vm8538_vm0, %v8536_v4 }
0x20b5   :  { %7905 = vmatprep.subr.bf16.mxu0 %v8536_v4 }
0x20b6   :  { %v5154_v60 = vpop.permute.xlu1 %5153 }
0x20b7   :  { %7890 = vmatmul.mubr.msk.bf16.vlgmr.msra.gmra.mrb[164].mxu1 %vm395_vm1, %v5152_v30 }
0x20b8   :  { %7900 = vmatpush3.bf16.xpose.msra.mxu1 %v5517_v36  ;;  %7901 = vmatprep.mubr.msk.bf16.mxu1 %vm8538_vm0, %v8536_v4 }
0x20b9   :  { %7911 = vmatprep.subr.bf16.mxu1 %v8536_v4 }
0x20bb   :  { %7896 = vmatmul.mubr.msk.bf16.vlgmr.msra.gmra.mrb[116].mxu0 %vm395_vm1, %v5154_v60 }
0x20bc   :  { %7906 = vmatpush3.bf16.msra.mxu0 %v5659_v33  ;;  %7907 = vmatprep.mubr.msk.bf16.mxu0 %vm8538_vm0, %v8536_v4  ;;  %v8511_v33 = vld [vmem:[%s10376_s1 + $0x38] sm:$0xff] }
0x20bd   :  { %7917 = vmatprep.subr.bf16.mxu0 %v8536_v4 }
0x20bf   :  { %7902 = vmatmul.mubr.msk.bf16.vlgmr.msra.gmra.mrb[168].mxu1 %vm395_vm1, %v5156_v50 }
0x20c0   :  { %7912 = vmatpush3.bf16.msra.mxu1 %v5705_v2  ;;  %7913 = vmatprep.mubr.msk.bf16.mxu1 %vm8538_vm0, %v8536_v4 }
0x20c1   :  { %7923 = vmatprep.subr.bf16.mxu1 %v8536_v4 }
0x2107   :  { %v5231_v55 = vpop.f32.mrb[148].mxu1 }
0x2108   :  { %v10107_v10 = vadd.f32 %v8504_v62, %v5231_v55  ;;  %v7861_v15 = vpop.f32.mrb[149].mxu1 }
0x2109   :  { %v5234_v16 = vpop.f32.mrb[150].mxu1 }
0x210a   :  { %v7862_v12 = vpop.f32.mrb[151].mxu1  ;;  %v5559_v17 = vsel %vm764_vm3, %v10107_v10, -inf }
0x210b   :  { %5560 = vmax.xlane.f32.xlu1 %v5559_v17 }
0x210f   :  { %v5277_v52 = vpop.f32.mrb[152].mxu1 }
0x2110   :  { %v5278_v21 = vadd.f32 %v8505_v19, %v5277_v52  ;;  %v7867_v3 = vpop.f32.mrb[153].mxu1 }
0x2111   :  { %v5280_v7 = vpop.f32.mrb[154].mxu1 }
0x2112   :  { %v7868_v14 = vpop.f32.mrb[155].mxu1  ;;  %v5562_v23 = vsel %vm764_vm3, %v5278_v21, -inf }
0x2113   :  { %5563 = vmax.xlane.f32.xlu0 %v5562_v23 }
0x217a   :  { %v5323_v45 = vpop.f32.mrb[156].mxu1 }
0x217b   :  { %v10118_v11 = vadd.f32 %v8506_v8, %v5323_v45  ;;  %v7873_v24 = vpop.f32.mrb[157].mxu1 }
0x217c   :  { %v5326_v26 = vpop.f32.mrb[158].mxu1 }
0x217d   :  { %v7874_v20 = vpop.f32.mrb[159].mxu1  ;;  %v5565_v29 = vsel %vm764_vm3, %v10118_v11, -inf }
0x217e   :  { %5566 = vmax.xlane.f32.xlu0 %v5565_v29 }
0x2182   :  { %v5369_v32 = vpop.f32.mrb[160].mxu1 }
0x2183   :  { %v5370_v39 = vadd.f32 %v8507_v18, %v5369_v32  ;;  %v7879_v41 = vpop.f32.mrb[161].mxu1 }
0x2184   :  { %v5372_v58 = vpop.f32.mrb[162].mxu1 }
0x2185   :  { %v7880_v59 = vpop.f32.mrb[163].mxu1  ;;  %v5568_v43 = vsel %vm764_vm3, %v5370_v39, -inf }
0x2186   :  { %v5415_v46 = vpop.f32.mrb[112].mxu0  ;;  %5569 = vmax.xlane.f32.xlu0 %v5568_v43 }
0x2187   :  { %v5416_v28 = vadd.f32 %v8508_v31, %v5415_v46  ;;  %v7885_v47 = vpop.f32.mrb[113].mxu0 }
0x2188   :  { %v5418_v48 = vpop.f32.mrb[114].mxu0 }
0x2189   :  { %v7886_v27 = vpop.f32.mrb[115].mxu0  ;;  %v5571_v42 = vsel %vm764_vm3, %v5416_v28, -inf }
0x218a   :  { %5572 = vmax.xlane.f32.xlu1 %v5571_v42  ;;  %v5461_v51 = vpop.f32.mrb[164].mxu1 }
0x218b   :  { %v10133_v34 = vadd.f32 %v8509_v54, %v5461_v51  ;;  %v7891_v38 = vpop.f32.mrb[165].mxu1 }
0x218c   :  { %v5464_v30 = vpop.f32.mrb[166].mxu1 }
0x218d   :  { %v7892_v35 = vpop.f32.mrb[167].mxu1  ;;  %v5574_v0 = vsel %vm764_vm3, %v10133_v34, -inf }
0x218e   :  { %v5507_v57 = vpop.f32.mrb[116].mxu0  ;;  %5575 = vmax.xlane.f32.xlu0 %v5574_v0 }
0x218f   :  { %v10140_v1 = vadd.f32 %v8510_v61, %v5507_v57  ;;  %v7897_v37 = vpop.f32.mrb[117].mxu0 }
0x2190   :  { %v5510_v6 = vpop.f32.mrb[118].mxu0 }
0x2191   :  { %v7898_v56 = vpop.f32.mrb[119].mxu0  ;;  %v5577_v36 = vsel %vm764_vm3, %v10140_v1, -inf }
0x2192   :  { %5578 = vmax.xlane.f32.xlu1 %v5577_v36  ;;  %v5553_v60 = vpop.f32.mrb[168].mxu1 }
0x2193   :  { %v5554_v50 = vadd.f32 %v8511_v33, %v5553_v60  ;;  %v7903_v2 = vpop.f32.mrb[169].mxu1 }
0x2194   :  { %v5556_v55 = vpop.f32.mrb[170].mxu1 }
0x2195   :  { %v7904_v62 = vpop.f32.mrb[171].mxu1  ;;  %v5580_v15 = vsel %vm764_vm3, %v5554_v50, -inf }
0x2196   :  { %5581 = vmax.xlane.f32.xlu0 %v5580_v15 }
0x2198   :  { %v5561_v52 = vpop.xlane.xlu1 %5560 }
0x2199   :  { %v5583_v7 = vsub.f32 %v10107_v10, %v5561_v52 }
0x219b   :  { %v5591_v14 = vmul.f32 1.442695, %v5583_v7 }
0x21a0   :  { %v5564_v16 = vpop.xlane.xlu0 %5563 }
0x21a1   :  { %v5584_v12 = vsub.f32 %v5278_v21, %v5564_v16 }
0x21a3   :  { %v5593_v17 = vmul.f32 1.442695, %v5584_v12  ;;  %5179 = vrot.lane.b32.xlu1 %v10082_v22, %s8539_s15 }
0x21a5   :  { %8442 = vpow2.f32 %v5593_v17 }
0x21a6   :  { %8444 = vpow2.f32 %v5591_v14 }
0x21af   :  { %v8443_v19 = vpop.eup %8442 }
0x21b0   :  { %v5610_v3 = vsel %vm764_vm3, %v8443_v19, 0.0  ;;  %v8445_v23 = vpop.eup %8444 }
0x21b1   :  { %5611 = vadd.xlane.f32.xlu0 %v5610_v3  ;;  %v5607_v45 = vsel %vm764_vm3, %v8445_v23, 0.0 }
0x21c7   :  { %5608 = vadd.xlane.f32.xlu1 %v5607_v45 }
0x220b   :  { %v5567_v8 = vpop.xlane.xlu0 %5566 }
0x220c   :  { %v5585_v21 = vsub.f32 %v10118_v11, %v5567_v8 }
0x220e   :  { %v5595_v24 = vmul.f32 1.442695, %v5585_v21 }
0x2210   :  { %8446 = vpow2.f32 %v5595_v24 }
0x2213   :  { %v5570_v26 = vpop.xlane.xlu0 %5569 }
0x2214   :  { %v5586_v20 = vsub.f32 %v5370_v39, %v5570_v26 }
0x2216   :  { %v5597_v29 = vmul.f32 1.442695, %v5586_v20 }
0x2217   :  { %v5573_v32 = vpop.xlane.xlu1 %5572 }
0x2218   :  { %8448 = vpow2.f32 %v5597_v29  ;;  %v5587_v18 = vsub.f32 %v5416_v28, %v5573_v32 }
0x221a   :  { %v8447_v41 = vpop.eup %8446  ;;  %v5599_v10 = vmul.f32 1.442695, %v5587_v18 }
0x221b   :  { %v5613_v58 = vsel %vm764_vm3, %v8447_v41, 0.0  ;;  %v5576_v46 = vpop.xlane.xlu0 %5575 }
0x221c   :  { %8450 = vpow2.f32 %v5599_v10  ;;  %5614 = vadd.xlane.f32.xlu1 %v5613_v58  ;;  %v5588_v47 = vsub.f32 %v10133_v34, %v5576_v46 }
0x221e   :  { %v5601_v48 = vmul.f32 1.442695, %v5588_v47 }
0x221f   :  { %v5579_v42 = vpop.xlane.xlu1 %5578 }
0x2220   :  { %v5589_v38 = vsub.f32 %v10140_v1, %v5579_v42 }
0x2222   :  { %v10155_v59 = vpop.eup %8448  ;;  %v5603_v0 = vmul.f32 1.442695, %v5589_v38 }
0x2223   :  { %v5616_v43 = vsel %vm764_vm3, %v10155_v59, 0.0  ;;  %v5582_v31 = vpop.xlane.xlu0 %5581  ;;  %v5180_v57 = vpop.permute.xlu1 %5179 }
0x2224   :  { %5617 = vadd.xlane.f32.xlu0 %v5616_v43  ;;  %v5590_v27 = vsub.f32 %v5554_v50, %v5582_v31  ;;  %v5751_v2 = vsel %vm864_vm2, %v5180_v57, 0  ;;  %v8282_v57 = vld [vmem:[%s10378_s3 + $0xc0] sm:$0xff]  }
0x2226   :  { %v10159_v11 = vpop.eup %8450  ;;  %v5605_v30 = vmul.f32 1.442695, %v5590_v27 }
0x2227   :  { %v5619_v39 = vsel %vm764_vm3, %v10159_v11, 0.0 }
0x2228   :  { %5620 = vadd.xlane.f32.xlu1 %v5619_v39 }
0x2239   :  { %5183 = vrot.lane.b32.xlu1 %v10082_v22, %s8540_s16 }
0x223a   :  { %5181 = vrot.lane.b32.xlu0 %v10090_v40, %s8539_s15 }
0x223d   :  { %5185 = vrot.lane.b32.xlu1 %v10090_v40, %s8540_s16 }
0x223e   :  { %v5612_v28 = vpop.xlane.xlu0 %5611 }
0x223f   :  { %8452 = vrcp.f32 %v5612_v28 }
0x2240   :  { %8454 = vpow2.f32 %v5601_v48 }
0x2241   :  { %8456 = vpow2.f32 %v5605_v30 }
0x2242   :  { %8458 = vpow2.f32 %v5603_v0 }
0x2249   :  { %v8453_v51 = vpop.eup %8452 }
0x224a   :  { %v5640_v54 = vmul.f32 %v8453_v51, %v8443_v19  ;;  %v8455_v61 = vpop.eup %8454 }
0x224b   :  { %v5622_v37 = vsel %vm764_vm3, %v8455_v61, 0.0  ;;  %v10175_v6 = vpop.eup %8456 }
0x224c   :  { %v5648_v35 = vpack.c.bf16 %v5640_v54, %v5640_v54  ;;  %v5628_v1 = vsel %vm764_vm3, %v10175_v6, 0.0  ;;  %v10179_v56 = vpop.eup %8458 }
0x224d   :  { %v5625_v33 = vsel %vm764_vm3, %v10179_v56, 0.0 }
0x224e   :  { %7914 = vmatmul.mubr.msk.bf16.vlgmr.msra.gmra.mrb[172].mxu1 %vm764_vm3, %v5648_v35 }
0x224f   :  { %7925 = vmatprep.mubr.msk.bf16.mxu1 %vm8538_vm0, %v8536_v4 }
0x2254   :  { %v5609_v34 = vpop.xlane.xlu1 %5608 }
0x2255   :  { %8460 = vrcp.f32 %v5609_v34 }
0x2259   :  { %5623 = vadd.xlane.f32.xlu0 %v5622_v37  ;;  %v8283_v37 = vld [vmem:[%s10378_s3 + $0xc8] sm:$0xff]  }
0x225d   :  { %5629 = vadd.xlane.f32.xlu0 %v5628_v1  ;;  %v8284_v1 = vld [vmem:[%s10378_s3 + $0xd0] sm:$0xff]  }
0x225f   :  { %v8461_v36 = vpop.eup %8460 }
0x2260   :  { %v5639_v60 = vmul.f32 %v8461_v36, %v8445_v23 }
0x2261   :  { %5626 = vadd.xlane.f32.xlu1 %v5625_v33 }
0x2262   :  { %v5647_v50 = vpack.c.bf16 %v5639_v60, %v5639_v60 }
0x2264   :  { %7908 = vmatmul.mubr.msk.bf16.vlgmr.msra.gmra.mrb[120].mxu0 %vm764_vm3, %v5647_v50  ;;  %v8285_v50 = vld [vmem:[%s10378_s3 + $0xd8] sm:$0xff]  }
0x2265   :  { %7918 = vmatpush3.bf16.msra.mxu0 %v5751_v2  ;;  %7919 = vmatprep.mubr.msk.bf16.mxu0 %vm8538_vm0, %v8536_v4 }
0x2266   :  { %7929 = vmatprep.subr.bf16.mxu0 %v8536_v4 }
0x2272   :  { %5187 = vrot.lane.b32.xlu1 %v10082_v22, %s8541_s17 }
0x2273   :  { %5189 = vrot.lane.b32.xlu0 %v10090_v40, %s8541_s17 }
0x22a9   :  { %v5615_v55 = vpop.xlane.xlu1 %5614 }
0x22aa   :  { %8462 = vrcp.f32 %v5615_v55 }
0x22b1   :  { %v5618_v62 = vpop.xlane.xlu0 %5617 }
0x22b2   :  { %8464 = vrcp.f32 %v5618_v62 }
0x22b4   :  { %v8463_v15 = vpop.eup %8462 }
0x22b5   :  { %v5641_v16 = vmul.f32 %v8463_v15, %v8447_v41  ;;  %v5621_v12 = vpop.xlane.xlu1 %5620  ;;  %v5182_v17 = vpop.permute.xlu0 %5181 }
0x22b6   :  { %8466 = vrcp.f32 %v5621_v12  ;;  %v5797_v52 = vsel %vm864_vm2, %v5182_v17, 0  ;;  %v8287_v17 = vld [vmem:[%s10378_s3 + $0xe8] sm:$0xff]  }
0x22b7   :  { %7924 = vmatpush3.bf16.msra.mxu1 %v5797_v52  ;;  %v5649_v19 = vpack.c.bf16 %v5641_v16, %v5641_v16  ;;  %v8286_v16 = vld [vmem:[%s10378_s3 + $0xe0] sm:$0xff]   ;;  %v8288_v52 = vld [vmem:[%s10378_s3 + $0xf0] sm:$0xff]  }
0x22b8   :  { %7935 = vmatprep.subr.bf16.mxu1 %v8536_v4 }
0x22b9   :  { %7920 = vmatmul.mubr.msk.bf16.vlgmr.msra.gmra.mrb[124].mxu0 %vm764_vm3, %v5649_v19  ;;  %v5184_v22 = vpop.permute.xlu1 %5183 }
0x22ba   :  { %v5843_v40 = vsel %vm864_vm2, %v5184_v22, 0  ;;  %7931 = vmatprep.mubr.msk.bf16.mxu0 %vm8538_vm0, %v8536_v4  ;;  %v8289_v22 = vld [vmem:[%s10378_s3 + $0xf8] sm:$0xff]  }
0x22bb   :  { %7930 = vmatpush3.bf16.msra.mxu0 %v5843_v40 }
0x22bc   :  { %v8465_v3 = vpop.eup %8464  ;;  %7941 = vmatprep.subr.bf16.mxu0 %v8536_v4 }
0x22bd   :  { %v5642_v7 = vmul.f32 %v8465_v3, %v10155_v59  ;;  %v5186_v14 = vpop.permute.xlu1 %5185 }
0x22be   :  { %v5889_v21 = vsel %vm864_vm2, %v5186_v14, 0 }
0x22bf   :  { %v5650_v23 = vpack.c.bf16 %v5642_v7, %v5642_v7 }
0x22c0   :  { %v8467_v45 = vpop.eup %8466 }
0x22c1   :  { %v5643_v8 = vmul.f32 %v8467_v45, %v10159_v11  ;;  %7926 = vmatmul.mubr.msk.bf16.vlgmr.msra.gmra.mrb[176].mxu1 %vm764_vm3, %v5650_v23 }
0x22c2   :  { %7936 = vmatpush3.bf16.msra.mxu1 %v5889_v21  ;;  %7937 = vmatprep.mubr.msk.bf16.mxu1 %vm8538_vm0, %v8536_v4 }
0x22c3   :  { %v5651_v24 = vpack.c.bf16 %v5643_v8, %v5643_v8  ;;  %7947 = vmatprep.subr.bf16.mxu1 %v8536_v4 }
0x22c5   :  { %7932 = vmatmul.mubr.msk.bf16.vlgmr.msra.gmra.mrb[128].mxu0 %vm764_vm3, %v5651_v24 }
0x22c6   :  { %7943 = vmatprep.mubr.msk.bf16.mxu0 %vm8538_vm0, %v8536_v4 }
0x22e6   :  { %v5624_v26 = vpop.xlane.xlu0 %5623 }
0x22e7   :  { %8468 = vrcp.f32 %v5624_v26 }
0x22ea   :  { %v5630_v20 = vpop.xlane.xlu0 %5629 }
0x22eb   :  { %8470 = vrcp.f32 %v5630_v20 }
0x22ee   :  { %v5627_v29 = vpop.xlane.xlu1 %5626  ;;  %v5190_v10 = vpop.permute.xlu0 %5189 }
0x22ef   :  { %8472 = vrcp.f32 %v5627_v29  ;;  %v5981_v11 = vsel %vm864_vm2, %v5190_v10, 0 }
0x22f1   :  { %v8469_v32 = vpop.eup %8468 }
0x22f2   :  { %v5644_v18 = vmul.f32 %v8469_v32, %v8455_v61  ;;  %v5188_v41 = vpop.permute.xlu1 %5187 }
0x22f3   :  { %v5935_v58 = vsel %vm864_vm2, %v5188_v41, 0 }
0x22f4   :  { %7942 = vmatpush3.bf16.msra.mxu0 %v5935_v58  ;;  %v5652_v59 = vpack.c.bf16 %v5644_v18, %v5644_v18 }
0x22f5   :  { %v8471_v43 = vpop.eup %8470  ;;  %7953 = vmatprep.subr.bf16.mxu0 %v8536_v4 }
0x22f6   :  { %7938 = vmatmul.mubr.msk.bf16.vlgmr.msra.gmra.mrb[180].mxu1 %vm764_vm3, %v5652_v59  ;;  %v5646_v39 = vmul.f32 %v8471_v43, %v10175_v6 }
0x22f7   :  { %7948 = vmatpush3.bf16.msra.mxu1 %v5981_v11  ;;  %7949 = vmatprep.mubr.msk.bf16.mxu1 %vm8538_vm0, %v8536_v4 }
0x22f8   :  { %7973 = vmatprep.subr.bf16.mxu1 %v8536_v4  ;;  %v5654_v47 = vpack.c.bf16 %v5646_v39, %v5646_v39 }
0x22f9   :  { %v8473_v46 = vpop.eup %8472 }
0x22fa   :  { %v5645_v31 = vmul.f32 %v8473_v46, %v10179_v56 }
0x22fc   :  { %v5653_v28 = vpack.c.bf16 %v5645_v31, %v5645_v31 }
0x22fe   :  { %7944 = vmatmul.mubr.msk.bf16.vlgmr.msra.gmra.mrb[132].mxu0 %vm764_vm3, %v5653_v28  ;;  %7950 = vmatmul.mubr.msk.bf16.vlgmr.msra.gmra.mrb[184].mxu1 %vm764_vm3, %v5654_v47 }
0x22ff   :  { %7969 = vmatprep.mubr.msk.bf16.mxu0 %vm8538_vm0, %v8536_v4  ;;  %7989 = vmatprep.mubr.msk.bf16.mxu1 %vm8538_vm0, %v8536_v4 }
0x2300   :  { %7954 = vmatpush3.bf16.msra.mxu0 %v8282_v57 }
0x2301   :  { %7955 = vmatprep.subr.bf16.mxu0 %v8536_v4 }
0x2304   :  { %7956 = vmatpush3.bf16.msra.mxu0 %v8283_v37 }
0x2305   :  { %7957 = vmatprep.subr.bf16.mxu0 %v8536_v4 }
0x2308   :  { %7958 = vmatpush3.bf16.msra.mxu0 %v8284_v1 }
0x2309   :  { %7959 = vmatprep.subr.bf16.mxu0 %v8536_v4 }
0x230c   :  { %7960 = vmatpush3.bf16.msra.mxu0 %v8285_v50  ;;  %v8291_v50 = vld [vmem:[%s10379_s4 + $0xc8] sm:$0xff]  }
0x230d   :  { %7961 = vmatprep.subr.bf16.mxu0 %v8536_v4 }
0x2310   :  { %7962 = vmatpush3.bf16.msra.mxu0 %v8286_v16  ;;  %v8296_v16 = vld [vmem:[%s10379_s4 + $0xf0] sm:$0xff]  }
0x2311   :  { %7963 = vmatprep.subr.bf16.mxu0 %v8536_v4 }
0x2314   :  { %7964 = vmatpush3.bf16.msra.mxu0 %v8287_v17  ;;  %v8298_v17 = vld [vmem:[%s10380_s5 + $0xc0] sm:$0xff]  }
0x2315   :  { %7965 = vmatprep.subr.bf16.mxu0 %v8536_v4 }
0x2318   :  { %7966 = vmatpush3.bf16.msra.mxu0 %v8288_v52  ;;  %v8299_v52 = vld [vmem:[%s10380_s5 + $0xc8] sm:$0xff]  }
0x2319   :  { %7967 = vmatprep.subr.bf16.mxu0 %v8536_v4 }
0x231c   :  { %7968 = vmatpush3.bf16.msra.mxu0 %v8289_v22 }
0x231d   :  { %7993 = vmatprep.subr.bf16.mxu0 %v8536_v4 }
0x2321   :  { %v10224_v48 = vpop.f32.mrb[172].mxu1 }
0x2322   :  { %v7915_v27 = vpop.f32.mrb[173].mxu1 }
0x2323   :  { %v5744_v42 = vpop.f32.mrb[174].mxu1 }
0x2324   :  { %v7916_v51 = vpop.f32.mrb[175].mxu1 }
0x2337   :  { %v10226_v54 = vpop.f32.mrb[120].mxu0 }
0x2338   :  { %v7909_v38 = vpop.f32.mrb[121].mxu0 }
0x2339   :  { %v5698_v30 = vpop.f32.mrb[122].mxu0 }
0x233a   :  { %v7910_v35 = vpop.f32.mrb[123].mxu0 }
0x238c   :  { %v5787_v0 = vpop.f32.mrb[124].mxu0 }
0x238d   :  { %v7921_v34 = vpop.f32.mrb[125].mxu0 }
0x238e   :  { %v5790_v61 = vpop.f32.mrb[126].mxu0 }
0x238f   :  { %v7922_v6 = vpop.f32.mrb[127].mxu0 }
0x2394   :  { %v5833_v56 = vpop.f32.mrb[176].mxu1 }
0x2395   :  { %v8067_v36 = vpack.i.bf16 %v5833_v56, %v5787_v0  ;;  %v7927_v60 = vpop.f32.mrb[177].mxu1 }
0x2396   :  { %v5836_v33 = vpop.f32.mrb[178].mxu1 }
0x2397   :  { %8068 = vrot.lane.b32.xlu1 %v8067_v36, %s8541_s17  ;;  %v7928_v2 = vpop.f32.mrb[179].mxu1 }
0x2398   :  { %v5879_v55 = vpop.f32.mrb[128].mxu0  ;;  %v8292_v2 = vld [vmem:[%s10379_s4 + $0xd0] sm:$0xff]  }
0x2399   :  { %v7933_v62 = vpop.f32.mrb[129].mxu0 }
0x239a   :  { %v5882_v15 = vpop.f32.mrb[130].mxu0  ;;  %v8294_v62 = vld [vmem:[%s10379_s4 + $0xe0] sm:$0xff]  }
0x239b   :  { %v7934_v12 = vpop.f32.mrb[131].mxu0  ;;  %v8295_v15 = vld [vmem:[%s10379_s4 + $0xe8] sm:$0xff]  }
0x239c   :  { %v8297_v12 = vld [vmem:[%s10379_s4 + $0xf8] sm:$0xff]  }
0x23c9   :  { %v5925_v19 = vpop.f32.mrb[180].mxu1 }
0x23ca   :  { %v8072_v40 = vpack.i.bf16 %v5925_v19, %v5879_v55  ;;  %v7939_v3 = vpop.f32.mrb[181].mxu1  ;;  %v8293_v55 = vld [vmem:[%s10379_s4 + $0xd8] sm:$0xff]  }
0x23cb   :  { %v5928_v7 = vpop.f32.mrb[182].mxu1 }
0x23cc   :  { %8073 = vrot.lane.b32.xlu0 %v8072_v40, %s8540_s16  ;;  %v7940_v14 = vpop.f32.mrb[183].mxu1 }
0x23d1   :  { %v5971_v23 = vpop.f32.mrb[132].mxu0  ;;  %v6017_v45 = vpop.f32.mrb[184].mxu1 }
0x23d2   :  { %v8077_v8 = vpack.i.bf16 %v6017_v45, %v5971_v23  ;;  %v7945_v21 = vpop.f32.mrb[133].mxu0  ;;  %v7951_v24 = vpop.f32.mrb[185].mxu1 }
0x23d3   :  { %v5974_v26 = vpop.f32.mrb[134].mxu0  ;;  %v6020_v20 = vpop.f32.mrb[186].mxu1 }
0x23d4   :  { %v7946_v29 = vpop.f32.mrb[135].mxu0  ;;  %8078 = vrot.lane.b32.xlu1 %v8077_v8, %s8539_s15  ;;  %v7952_v32 = vpop.f32.mrb[187].mxu1  ;;  %v6191_v8 = vrot.slane %v10020_v63, %v9020_v5  ;;  %v6197_v20 = vrot.slane %v10020_v63, %v9025_v9  ;;  %v8301_v5 = vld [vmem:[%s10380_s5 + $0xd8] sm:$0xff]   ;;  %v8302_v9 = vld [vmem:[%s10380_s5 + $0xe0] sm:$0xff]  }
0x2409   :  { %v8069_v18 = vpop.permute.xlu1 %8068 }
0x240a   :  { %v8071_v10 = vunpack.i.h.bf16 %v8069_v18  ;;  %v8070_v58 = vunpack.i.l.bf16 %v8069_v18 }
0x240c   :  { %v6048_v39 = vsel %vm395_vm1, %v10224_v48, %v8071_v10  ;;  %v6047_v46 = vsel %vm395_vm1, %v10226_v54, %v8070_v58  ;;  %v6074_v48 = vrot.slane %v10020_v63, %v8962_v25  ;;  %v8290_v25 = vld [vmem:[%s10379_s4 + $0xc0] sm:$0xff]   ;;  %v8300_v10 = vld [vmem:[%s10380_s5 + $0xd0] sm:$0xff]   ;;  %v8303_v63 = vld [vmem:[%s10380_s5 + $0xe8] sm:$0xff]  }
0x240d   :  { %7974 = vmatpush3.bf16.msra.mxu1 %v8290_v25  ;;  %v8304_v58 = vld [vmem:[%s10380_s5 + $0xf0] sm:$0xff]  }
0x240e   :  { %7975 = vmatprep.subr.bf16.mxu1 %v8536_v4 }
0x2411   :  { %7976 = vmatpush3.bf16.msra.mxu1 %v8291_v50 }
0x2412   :  { %7977 = vmatprep.subr.bf16.mxu1 %v8536_v4 }
0x2415   :  { %7978 = vmatpush3.bf16.msra.mxu1 %v8292_v2 }
0x2416   :  { %7979 = vmatprep.subr.bf16.mxu1 %v8536_v4 }
0x2419   :  { %7980 = vmatpush3.bf16.msra.mxu1 %v8293_v55 }
0x241a   :  { %7981 = vmatprep.subr.bf16.mxu1 %v8536_v4 }
0x241d   :  { %7982 = vmatpush3.bf16.msra.mxu1 %v8294_v62 }
0x241e   :  { %7983 = vmatprep.subr.bf16.mxu1 %v8536_v4 }
0x2421   :  { %7984 = vmatpush3.bf16.msra.mxu1 %v8295_v15 }
0x2422   :  { %7985 = vmatprep.subr.bf16.mxu1 %v8536_v4 }
0x2425   :  { %7986 = vmatpush3.bf16.msra.mxu1 %v8296_v16 }
0x2426   :  { %7987 = vmatprep.subr.bf16.mxu1 %v8536_v4 }
0x2429   :  { %7988 = vmatpush3.bf16.msra.mxu1 %v8297_v12 }
0x243e   :  { %v8074_v41 = vpop.permute.xlu0 %8073 }
0x243f   :  { %v8076_v59 = vunpack.i.h.bf16 %v8074_v41  ;;  %v8075_v43 = vunpack.i.l.bf16 %v8074_v41 }
0x2441   :  { %v6050_v47 = vsel %vm1256_vm4, %v6048_v39, %v8076_v59  ;;  %v6049_v27 = vsel %vm1256_vm4, %v6047_v46, %v8075_v43  ;;  %v8305_v59 = vld [vmem:[%s10380_s5 + $0xf8] sm:$0xff]  }
0x2442   :  { %v6862_v43 = vld [vmem:[%s10381_s6 + $0x38] sm:$0x3] }
0x2443   :  { %v6342_v25 = vrot.slane %v6862_v43, %v8703_v49 }
0x2446   :  { %v8079_v11 = vpop.permute.xlu1 %8078 }
0x2447   :  { %v8081_v31 = vunpack.i.h.bf16 %v8079_v11  ;;  %v8080_v28 = vunpack.i.l.bf16 %v8079_v11  ;;  %v6221_v11 = vrot.slane %v6862_v43, %v8692_v44 }
0x2449   :  { %v6052_v42 = vsel %vm1259_vm5, %v6050_v47, %v8081_v31  ;;  %v6051_v51 = vsel %vm1259_vm5, %v6049_v27, %v8080_v28 }
0x244a   :  { %v6053_v38 = vpack.c.bf16 %v6052_v42, %v6051_v51 }
0x244c   :  { %7970 = vmatmul.mubr.bf16.vlgmr.msra.gmra.mrb[136].mxu0 %v6053_v38 }
0x244d   :  { %8009 = vmatprep.mubr.msk.bf16.mxu0 %vm8538_vm0, %v8536_v4  ;;  %7994 = vmatpush3.bf16.msra.mxu0 %v8298_v17 }
0x244e   :  { %7995 = vmatprep.subr.bf16.mxu0 %v8536_v4 }
0x2451   :  { %7996 = vmatpush3.bf16.msra.mxu0 %v8299_v52 }
0x2452   :  { %7997 = vmatprep.subr.bf16.mxu0 %v8536_v4 }
0x2455   :  { %7998 = vmatpush3.bf16.msra.mxu0 %v8300_v10 }
0x2456   :  { %7999 = vmatprep.subr.bf16.mxu0 %v8536_v4 }
0x2459   :  { %8000 = vmatpush3.bf16.msra.mxu0 %v8301_v5 }
0x245a   :  { %8001 = vmatprep.subr.bf16.mxu0 %v8536_v4 }
0x245d   :  { %8002 = vmatpush3.bf16.msra.mxu0 %v8302_v9 }
0x245e   :  { %8003 = vmatprep.subr.bf16.mxu0 %v8536_v4 }
0x2461   :  { %8004 = vmatpush3.bf16.msra.mxu0 %v8303_v63 }
0x2462   :  { %8005 = vmatprep.subr.bf16.mxu0 %v8536_v4 }
0x2465   :  { %8006 = vmatpush3.bf16.msra.mxu0 %v8304_v58 }
0x2466   :  { %8007 = vmatprep.subr.bf16.mxu0 %v8536_v4 }
0x2469   :  { %8008 = vmatpush3.bf16.msra.mxu0 %v8305_v59 }
0x251f   :  { %v6157_v30 = vpop.f32.mrb[136].mxu0 }
0x2520   :  { %v6158_v54 = vadd.f32 %v6157_v30, %v6074_v48  ;;  %v7971_v35 = vpop.f32.mrb[137].mxu0 }
0x2521   :  { %v6160_v0 = vpop.f32.mrb[138].mxu0 }
0x2522   :  { %v10276_v57 = vadd.f32 %v6158_v54, %v9927_v53  ;;  %v6161_v34 = vadd.f32 %v6160_v0, %v6074_v48  ;;  %v7972_v61 = vpop.f32.mrb[139].mxu0 }
0x2524   :  { %v10279_v37 = vadd.f32 %v6161_v34, %v9930_v13  ;;  %6166 = vadd.xlane.f32.xlu0 %v10276_v57 }
0x2526   :  { %6168 = vadd.xlane.f32.xlu1 %v10279_v37 }
0x25b1   :  { %v6167_v6 = vpop.xlane.xlu0 %6166 }
0x25b2   :  { %v6170_v1 = vmul.f32 0.0078125, %v6167_v6 }
0x25b3   :  { %v6169_v53 = vpop.xlane.xlu1 %6168 }
0x25b4   :  { %v6172_v56 = vsub.f32 %v10276_v57, %v6170_v1  ;;  %v6171_v36 = vmul.f32 0.0078125, %v6169_v53 }
0x25b6   :  { %v6173_v13 = vsub.f32 %v10279_v37, %v6171_v36  ;;  %v6174_v60 = vmul.f32 %v6172_v56, %v6172_v56 }
0x25b8   :  { %6176 = vadd.xlane.f32.xlu0 %v6174_v60  ;;  %v6175_v33 = vmul.f32 %v6173_v13, %v6173_v13 }
0x25bc   :  { %6178 = vadd.xlane.f32.xlu0 %v6175_v33 }
0x2645   :  { %v6177_v19 = vpop.xlane.xlu0 %6176 }
0x2646   :  { %v6180_v22 = vmul.f32 0.0078125, %v6177_v19 }
0x2648   :  { %v6182_v40 = vadd.f32 1e-05, %v6180_v22 }
0x2649   :  { %v6179_v3 = vpop.xlane.xlu0 %6178 }
0x264a   :  { %8474 = vrsqrt.f32 %v6182_v40  ;;  %v6181_v7 = vmul.f32 0.0078125, %v6179_v3 }
0x264c   :  { %v6183_v14 = vadd.f32 1e-05, %v6181_v7 }
0x264e   :  { %8476 = vrsqrt.f32 %v6183_v14 }
0x2654   :  { %v8475_v23 = vpop.eup %8474 }
0x2655   :  { %v6186_v45 = vmul.f32 %v8475_v23, %v6172_v56 }
0x2657   :  { %v6192_v26 = vmul.f32 %v6191_v8, %v6186_v45 }
0x2658   :  { %v8477_v21 = vpop.eup %8476 }
0x2659   :  { %v6187_v24 = vmul.f32 %v8477_v21, %v6173_v13  ;;  %v6198_v32 = vadd.f32 %v6197_v20, %v6192_v26 }
0x265b   :  { %v6193_v29 = vmul.f32 %v6191_v8, %v6187_v24 }
0x265d   :  { %v6199_v18 = vadd.f32 %v6197_v20, %v6193_v29 }
0x265f   :  { %v6200_v41 = vpack.c.bf16 %v6199_v18, %v6198_v32 }
0x2661   :  { %7990 = vmatmul.mubr.bf16.vlgmr.msra.gmra.mrb[188].mxu1 %v6200_v41 }
0x2734   :  { %v6304_v39 = vpop.f32.mrb[188].mxu1 }
0x2735   :  { %v6305_v46 = vadd.f32 %v6304_v39, %v6221_v11  ;;  %v7991_v31 = vpop.f32.mrb[189].mxu1 }
0x2736   :  { %v6307_v28 = vpop.f32.mrb[190].mxu1 }
0x2737   :  { %v6313_v47 = vmul.f32 0.70710677, %v6305_v46  ;;  %v6308_v27 = vadd.f32 %v6307_v28, %v6221_v11  ;;  %v7992_v42 = vpop.f32.mrb[191].mxu1  ;;  %v6311_v30 = vmul.f32 0.5, %v6305_v46 }
0x2739   :  { %8478 = verf.f32 %v6313_v47  ;;  %v6314_v4 = vmul.f32 0.70710677, %v6308_v27  ;;  %v6312_v54 = vmul.f32 0.5, %v6308_v27 }
0x273b   :  { %8480 = verf.f32 %v6314_v4 }
0x2743   :  { %v8479_v51 = vpop.eup %8478 }
0x2744   :  { %v6317_v38 = vadd.f32 1.0, %v8479_v51 }
0x2745   :  { %v8481_v48 = vpop.eup %8480 }
0x2746   :  { %v6318_v35 = vadd.f32 1.0, %v8481_v48  ;;  %v6319_v0 = vmul.f32 %v6317_v38, %v6311_v30 }
0x2748   :  { %v6320_v34 = vmul.f32 %v6318_v35, %v6312_v54 }
0x274a   :  { %v6321_v61 = vpack.c.bf16 %v6320_v34, %v6319_v0 }
0x274c   :  { %8010 = vmatmul.mubr.bf16.vlgmr.msra.gmra.mrb[140].mxu0 %v6321_v61 }
0x281f   :  { %v6425_v6 = vpop.f32.mrb[140].mxu0 }
0x2820   :  { %v6426_v1 = vadd.f32 %v6425_v6, %v6342_v25  ;;  %v8011_v53 = vpop.f32.mrb[141].mxu0 }
0x2821   :  { %v6428_v56 = vpop.f32.mrb[142].mxu0 }
0x2822   :  { %v6432_v36 = vadd.f32 %v6426_v1, %v10276_v57  ;;  %v6429_v13 = vadd.f32 %v6428_v56, %v6342_v25  ;;  %v8012_v60 = vpop.f32.mrb[143].mxu0 }
0x2824   :  { %v6433_v33 = vadd.f32 %v6429_v13, %v10279_v37  ;;  %6435 = vadd.xlane.f32.xlu0 %v6432_v36  ;;  %v6434_v37 = vld [vmem:[%s10382_s7] sm:$0x3] }
0x2825   :  { %v6460_v7 = vrot.slane %v6434_v37, %v8692_v44  ;;  %v6466_v45 = vrot.slane %v6434_v37, %v8703_v49 }
0x2826   :  { %6437 = vadd.xlane.f32.xlu1 %v6433_v33 }
0x28b1   :  { %v6436_v50 = vpop.xlane.xlu0 %6435 }
0x28b2   :  { %v6439_v2 = vmul.f32 0.0078125, %v6436_v50 }
0x28b3   :  { %v6438_v55 = vpop.xlane.xlu1 %6437 }
0x28b4   :  { %v6441_v62 = vsub.f32 %v6432_v36, %v6439_v2  ;;  %v6440_v15 = vmul.f32 0.0078125, %v6438_v55 }
0x28b6   :  { %v6442_v16 = vsub.f32 %v6433_v33, %v6440_v15  ;;  %v6443_v12 = vmul.f32 %v6441_v62, %v6441_v62 }
0x28b8   :  { %6445 = vadd.xlane.f32.xlu0 %v6443_v12  ;;  %v6444_v17 = vmul.f32 %v6442_v16, %v6442_v16 }
0x28ba   :  { %6447 = vadd.xlane.f32.xlu1 %v6444_v17 }
0x2945   :  { %v6446_v52 = vpop.xlane.xlu0 %6445 }
0x2946   :  { %v6449_v19 = vmul.f32 0.0078125, %v6446_v52 }
0x2947   :  { %v6448_v22 = vpop.xlane.xlu1 %6447 }
0x2948   :  { %v6451_v57 = vadd.f32 1e-05, %v6449_v19  ;;  %v6450_v40 = vmul.f32 0.0078125, %v6448_v22 }
0x294a   :  { %8482 = vrsqrt.f32 %v6451_v57  ;;  %v6452_v3 = vadd.f32 1e-05, %v6450_v40 }
0x294c   :  { %8484 = vrsqrt.f32 %v6452_v3 }
0x2954   :  { %v8483_v14 = vpop.eup %8482 }
0x2955   :  { %v6455_v23 = vmul.f32 %v8483_v14, %v6441_v62 }
0x2956   :  { %v8485_v8 = vpop.eup %8484 }
0x2957   :  { %v6456_v21 = vmul.f32 %v8485_v8, %v6442_v16  ;;  %v6461_v24 = vmul.f32 %v6460_v7, %v6455_v23 }
0x2959   :  { %v6462_v26 = vmul.f32 %v6460_v7, %v6456_v21  ;;  %v6467_v20 = vadd.f32 %v6466_v45, %v6461_v24 }
0x295b   :  { %v6468_v29 = vadd.f32 %v6466_v45, %v6462_v26  ;;  %6469 = vst [vmem:[#allocation2] sm:$0xff] %v6467_v20 }
0x295d   :  { %6470 = vst [vmem:[#allocation2 + $0x8] sm:$0xff] %v6468_v29 }
0x295e   :  { %8523 = shalt.err (!%p8520_p4)
}
0x295f   :  { %s8524_s26 = scalar_lea.hbm %s10383_s8, 256 }
0x2960   :  { %p8525_p5 = scmp.ne.s32.totalorder %s10383_s8, %s8524_s26  ;;  %p8528_p6 = scmp.lt.u32.totalorder %s8524_s26, %s10383_s8 }
0x2962   :  { %p8530_p7 = pnand %p8528_p6, %p8525_p5 }
0x2964   :  { %8533 = shalt.err (!%p8530_p7)
}
0x2965   :  { %s8543_s2 = smov 128   ;;  %s8544_s9 = smov 8  }
0x2966   :  { %6482 = dma.vmem_to_hbm [thread:$0]  %s6477_s24, 256, %s10383_s8, [#allocation3], %s8543_s2, %s8543_s2, %s8544_s9  }
0x2967   :  { %8534 = dma.done.wait [#allocation3], 256  }
0x2968   :  { %8535 = vsyncadd [#allocation3], 4294967040 }
0x2969   :  { %6486 = vsyncpa [#allocation3], 1 }

</bundles_post_ra>
